<compile_context>
chip_gen: v7x
topology: tpu7x:2x2x1
jax: 0.10.0
libtpu: 0.0.40
codegen_flags: <defaults>
</compile_context>

<pallas_src>
import jax
import jax.numpy as jnp
import numpy as np
from jax.experimental import pallas as pl
from jax.experimental.pallas import tpu as pltpu


# ----------------------------------------------------------------------------
# Fused kernel (conv stack + LSTM stack), built per static configuration
# ----------------------------------------------------------------------------
def _make_fused_kernel(conv_shapes, n_lstm, H, BP, T):
    """conv_shapes: [(K, Cin, Cout)]; H: lstm hidden; BP: padded rows per timestep."""
    n_conv = len(conv_shapes)
    TB = T * BP

    def shift_time(z, d):
        # Row t*BP+b of the result holds z[(t+d)*BP + b]; zero outside [0, T).
        # All pieces are 8-row (sublane-granule) aligned -> clean vreg copies.
        if d == 0:
            return z
        step = abs(d) * BP
        zero = jnp.zeros((step, z.shape[1]), z.dtype)
        if d < 0:
            return jnp.concatenate([zero, z[:TB - step, :]], axis=0)
        return jnp.concatenate([z[step:, :], zero], axis=0)

    def cell(g, c):
        # LSTM cell update, gate order (i, f, g, o); full-width stable sigmoid (EUP).
        sg = 0.5 * (jnp.tanh(0.5 * g) + 1.0)
        th = jnp.tanh(g)
        c_new = sg[:, H:2 * H] * c + sg[:, :H] * th[:, 2 * H:3 * H]
        h_new = sg[:, 3 * H:] * jnp.tanh(c_new)
        return h_new, c_new

    def kernel(*refs):
        it = iter(refs)
        x_ref = next(it)                                           # (TB, K0*Cin0) bf16 pre-tapped
        conv_refs = [(next(it), next(it)) for _ in range(n_conv)]  # (w_tap bf16, shift f32)
        if n_lstm == 2:
            wih1_ref, b1_ref, wblk_ref, b2_ref = next(it), next(it), next(it), next(it)
            lstm_refs = None
        else:
            lstm_refs = [(next(it), next(it), next(it)) for _ in range(n_lstm)]
        out_ref = next(it)                                         # (BP, H) f32
        gx_ref = next(it)                                          # (TB, 4H) f32 scratch

        # ---------------- CNN stack: Conv1d('same') + folded BN(eval) + ReLU ----------------
        z = None
        for li, ((K, cin, cout), (w_ref, s_ref)) in enumerate(zip(conv_shapes, conv_refs)):
            pad = K // 2
            if li == 0:
                lhs = x_ref[...]                                   # taps pre-built by wrapper
            else:
                taps = [shift_time(z, j - pad) for j in range(K)]
                lhs = jnp.concatenate(taps, axis=1).astype(jnp.bfloat16)   # (TB, K*Cin)
            acc = jnp.dot(lhs, w_ref[...], preferred_element_type=jnp.float32)  # one MXU pass
            z = jnp.maximum(acc + s_ref[...], 0.0)                 # (TB, Cout) f32

        # ---------------- LSTM stack ----------------
        if n_lstm == 2:
            # Hoisted layer-1 input projection: one aligned (TB,F)x(F,4H) matmul + bulk store.
            gx_ref[...] = jnp.dot(z.astype(jnp.bfloat16), wih1_ref[...],
                                  preferred_element_type=jnp.float32) + b1_ref[...]
            wblk = wblk_ref[...]                                   # (2H, 8H) bf16 block weight
            b2 = b2_ref[...]                                       # (1, 4H) f32
            h1 = jnp.zeros((BP, H), jnp.float32); c1 = jnp.zeros((BP, H), jnp.float32)
            h2 = jnp.zeros((BP, H), jnp.float32); c2 = jnp.zeros((BP, H), jnp.float32)
            # Wavefront: at step s, layer 1 computes time s while layer 2 computes time s-1.
            # State entering step s: h1=h1_{s-1}, c1=c1_{s-1}, h2=h2_{s-2}, c2=c2_{s-2}.
            for s in range(T + 1):
                lhs = jnp.concatenate([h1, h2], axis=1).astype(jnp.bfloat16)   # (BP, 2H)
                gg = jnp.dot(lhs, wblk, preferred_element_type=jnp.float32)    # (BP, 8H)
                h1_n, c1_n = h1, c1
                if s < T:      # layer-1 gates: hoisted x-projection + h1_{s-1} @ whh1
                    h1_n, c1_n = cell(gx_ref[s * BP:(s + 1) * BP, :] + gg[:, :4 * H], c1)
                if s >= 1:     # layer-2 gates: h1_{s-1} @ wih2 + h2_{s-2} @ whh2 + bias
                    h2, c2 = cell(gg[:, 4 * H:] + b2, c2)
                h1, c1 = h1_n, c1_n
            out_ref[...] = h2                                      # out[:, -1] of last layer
        else:
            # Generic sequential fallback (any number of layers), fully in-register.
            h = None
            for li, (wih_ref, whh_ref, b_ref) in enumerate(lstm_refs):
                gx_ref[...] = jnp.dot(z.astype(jnp.bfloat16), wih_ref[...],
                                      preferred_element_type=jnp.float32) + b_ref[...]
                whh = whh_ref[...]
                h = jnp.zeros((BP, H), jnp.float32); c = jnp.zeros((BP, H), jnp.float32)
                hs = []
                for t in range(T):
                    g = gx_ref[t * BP:(t + 1) * BP, :] + jnp.dot(
                        h.astype(jnp.bfloat16), whh, preferred_element_type=jnp.float32)
                    h, c = cell(g, c)
                    if li < n_lstm - 1:
                        hs.append(h)
                if li < n_lstm - 1:
                    z = jnp.concatenate(hs, axis=0)                # (TB, H) for next layer
            out_ref[...] = h

    return kernel


# ----------------------------------------------------------------------------
# Wrapper: weight prep (BN folding, bf16 casts, block weights) + single pallas_call
# ----------------------------------------------------------------------------
@jax.jit
def convlstm_forward(x, params):
    """x: (B, T, 1) -- matches the torch module, whose forward transposes into Conv1d."""
    B, T, cin0 = x.shape
    BP = ((B + 7) // 8) * 8                        # pad batch rows to the 8-sublane granule

    # ---- conv weights: fold BatchNorm (eval), flatten taps -> (K*Cin, Cout), cast bf16 ----
    conv_shapes, conv_inputs = [], []
    in_ch = cin0
    for p in params["cnn"]:
        w = p["w"].astype(jnp.float32)             # torch layout (Cout, Cin, K)
        cout, cin, K = w.shape
        assert K % 2 == 1 and cin == in_ch
        scale = p["gamma"].astype(jnp.float32) * jax.lax.rsqrt(p["var"].astype(jnp.float32) + 1e-5)
        w_tap = (jnp.transpose(w, (2, 1, 0)) * scale[None, None, :]).reshape(K * cin, cout)
        shift = ((p["b"].astype(jnp.float32) - p["mean"].astype(jnp.float32)) * scale
                 + p["beta"].astype(jnp.float32)).reshape(1, cout)
        conv_shapes.append((K, cin, cout))
        conv_inputs += [w_tap.astype(jnp.bfloat16), shift]
        in_ch = cout

    # ---- input: pre-build first conv's K-tap LHS (time-major, batch padded to BP) ----
    K0 = conv_shapes[0][0]
    pad0 = K0 // 2
    xt = jnp.swapaxes(x, 0, 1).astype(jnp.float32)                 # (T, B, Cin0)
    if BP != B:
        xt = jnp.pad(xt, ((0, 0), (0, BP - B), (0, 0)))
    xp = jnp.pad(xt, ((pad0, pad0), (0, 0), (0, 0)))
    x_taps = jnp.concatenate([xp[j:j + T] for j in range(K0)], axis=-1)  # (T, BP, K0*Cin0)
    x_taps = x_taps.reshape(T * BP, K0 * cin0).astype(jnp.bfloat16)

    # ---- LSTM weights ----
    n_lstm = len(params["lstm"])
    H = params["lstm"][0]["whh"].shape[1]
    if n_lstm == 2:
        p1, p2 = params["lstm"]
        wih1 = p1["wih"].T.astype(jnp.bfloat16)                    # (F, 4H)
        b1 = (p1["bih"] + p1["bhh"]).reshape(1, 4 * H).astype(jnp.float32)
        # Fused recurrent block weight: LHS rows [h1_{s-1} ; h2_{s-2}],
        # columns [layer-1 gates | layer-2 gates] -> one 256-wide MXU pass / wavefront step.
        wblk = jnp.zeros((2 * H, 8 * H), jnp.float32)
        wblk = wblk.at[:H, :4 * H].set(p1["whh"].T.astype(jnp.float32))
        wblk = wblk.at[:H, 4 * H:].set(p2["wih"].T.astype(jnp.float32))
        wblk = wblk.at[H:, 4 * H:].set(p2["whh"].T.astype(jnp.float32))
        b2 = (p2["bih"] + p2["bhh"]).reshape(1, 4 * H).astype(jnp.float32)
        lstm_inputs = [wih1, b1, wblk.astype(jnp.bfloat16), b2]
    else:
        lstm_inputs = []
        for p in params["lstm"]:
            lstm_inputs += [p["wih"].T.astype(jnp.bfloat16),
                            p["whh"].T.astype(jnp.bfloat16),
                            (p["bih"] + p["bhh"]).reshape(1, 4 * H).astype(jnp.float32)]

    inputs = [x_taps] + conv_inputs + lstm_inputs
    in_specs = [pl.BlockSpec(a.shape, lambda i: (0, 0)) for a in inputs]   # all inputs are 2-D

    # Advisory cost estimate so XLA schedules the surrounding tiny ops sensibly.
    flops = 0
    for (K, cin, cout) in conv_shapes:
        flops += 2 * T * BP * K * cin * cout
    if n_lstm == 2:
        flops += 2 * T * BP * in_ch * 4 * H + 2 * (T + 1) * BP * 2 * H * 8 * H
    else:
        in_f = in_ch
        for _ in range(n_lstm):
            flops += 2 * T * BP * in_f * 4 * H + 2 * T * BP * H * 4 * H
            in_f = H
    transcendentals = n_lstm * T * BP * 9 * H
    bytes_accessed = int(sum(int(np.prod(a.shape)) * a.dtype.itemsize for a in inputs)
                         + BP * H * 4)

    kernel = _make_fused_kernel(conv_shapes, n_lstm, H, BP, T)
    out = pl.pallas_call(
        kernel,
        out_shape=jax.ShapeDtypeStruct((BP, H), jnp.float32),
        grid_spec=pltpu.PrefetchScalarGridSpec(
            num_scalar_prefetch=0,
            grid=(1,),
            in_specs=in_specs,
            out_specs=pl.BlockSpec((BP, H), lambda i: (0, 0)),
            scratch_shapes=[pltpu.VMEM((T * BP, 4 * H), jnp.float32)],   # hoisted layer-1 gates
        ),
        compiler_params=pltpu.CompilerParams(
            dimension_semantics=("arbitrary",),
            vmem_limit_bytes=32 * 1024 * 1024),
        cost_estimate=pl.CostEstimate(flops=flops, transcendentals=transcendentals,
                                      bytes_accessed=bytes_accessed),
    )(*inputs)
    return out[:B]
    # TODO(synk): LSTM inter-layer dropout omitted (eval mode / dropout=0.0 -> no-op).


# ----------------------------------------------------------------------------
# Pure-JAX references
# ----------------------------------------------------------------------------
def ref_forward(x, params):
    """PyTorch-faithful fp32 reference (unfolded BN, lax.scan recurrence)."""
    z = x.astype(jnp.float32)
    for p in params["cnn"]:
        w, b = p["w"], p["b"]
        K = w.shape[2]
        T = z.shape[1]
        zp = jnp.pad(z, ((0, 0), (K // 2, K // 2), (0, 0)))
        acc = b[None, None, :]
        for dt in range(K):
            acc = acc + jnp.einsum("btc,oc->bto", zp[:, dt:dt + T, :], w[:, :, dt])
        acc = (acc - p["mean"]) / jnp.sqrt(p["var"] + 1e-5) * p["gamma"] + p["beta"]
        z = jnp.maximum(acc, 0.0)

    for p in params["lstm"]:
        wih, whh, bih, bhh = p["wih"], p["whh"], p["bih"], p["bhh"]
        B = z.shape[0]
        H = whh.shape[1]

        def step(carry, x_t):
            h, c = carry
            g = x_t @ wih.T + h @ whh.T + bih + bhh
            i = jax.nn.sigmoid(g[:, :H])
            f = jax.nn.sigmoid(g[:, H:2 * H])
            gg = jnp.tanh(g[:, 2 * H:3 * H])
            o = jax.nn.sigmoid(g[:, 3 * H:])
            c = f * c + i * gg
            h = o * jnp.tanh(c)
            return (h, c), h

        init = (jnp.zeros((B, H), jnp.float32), jnp.zeros((B, H), jnp.float32))
        _, hs = jax.lax.scan(step, init, jnp.swapaxes(z, 0, 1))
        z = jnp.swapaxes(hs, 0, 1)
    return z[:, -1]


def ref_forward_bf16(x, params):
    """Mirrors the kernel's numerics: folded BN + bf16 MXU operands, f32 accumulate/state."""
    bf = jnp.bfloat16
    z = x.astype(jnp.float32)
    for p in params["cnn"]:
        w = p["w"].astype(jnp.float32)
        cout, cin, K = w.shape
        T = z.shape[1]
        scale = p["gamma"] * jax.lax.rsqrt(p["var"] + 1e-5)
        w_tap = (jnp.transpose(w, (2, 1, 0)) * scale[None, None, :]).reshape(K * cin, cout)
        shift = (p["b"] - p["mean"]) * scale + p["beta"]
        zp = jnp.pad(z, ((0, 0), (K // 2, K // 2), (0, 0)))
        taps = jnp.concatenate([zp[:, j:j + T, :] for j in range(K)], axis=-1)
        acc = jnp.einsum("btk,ko->bto", taps.astype(bf), w_tap.astype(bf),
                         preferred_element_type=jnp.float32)
        z = jnp.maximum(acc + shift[None, None, :], 0.0)

    for p in params["lstm"]:
        wihT = p["wih"].T.astype(bf)
        whhT = p["whh"].T.astype(bf)
        bias = (p["bih"] + p["bhh"]).astype(jnp.float32)
        B = z.shape[0]
        H = p["whh"].shape[1]

        def step(carry, x_t):
            h, c = carry
            g = (jnp.dot(x_t.astype(bf), wihT, preferred_element_type=jnp.float32)
                 + jnp.dot(h.astype(bf), whhT, preferred_element_type=jnp.float32) + bias)
            i = jax.nn.sigmoid(g[:, :H])
            f = jax.nn.sigmoid(g[:, H:2 * H])
            gc = jnp.tanh(g[:, 2 * H:3 * H])
            o = jax.nn.sigmoid(g[:, 3 * H:])
            c = f * c + i * gc
            h = o * jnp.tanh(c)
            return (h, c), h

        init = (jnp.zeros((B, H), jnp.float32), jnp.zeros((B, H), jnp.float32))
        _, hs = jax.lax.scan(step, init, jnp.swapaxes(z, 0, 1))
        z = jnp.swapaxes(hs, 0, 1)
    return z[:, -1]


# ----------------------------------------------------------------------------
# Deterministic parameter construction (shapes match the torch module __init__)
# ----------------------------------------------------------------------------
def make_params(key, cnn_kernel, cnn_filters, lstm_hidden, lstm_layers):
    params = {"cnn": [], "lstm": []}
    in_ch = 1
    for f in cnn_filters:
        key, k1, k2, k3, k4, k5, k6 = jax.random.split(key, 7)
        params["cnn"].append({
            "w": 0.3 * jax.random.normal(k1, (f, in_ch, cnn_kernel), jnp.float32),
            "b": 0.1 * jax.random.normal(k2, (f,), jnp.float32),
            "gamma": 1.0 + 0.1 * jax.random.normal(k3, (f,), jnp.float32),
            "beta": 0.1 * jax.random.normal(k4, (f,), jnp.float32),
            "mean": 0.1 * jax.random.normal(k5, (f,), jnp.float32),
            "var": 0.5 + jnp.abs(jax.random.normal(k6, (f,), jnp.float32)),
        })
        in_ch = f
    in_f = cnn_filters[-1]
    for _ in range(lstm_layers):
        key, k1, k2, k3, k4 = jax.random.split(key, 5)
        params["lstm"].append({
            "wih": 0.2 * jax.random.normal(k1, (4 * lstm_hidden, in_f), jnp.float32),
            "whh": 0.2 * jax.random.normal(k2, (4 * lstm_hidden, lstm_hidden), jnp.float32),
            "bih": 0.1 * jax.random.normal(k3, (4 * lstm_hidden,), jnp.float32),
            "bhh": 0.1 * jax.random.normal(k4, (4 * lstm_hidden,), jnp.float32),
        })
        in_f = lstm_hidden
    return params


if __name__ == "__main__":
    # cfg: cnn_kernel=3, cnn_filters=[8, 16], lstm_hidden=32, lstm_layers=2, dropout=0.0
    B, T = 4, 16
    CNN_KERNEL = 3
    CNN_FILTERS = (8, 16)
    LSTM_HIDDEN = 32
    LSTM_LAYERS = 2

    key = jax.random.PRNGKey(0)
    key, xkey = jax.random.split(key)
    x = jax.random.normal(xkey, (B, T, 1), jnp.float32)   # (batch, seq, features=1)

    params = make_params(key, CNN_KERNEL, CNN_FILTERS, LSTM_HIDDEN, LSTM_LAYERS)

    out = jax.block_until_ready(convlstm_forward(x, params))
    assert out.shape == (B, LSTM_HIDDEN)

    # Tight check against a reference that mirrors the kernel's bf16-operand matmuls.
    ref_b = jax.block_until_ready(ref_forward_bf16(x, params))
    np.testing.assert_allclose(np.asarray(out), np.asarray(ref_b), rtol=3e-3, atol=3e-3)

    # Looser check against the PyTorch-faithful fp32 reference (tolerance covers the
    # bf16 MXU-operand quantization requested by the perf review).
    ref_f = jax.block_until_ready(ref_forward(x, params))
    np.testing.assert_allclose(np.asarray(out), np.asarray(ref_f), rtol=2.5e-2, atol=2.5e-2)

    print("KERNEL_OK")
</pallas_src>

<mosaic_0001>
module attributes {stable_mosaic.version = 11 : i64} {
  func.func @kernel(%arg0: i32, %arg1: memref<128x3xbf16, #tpu.memory_space<vmem>>, %arg2: memref<3x8xbf16, #tpu.memory_space<vmem>>, %arg3: memref<1x8xf32, #tpu.memory_space<vmem>>, %arg4: memref<24x16xbf16, #tpu.memory_space<vmem>>, %arg5: memref<1x16xf32, #tpu.memory_space<vmem>>, %arg6: memref<16x128xbf16, #tpu.memory_space<vmem>>, %arg7: memref<1x128xf32, #tpu.memory_space<vmem>>, %arg8: memref<64x256xbf16, #tpu.memory_space<vmem>>, %arg9: memref<1x128xf32, #tpu.memory_space<vmem>>, %arg10: memref<8x32xf32, #tpu.memory_space<vmem>>, %arg11: memref<128x128xf32, #tpu.memory_space<vmem>>) attributes {dimension_semantics = [#tpu.dimension_semantics<arbitrary>], iteration_bounds = array<i64: 1>, scalar_prefetch = 0 : i64, scratch_operands = 1 : i64, tpu.core_type = #tpu.core_type<tc>, window_params = [{pipeline_mode = #tpu.pipeline_mode<synchronous>, transform_indices = @transform_0, window_bounds = array<i64: 128, 3>}, {pipeline_mode = #tpu.pipeline_mode<synchronous>, transform_indices = @transform_1, window_bounds = array<i64: 3, 8>}, {pipeline_mode = #tpu.pipeline_mode<synchronous>, transform_indices = @transform_2, window_bounds = array<i64: 1, 8>}, {pipeline_mode = #tpu.pipeline_mode<synchronous>, transform_indices = @transform_3, window_bounds = array<i64: 24, 16>}, {pipeline_mode = #tpu.pipeline_mode<synchronous>, transform_indices = @transform_4, window_bounds = array<i64: 1, 16>}, {pipeline_mode = #tpu.pipeline_mode<synchronous>, transform_indices = @transform_5, window_bounds = array<i64: 16, 128>}, {pipeline_mode = #tpu.pipeline_mode<synchronous>, transform_indices = @transform_6, window_bounds = array<i64: 1, 128>}, {pipeline_mode = #tpu.pipeline_mode<synchronous>, transform_indices = @transform_7, window_bounds = array<i64: 64, 256>}, {pipeline_mode = #tpu.pipeline_mode<synchronous>, transform_indices = @transform_8, window_bounds = array<i64: 1, 128>}, {pipeline_mode = #tpu.pipeline_mode<synchronous>, transform_indices = @transform_9, window_bounds = array<i64: 8, 32>}]} {
    %c0 = arith.constant 0 : index
    %c0_0 = arith.constant 0 : index
    %0 = vector.load %arg1[%c0, %c0_0] : memref<128x3xbf16, #tpu.memory_space<vmem>>, vector<128x3xbf16>
    %c0_1 = arith.constant 0 : index
    %c0_2 = arith.constant 0 : index
    %1 = vector.load %arg2[%c0_1, %c0_2] : memref<3x8xbf16, #tpu.memory_space<vmem>>, vector<3x8xbf16>
    %cst = arith.constant dense<0.000000e+00> : vector<128x8xf32>
    %2 = tpu.matmul %0, %1, %cst {dimension_numbers = #tpu.dot_dimension_numbers<[1], [0], [0], [1], [0, 0, 1, 1], [], []>} : vector<128x3xbf16>, vector<3x8xbf16>, vector<128x8xf32> -> vector<128x8xf32>
    %c0_3 = arith.constant 0 : index
    %c0_4 = arith.constant 0 : index
    %3 = vector.load %arg3[%c0_3, %c0_4] : memref<1x8xf32, #tpu.memory_space<vmem>>, vector<1x8xf32>
    %4 = vector.broadcast %3 : vector<1x8xf32> to vector<128x8xf32>
    %5 = arith.addf %2, %4 : vector<128x8xf32>
    %cst_5 = arith.constant 0.000000e+00 : f32
    %6 = vector.broadcast %cst_5 : f32 to vector<128x8xf32>
    %7 = arith.maximumf %5, %6 : vector<128x8xf32>
    %cst_6 = arith.constant 0.000000e+00 : f32
    %8 = vector.broadcast %cst_6 : f32 to vector<8x8xf32>
    %9 = vector.extract_strided_slice %7 {offsets = [0, 0], sizes = [120, 8], strides = [1, 1]} : vector<128x8xf32> to vector<120x8xf32>
    %10 = tpu.concatenate %8, %9 in 0 : vector<8x8xf32>, vector<120x8xf32> -> vector<128x8xf32>
    %cst_7 = arith.constant 0.000000e+00 : f32
    %11 = vector.broadcast %cst_7 : f32 to vector<8x8xf32>
    %12 = vector.extract_strided_slice %7 {offsets = [8, 0], sizes = [120, 8], strides = [1, 1]} : vector<128x8xf32> to vector<120x8xf32>
    %13 = tpu.concatenate %12, %11 in 0 : vector<120x8xf32>, vector<8x8xf32> -> vector<128x8xf32>
    %14 = tpu.concatenate %10, %7, %13 in 1 : vector<128x8xf32>, vector<128x8xf32>, vector<128x8xf32> -> vector<128x24xf32>
    %15 = arith.truncf %14 : vector<128x24xf32> to vector<128x24xbf16>
    %c0_8 = arith.constant 0 : index
    %c0_9 = arith.constant 0 : index
    %16 = vector.load %arg4[%c0_8, %c0_9] : memref<24x16xbf16, #tpu.memory_space<vmem>>, vector<24x16xbf16>
    %cst_10 = arith.constant dense<0.000000e+00> : vector<128x16xf32>
    %17 = tpu.matmul %15, %16, %cst_10 {dimension_numbers = #tpu.dot_dimension_numbers<[1], [0], [0], [1], [0, 0, 1, 1], [], []>} : vector<128x24xbf16>, vector<24x16xbf16>, vector<128x16xf32> -> vector<128x16xf32>
    %c0_11 = arith.constant 0 : index
    %c0_12 = arith.constant 0 : index
    %18 = vector.load %arg5[%c0_11, %c0_12] : memref<1x16xf32, #tpu.memory_space<vmem>>, vector<1x16xf32>
    %19 = vector.broadcast %18 : vector<1x16xf32> to vector<128x16xf32>
    %20 = arith.addf %17, %19 : vector<128x16xf32>
    %cst_13 = arith.constant 0.000000e+00 : f32
    %21 = vector.broadcast %cst_13 : f32 to vector<128x16xf32>
    %22 = arith.maximumf %20, %21 : vector<128x16xf32>
    %23 = arith.truncf %22 : vector<128x16xf32> to vector<128x16xbf16>
    %c0_14 = arith.constant 0 : index
    %c0_15 = arith.constant 0 : index
    %24 = vector.load %arg6[%c0_14, %c0_15] : memref<16x128xbf16, #tpu.memory_space<vmem>>, vector<16x128xbf16>
    %cst_16 = arith.constant dense<0.000000e+00> : vector<128x128xf32>
    %25 = tpu.matmul %23, %24, %cst_16 {dimension_numbers = #tpu.dot_dimension_numbers<[1], [0], [0], [1], [0, 0, 1, 1], [], []>} : vector<128x16xbf16>, vector<16x128xbf16>, vector<128x128xf32> -> vector<128x128xf32>
    %c0_17 = arith.constant 0 : index
    %c0_18 = arith.constant 0 : index
    %26 = vector.load %arg7[%c0_17, %c0_18] : memref<1x128xf32, #tpu.memory_space<vmem>>, vector<1x128xf32>
    %27 = vector.broadcast %26 : vector<1x128xf32> to vector<128x128xf32>
    %28 = arith.addf %25, %27 : vector<128x128xf32>
    %c0_19 = arith.constant 0 : index
    %c0_20 = arith.constant 0 : index
    %29 = vector.load %arg11[%c0_19, %c0_20] : memref<128x128xf32, #tpu.memory_space<vmem>>, vector<128x128xf32>
    tpu.vector_store %arg11[%c0_19, %c0_20], %28 {strides = array<i32>} : memref<128x128xf32, #tpu.memory_space<vmem>>, vector<128x128xf32>,
    %c0_21 = arith.constant 0 : index
    %c0_22 = arith.constant 0 : index
    %30 = vector.load %arg8[%c0_21, %c0_22] : memref<64x256xbf16, #tpu.memory_space<vmem>>, vector<64x256xbf16>
    %c0_23 = arith.constant 0 : index
    %c0_24 = arith.constant 0 : index
    %31 = vector.load %arg9[%c0_23, %c0_24] : memref<1x128xf32, #tpu.memory_space<vmem>>, vector<1x128xf32>
    %cst_25 = arith.constant 0.000000e+00 : f32
    %32 = vector.broadcast %cst_25 : f32 to vector<8x32xf32>
    %cst_26 = arith.constant 0.000000e+00 : f32
    %33 = vector.broadcast %cst_26 : f32 to vector<8x32xf32>
    %cst_27 = arith.constant 0.000000e+00 : f32
    %34 = vector.broadcast %cst_27 : f32 to vector<8x32xf32>
    %cst_28 = arith.constant 0.000000e+00 : f32
    %35 = vector.broadcast %cst_28 : f32 to vector<8x32xf32>
    %36 = tpu.concatenate %32, %34 in 1 : vector<8x32xf32>, vector<8x32xf32> -> vector<8x64xf32>
    %37 = arith.truncf %36 : vector<8x64xf32> to vector<8x64xbf16>
    %cst_29 = arith.constant dense<0.000000e+00> : vector<8x256xf32>
    %38 = tpu.matmul %37, %30, %cst_29 {dimension_numbers = #tpu.dot_dimension_numbers<[1], [0], [0], [1], [0, 0, 1, 1], [], []>} : vector<8x64xbf16>, vector<64x256xbf16>, vector<8x256xf32> -> vector<8x256xf32>
    %c0_30 = arith.constant 0 : index
    %c0_31 = arith.constant 0 : index
    %39 = vector.load %arg11[%c0_30, %c0_31] : memref<128x128xf32, #tpu.memory_space<vmem>>, vector<8x128xf32>
    %40 = vector.extract_strided_slice %38 {offsets = [0, 0], sizes = [8, 128], strides = [1, 1]} : vector<8x256xf32> to vector<8x128xf32>
    %41 = arith.addf %39, %40 : vector<8x128xf32>
    %cst_32 = arith.constant 5.000000e-01 : f32
    %42 = vector.broadcast %cst_32 : f32 to vector<8x128xf32>
    %43 = arith.mulf %42, %41 : vector<8x128xf32>
    %44 = math.tanh %43 : vector<8x128xf32>
    %cst_33 = arith.constant 1.000000e+00 : f32
    %45 = vector.broadcast %cst_33 : f32 to vector<8x128xf32>
    %46 = arith.addf %44, %45 : vector<8x128xf32>
    %cst_34 = arith.constant 5.000000e-01 : f32
    %47 = vector.broadcast %cst_34 : f32 to vector<8x128xf32>
    %48 = arith.mulf %47, %46 : vector<8x128xf32>
    %49 = math.tanh %41 : vector<8x128xf32>
    %50 = vector.extract_strided_slice %48 {offsets = [0, 32], sizes = [8, 32], strides = [1, 1]} : vector<8x128xf32> to vector<8x32xf32>
    %51 = arith.mulf %50, %33 : vector<8x32xf32>
    %52 = vector.extract_strided_slice %48 {offsets = [0, 0], sizes = [8, 32], strides = [1, 1]} : vector<8x128xf32> to vector<8x32xf32>
    %53 = vector.extract_strided_slice %49 {offsets = [0, 64], sizes = [8, 32], strides = [1, 1]} : vector<8x128xf32> to vector<8x32xf32>
    %54 = arith.mulf %52, %53 : vector<8x32xf32>
    %55 = arith.addf %51, %54 : vector<8x32xf32>
    %56 = vector.extract_strided_slice %48 {offsets = [0, 96], sizes = [8, 32], strides = [1, 1]} : vector<8x128xf32> to vector<8x32xf32>
    %57 = math.tanh %55 : vector<8x32xf32>
    %58 = arith.mulf %56, %57 : vector<8x32xf32>
    %59 = tpu.concatenate %58, %34 in 1 : vector<8x32xf32>, vector<8x32xf32> -> vector<8x64xf32>
    %60 = arith.truncf %59 : vector<8x64xf32> to vector<8x64xbf16>
    %cst_35 = arith.constant dense<0.000000e+00> : vector<8x256xf32>
    %61 = tpu.matmul %60, %30, %cst_35 {dimension_numbers = #tpu.dot_dimension_numbers<[1], [0], [0], [1], [0, 0, 1, 1], [], []>} : vector<8x64xbf16>, vector<64x256xbf16>, vector<8x256xf32> -> vector<8x256xf32>
    %c8 = arith.constant 8 : index
    %c0_36 = arith.constant 0 : index
    %62 = vector.load %arg11[%c8, %c0_36] : memref<128x128xf32, #tpu.memory_space<vmem>>, vector<8x128xf32>
    %63 = vector.extract_strided_slice %61 {offsets = [0, 0], sizes = [8, 128], strides = [1, 1]} : vector<8x256xf32> to vector<8x128xf32>
    %64 = arith.addf %62, %63 : vector<8x128xf32>
    %cst_37 = arith.constant 5.000000e-01 : f32
    %65 = vector.broadcast %cst_37 : f32 to vector<8x128xf32>
    %66 = arith.mulf %65, %64 : vector<8x128xf32>
    %67 = math.tanh %66 : vector<8x128xf32>
    %cst_38 = arith.constant 1.000000e+00 : f32
    %68 = vector.broadcast %cst_38 : f32 to vector<8x128xf32>
    %69 = arith.addf %67, %68 : vector<8x128xf32>
    %cst_39 = arith.constant 5.000000e-01 : f32
    %70 = vector.broadcast %cst_39 : f32 to vector<8x128xf32>
    %71 = arith.mulf %70, %69 : vector<8x128xf32>
    %72 = math.tanh %64 : vector<8x128xf32>
    %73 = vector.extract_strided_slice %71 {offsets = [0, 32], sizes = [8, 32], strides = [1, 1]} : vector<8x128xf32> to vector<8x32xf32>
    %74 = arith.mulf %73, %55 : vector<8x32xf32>
    %75 = vector.extract_strided_slice %71 {offsets = [0, 0], sizes = [8, 32], strides = [1, 1]} : vector<8x128xf32> to vector<8x32xf32>
    %76 = vector.extract_strided_slice %72 {offsets = [0, 64], sizes = [8, 32], strides = [1, 1]} : vector<8x128xf32> to vector<8x32xf32>
    %77 = arith.mulf %75, %76 : vector<8x32xf32>
    %78 = arith.addf %74, %77 : vector<8x32xf32>
    %79 = vector.extract_strided_slice %71 {offsets = [0, 96], sizes = [8, 32], strides = [1, 1]} : vector<8x128xf32> to vector<8x32xf32>
    %80 = math.tanh %78 : vector<8x32xf32>
    %81 = arith.mulf %79, %80 : vector<8x32xf32>
    %82 = vector.extract_strided_slice %61 {offsets = [0, 128], sizes = [8, 128], strides = [1, 1]} : vector<8x256xf32> to vector<8x128xf32>
    %83 = vector.broadcast %31 : vector<1x128xf32> to vector<8x128xf32>
    %84 = arith.addf %82, %83 : vector<8x128xf32>
    %cst_40 = arith.constant 5.000000e-01 : f32
    %85 = vector.broadcast %cst_40 : f32 to vector<8x128xf32>
    %86 = arith.mulf %85, %84 : vector<8x128xf32>
    %87 = math.tanh %86 : vector<8x128xf32>
    %cst_41 = arith.constant 1.000000e+00 : f32
    %88 = vector.broadcast %cst_41 : f32 to vector<8x128xf32>
    %89 = arith.addf %87, %88 : vector<8x128xf32>
    %cst_42 = arith.constant 5.000000e-01 : f32
    %90 = vector.broadcast %cst_42 : f32 to vector<8x128xf32>
    %91 = arith.mulf %90, %89 : vector<8x128xf32>
    %92 = math.tanh %84 : vector<8x128xf32>
    %93 = vector.extract_strided_slice %91 {offsets = [0, 32], sizes = [8, 32], strides = [1, 1]} : vector<8x128xf32> to vector<8x32xf32>
    %94 = arith.mulf %93, %35 : vector<8x32xf32>
    %95 = vector.extract_strided_slice %91 {offsets = [0, 0], sizes = [8, 32], strides = [1, 1]} : vector<8x128xf32> to vector<8x32xf32>
    %96 = vector.extract_strided_slice %92 {offsets = [0, 64], sizes = [8, 32], strides = [1, 1]} : vector<8x128xf32> to vector<8x32xf32>
    %97 = arith.mulf %95, %96 : vector<8x32xf32>
    %98 = arith.addf %94, %97 : vector<8x32xf32>
    %99 = vector.extract_strided_slice %91 {offsets = [0, 96], sizes = [8, 32], strides = [1, 1]} : vector<8x128xf32> to vector<8x32xf32>
    %100 = math.tanh %98 : vector<8x32xf32>
    %101 = arith.mulf %99, %100 : vector<8x32xf32>
    %102 = tpu.concatenate %81, %101 in 1 : vector<8x32xf32>, vector<8x32xf32> -> vector<8x64xf32>
    %103 = arith.truncf %102 : vector<8x64xf32> to vector<8x64xbf16>
    %cst_43 = arith.constant dense<0.000000e+00> : vector<8x256xf32>
    %104 = tpu.matmul %103, %30, %cst_43 {dimension_numbers = #tpu.dot_dimension_numbers<[1], [0], [0], [1], [0, 0, 1, 1], [], []>} : vector<8x64xbf16>, vector<64x256xbf16>, vector<8x256xf32> -> vector<8x256xf32>
    %c16 = arith.constant 16 : index
    %c0_44 = arith.constant 0 : index
    %105 = vector.load %arg11[%c16, %c0_44] : memref<128x128xf32, #tpu.memory_space<vmem>>, vector<8x128xf32>
    %106 = vector.extract_strided_slice %104 {offsets = [0, 0], sizes = [8, 128], strides = [1, 1]} : vector<8x256xf32> to vector<8x128xf32>
    %107 = arith.addf %105, %106 : vector<8x128xf32>
    %cst_45 = arith.constant 5.000000e-01 : f32
    %108 = vector.broadcast %cst_45 : f32 to vector<8x128xf32>
    %109 = arith.mulf %108, %107 : vector<8x128xf32>
    %110 = math.tanh %109 : vector<8x128xf32>
    %cst_46 = arith.constant 1.000000e+00 : f32
    %111 = vector.broadcast %cst_46 : f32 to vector<8x128xf32>
    %112 = arith.addf %110, %111 : vector<8x128xf32>
    %cst_47 = arith.constant 5.000000e-01 : f32
    %113 = vector.broadcast %cst_47 : f32 to vector<8x128xf32>
    %114 = arith.mulf %113, %112 : vector<8x128xf32>
    %115 = math.tanh %107 : vector<8x128xf32>
    %116 = vector.extract_strided_slice %114 {offsets = [0, 32], sizes = [8, 32], strides = [1, 1]} : vector<8x128xf32> to vector<8x32xf32>
    %117 = arith.mulf %116, %78 : vector<8x32xf32>
    %118 = vector.extract_strided_slice %114 {offsets = [0, 0], sizes = [8, 32], strides = [1, 1]} : vector<8x128xf32> to vector<8x32xf32>
    %119 = vector.extract_strided_slice %115 {offsets = [0, 64], sizes = [8, 32], strides = [1, 1]} : vector<8x128xf32> to vector<8x32xf32>
    %120 = arith.mulf %118, %119 : vector<8x32xf32>
    %121 = arith.addf %117, %120 : vector<8x32xf32>
    %122 = vector.extract_strided_slice %114 {offsets = [0, 96], sizes = [8, 32], strides = [1, 1]} : vector<8x128xf32> to vector<8x32xf32>
    %123 = math.tanh %121 : vector<8x32xf32>
    %124 = arith.mulf %122, %123 : vector<8x32xf32>
    %125 = vector.extract_strided_slice %104 {offsets = [0, 128], sizes = [8, 128], strides = [1, 1]} : vector<8x256xf32> to vector<8x128xf32>
    %126 = vector.broadcast %31 : vector<1x128xf32> to vector<8x128xf32>
    %127 = arith.addf %125, %126 : vector<8x128xf32>
    %cst_48 = arith.constant 5.000000e-01 : f32
    %128 = vector.broadcast %cst_48 : f32 to vector<8x128xf32>
    %129 = arith.mulf %128, %127 : vector<8x128xf32>
    %130 = math.tanh %129 : vector<8x128xf32>
    %cst_49 = arith.constant 1.000000e+00 : f32
    %131 = vector.broadcast %cst_49 : f32 to vector<8x128xf32>
    %132 = arith.addf %130, %131 : vector<8x128xf32>
    %cst_50 = arith.constant 5.000000e-01 : f32
    %133 = vector.broadcast %cst_50 : f32 to vector<8x128xf32>
    %134 = arith.mulf %133, %132 : vector<8x128xf32>
    %135 = math.tanh %127 : vector<8x128xf32>
    %136 = vector.extract_strided_slice %134 {offsets = [0, 32], sizes = [8, 32], strides = [1, 1]} : vector<8x128xf32> to vector<8x32xf32>
    %137 = arith.mulf %136, %98 : vector<8x32xf32>
    %138 = vector.extract_strided_slice %134 {offsets = [0, 0], sizes = [8, 32], strides = [1, 1]} : vector<8x128xf32> to vector<8x32xf32>
    %139 = vector.extract_strided_slice %135 {offsets = [0, 64], sizes = [8, 32], strides = [1, 1]} : vector<8x128xf32> to vector<8x32xf32>
    %140 = arith.mulf %138, %139 : vector<8x32xf32>
    %141 = arith.addf %137, %140 : vector<8x32xf32>
    %142 = vector.extract_strided_slice %134 {offsets = [0, 96], sizes = [8, 32], strides = [1, 1]} : vector<8x128xf32> to vector<8x32xf32>
    %143 = math.tanh %141 : vector<8x32xf32>
    %144 = arith.mulf %142, %143 : vector<8x32xf32>
    %145 = tpu.concatenate %124, %144 in 1 : vector<8x32xf32>, vector<8x32xf32> -> vector<8x64xf32>
    %146 = arith.truncf %145 : vector<8x64xf32> to vector<8x64xbf16>
    %cst_51 = arith.constant dense<0.000000e+00> : vector<8x256xf32>
    %147 = tpu.matmul %146, %30, %cst_51 {dimension_numbers = #tpu.dot_dimension_numbers<[1], [0], [0], [1], [0, 0, 1, 1], [], []>} : vector<8x64xbf16>, vector<64x256xbf16>, vector<8x256xf32> -> vector<8x256xf32>
    %c24 = arith.constant 24 : index
    %c0_52 = arith.constant 0 : index
    %148 = vector.load %arg11[%c24, %c0_52] : memref<128x128xf32, #tpu.memory_space<vmem>>, vector<8x128xf32>
    %149 = vector.extract_strided_slice %147 {offsets = [0, 0], sizes = [8, 128], strides = [1, 1]} : vector<8x256xf32> to vector<8x128xf32>
    %150 = arith.addf %148, %149 : vector<8x128xf32>
    %cst_53 = arith.constant 5.000000e-01 : f32
    %151 = vector.broadcast %cst_53 : f32 to vector<8x128xf32>
    %152 = arith.mulf %151, %150 : vector<8x128xf32>
    %153 = math.tanh %152 : vector<8x128xf32>
    %cst_54 = arith.constant 1.000000e+00 : f32
    %154 = vector.broadcast %cst_54 : f32 to vector<8x128xf32>
    %155 = arith.addf %153, %154 : vector<8x128xf32>
    %cst_55 = arith.constant 5.000000e-01 : f32
    %156 = vector.broadcast %cst_55 : f32 to vector<8x128xf32>
    %157 = arith.mulf %156, %155 : vector<8x128xf32>
    %158 = math.tanh %150 : vector<8x128xf32>
    %159 = vector.extract_strided_slice %157 {offsets = [0, 32], sizes = [8, 32], strides = [1, 1]} : vector<8x128xf32> to vector<8x32xf32>
    %160 = arith.mulf %159, %121 : vector<8x32xf32>
    %161 = vector.extract_strided_slice %157 {offsets = [0, 0], sizes = [8, 32], strides = [1, 1]} : vector<8x128xf32> to vector<8x32xf32>
    %162 = vector.extract_strided_slice %158 {offsets = [0, 64], sizes = [8, 32], strides = [1, 1]} : vector<8x128xf32> to vector<8x32xf32>
    %163 = arith.mulf %161, %162 : vector<8x32xf32>
    %164 = arith.addf %160, %163 : vector<8x32xf32>
    %165 = vector.extract_strided_slice %157 {offsets = [0, 96], sizes = [8, 32], strides = [1, 1]} : vector<8x128xf32> to vector<8x32xf32>
    %166 = math.tanh %164 : vector<8x32xf32>
    %167 = arith.mulf %165, %166 : vector<8x32xf32>
    %168 = vector.extract_strided_slice %147 {offsets = [0, 128], sizes = [8, 128], strides = [1, 1]} : vector<8x256xf32> to vector<8x128xf32>
    %169 = vector.broadcast %31 : vector<1x128xf32> to vector<8x128xf32>
    %170 = arith.addf %168, %169 : vector<8x128xf32>
    %cst_56 = arith.constant 5.000000e-01 : f32
    %171 = vector.broadcast %cst_56 : f32 to vector<8x128xf32>
    %172 = arith.mulf %171, %170 : vector<8x128xf32>
    %173 = math.tanh %172 : vector<8x128xf32>
    %cst_57 = arith.constant 1.000000e+00 : f32
    %174 = vector.broadcast %cst_57 : f32 to vector<8x128xf32>
    %175 = arith.addf %173, %174 : vector<8x128xf32>
    %cst_58 = arith.constant 5.000000e-01 : f32
    %176 = vector.broadcast %cst_58 : f32 to vector<8x128xf32>
    %177 = arith.mulf %176, %175 : vector<8x128xf32>
    %178 = math.tanh %170 : vector<8x128xf32>
    %179 = vector.extract_strided_slice %177 {offsets = [0, 32], sizes = [8, 32], strides = [1, 1]} : vector<8x128xf32> to vector<8x32xf32>
    %180 = arith.mulf %179, %141 : vector<8x32xf32>
    %181 = vector.extract_strided_slice %177 {offsets = [0, 0], sizes = [8, 32], strides = [1, 1]} : vector<8x128xf32> to vector<8x32xf32>
    %182 = vector.extract_strided_slice %178 {offsets = [0, 64], sizes = [8, 32], strides = [1, 1]} : vector<8x128xf32> to vector<8x32xf32>
    %183 = arith.mulf %181, %182 : vector<8x32xf32>
    %184 = arith.addf %180, %183 : vector<8x32xf32>
    %185 = vector.extract_strided_slice %177 {offsets = [0, 96], sizes = [8, 32], strides = [1, 1]} : vector<8x128xf32> to vector<8x32xf32>
    %186 = math.tanh %184 : vector<8x32xf32>
    %187 = arith.mulf %185, %186 : vector<8x32xf32>
    %188 = tpu.concatenate %167, %187 in 1 : vector<8x32xf32>, vector<8x32xf32> -> vector<8x64xf32>
    %189 = arith.truncf %188 : vector<8x64xf32> to vector<8x64xbf16>
    %cst_59 = arith.constant dense<0.000000e+00> : vector<8x256xf32>
    %190 = tpu.matmul %189, %30, %cst_59 {dimension_numbers = #tpu.dot_dimension_numbers<[1], [0], [0], [1], [0, 0, 1, 1], [], []>} : vector<8x64xbf16>, vector<64x256xbf16>, vector<8x256xf32> -> vector<8x256xf32>
    %c32 = arith.constant 32 : index
    %c0_60 = arith.constant 0 : index
    %191 = vector.load %arg11[%c32, %c0_60] : memref<128x128xf32, #tpu.memory_space<vmem>>, vector<8x128xf32>
    %192 = vector.extract_strided_slice %190 {offsets = [0, 0], sizes = [8, 128], strides = [1, 1]} : vector<8x256xf32> to vector<8x128xf32>
    %193 = arith.addf %191, %192 : vector<8x128xf32>
    %cst_61 = arith.constant 5.000000e-01 : f32
    %194 = vector.broadcast %cst_61 : f32 to vector<8x128xf32>
    %195 = arith.mulf %194, %193 : vector<8x128xf32>
    %196 = math.tanh %195 : vector<8x128xf32>
    %cst_62 = arith.constant 1.000000e+00 : f32
    %197 = vector.broadcast %cst_62 : f32 to vector<8x128xf32>
    %198 = arith.addf %196, %197 : vector<8x128xf32>
    %cst_63 = arith.constant 5.000000e-01 : f32
    %199 = vector.broadcast %cst_63 : f32 to vector<8x128xf32>
    %200 = arith.mulf %199, %198 : vector<8x128xf32>
    %201 = math.tanh %193 : vector<8x128xf32>
    %202 = vector.extract_strided_slice %200 {offsets = [0, 32], sizes = [8, 32], strides = [1, 1]} : vector<8x128xf32> to vector<8x32xf32>
    %203 = arith.mulf %202, %164 : vector<8x32xf32>
    %204 = vector.extract_strided_slice %200 {offsets = [0, 0], sizes = [8, 32], strides = [1, 1]} : vector<8x128xf32> to vector<8x32xf32>
    %205 = vector.extract_strided_slice %201 {offsets = [0, 64], sizes = [8, 32], strides = [1, 1]} : vector<8x128xf32> to vector<8x32xf32>
    %206 = arith.mulf %204, %205 : vector<8x32xf32>
    %207 = arith.addf %203, %206 : vector<8x32xf32>
    %208 = vector.extract_strided_slice %200 {offsets = [0, 96], sizes = [8, 32], strides = [1, 1]} : vector<8x128xf32> to vector<8x32xf32>
    %209 = math.tanh %207 : vector<8x32xf32>
    %210 = arith.mulf %208, %209 : vector<8x32xf32>
    %211 = vector.extract_strided_slice %190 {offsets = [0, 128], sizes = [8, 128], strides = [1, 1]} : vector<8x256xf32> to vector<8x128xf32>
    %212 = vector.broadcast %31 : vector<1x128xf32> to vector<8x128xf32>
    %213 = arith.addf %211, %212 : vector<8x128xf32>
    %cst_64 = arith.constant 5.000000e-01 : f32
    %214 = vector.broadcast %cst_64 : f32 to vector<8x128xf32>
    %215 = arith.mulf %214, %213 : vector<8x128xf32>
    %216 = math.tanh %215 : vector<8x128xf32>
    %cst_65 = arith.constant 1.000000e+00 : f32
    %217 = vector.broadcast %cst_65 : f32 to vector<8x128xf32>
    %218 = arith.addf %216, %217 : vector<8x128xf32>
    %cst_66 = arith.constant 5.000000e-01 : f32
    %219 = vector.broadcast %cst_66 : f32 to vector<8x128xf32>
    %220 = arith.mulf %219, %218 : vector<8x128xf32>
    %221 = math.tanh %213 : vector<8x128xf32>
    %222 = vector.extract_strided_slice %220 {offsets = [0, 32], sizes = [8, 32], strides = [1, 1]} : vector<8x128xf32> to vector<8x32xf32>
    %223 = arith.mulf %222, %184 : vector<8x32xf32>
    %224 = vector.extract_strided_slice %220 {offsets = [0, 0], sizes = [8, 32], strides = [1, 1]} : vector<8x128xf32> to vector<8x32xf32>
    %225 = vector.extract_strided_slice %221 {offsets = [0, 64], sizes = [8, 32], strides = [1, 1]} : vector<8x128xf32> to vector<8x32xf32>
    %226 = arith.mulf %224, %225 : vector<8x32xf32>
    %227 = arith.addf %223, %226 : vector<8x32xf32>
    %228 = vector.extract_strided_slice %220 {offsets = [0, 96], sizes = [8, 32], strides = [1, 1]} : vector<8x128xf32> to vector<8x32xf32>
    %229 = math.tanh %227 : vector<8x32xf32>
    %230 = arith.mulf %228, %229 : vector<8x32xf32>
    %231 = tpu.concatenate %210, %230 in 1 : vector<8x32xf32>, vector<8x32xf32> -> vector<8x64xf32>
    %232 = arith.truncf %231 : vector<8x64xf32> to vector<8x64xbf16>
    %cst_67 = arith.constant dense<0.000000e+00> : vector<8x256xf32>
    %233 = tpu.matmul %232, %30, %cst_67 {dimension_numbers = #tpu.dot_dimension_numbers<[1], [0], [0], [1], [0, 0, 1, 1], [], []>} : vector<8x64xbf16>, vector<64x256xbf16>, vector<8x256xf32> -> vector<8x256xf32>
    %c40 = arith.constant 40 : index
    %c0_68 = arith.constant 0 : index
    %234 = vector.load %arg11[%c40, %c0_68] : memref<128x128xf32, #tpu.memory_space<vmem>>, vector<8x128xf32>
    %235 = vector.extract_strided_slice %233 {offsets = [0, 0], sizes = [8, 128], strides = [1, 1]} : vector<8x256xf32> to vector<8x128xf32>
    %236 = arith.addf %234, %235 : vector<8x128xf32>
    %cst_69 = arith.constant 5.000000e-01 : f32
    %237 = vector.broadcast %cst_69 : f32 to vector<8x128xf32>
    %238 = arith.mulf %237, %236 : vector<8x128xf32>
    %239 = math.tanh %238 : vector<8x128xf32>
    %cst_70 = arith.constant 1.000000e+00 : f32
    %240 = vector.broadcast %cst_70 : f32 to vector<8x128xf32>
    %241 = arith.addf %239, %240 : vector<8x128xf32>
    %cst_71 = arith.constant 5.000000e-01 : f32
    %242 = vector.broadcast %cst_71 : f32 to vector<8x128xf32>
    %243 = arith.mulf %242, %241 : vector<8x128xf32>
    %244 = math.tanh %236 : vector<8x128xf32>
    %245 = vector.extract_strided_slice %243 {offsets = [0, 32], sizes = [8, 32], strides = [1, 1]} : vector<8x128xf32> to vector<8x32xf32>
    %246 = arith.mulf %245, %207 : vector<8x32xf32>
    %247 = vector.extract_strided_slice %243 {offsets = [0, 0], sizes = [8, 32], strides = [1, 1]} : vector<8x128xf32> to vector<8x32xf32>
    %248 = vector.extract_strided_slice %244 {offsets = [0, 64], sizes = [8, 32], strides = [1, 1]} : vector<8x128xf32> to vector<8x32xf32>
    %249 = arith.mulf %247, %248 : vector<8x32xf32>
    %250 = arith.addf %246, %249 : vector<8x32xf32>
    %251 = vector.extract_strided_slice %243 {offsets = [0, 96], sizes = [8, 32], strides = [1, 1]} : vector<8x128xf32> to vector<8x32xf32>
    %252 = math.tanh %250 : vector<8x32xf32>
    %253 = arith.mulf %251, %252 : vector<8x32xf32>
    %254 = vector.extract_strided_slice %233 {offsets = [0, 128], sizes = [8, 128], strides = [1, 1]} : vector<8x256xf32> to vector<8x128xf32>
    %255 = vector.broadcast %31 : vector<1x128xf32> to vector<8x128xf32>
    %256 = arith.addf %254, %255 : vector<8x128xf32>
    %cst_72 = arith.constant 5.000000e-01 : f32
    %257 = vector.broadcast %cst_72 : f32 to vector<8x128xf32>
    %258 = arith.mulf %257, %256 : vector<8x128xf32>
    %259 = math.tanh %258 : vector<8x128xf32>
    %cst_73 = arith.constant 1.000000e+00 : f32
    %260 = vector.broadcast %cst_73 : f32 to vector<8x128xf32>
    %261 = arith.addf %259, %260 : vector<8x128xf32>
    %cst_74 = arith.constant 5.000000e-01 : f32
    %262 = vector.broadcast %cst_74 : f32 to vector<8x128xf32>
    %263 = arith.mulf %262, %261 : vector<8x128xf32>
    %264 = math.tanh %256 : vector<8x128xf32>
    %265 = vector.extract_strided_slice %263 {offsets = [0, 32], sizes = [8, 32], strides = [1, 1]} : vector<8x128xf32> to vector<8x32xf32>
    %266 = arith.mulf %265, %227 : vector<8x32xf32>
    %267 = vector.extract_strided_slice %263 {offsets = [0, 0], sizes = [8, 32], strides = [1, 1]} : vector<8x128xf32> to vector<8x32xf32>
    %268 = vector.extract_strided_slice %264 {offsets = [0, 64], sizes = [8, 32], strides = [1, 1]} : vector<8x128xf32> to vector<8x32xf32>
    %269 = arith.mulf %267, %268 : vector<8x32xf32>
    %270 = arith.addf %266, %269 : vector<8x32xf32>
    %271 = vector.extract_strided_slice %263 {offsets = [0, 96], sizes = [8, 32], strides = [1, 1]} : vector<8x128xf32> to vector<8x32xf32>
    %272 = math.tanh %270 : vector<8x32xf32>
    %273 = arith.mulf %271, %272 : vector<8x32xf32>
    %274 = tpu.concatenate %253, %273 in 1 : vector<8x32xf32>, vector<8x32xf32> -> vector<8x64xf32>
    %275 = arith.truncf %274 : vector<8x64xf32> to vector<8x64xbf16>
    %cst_75 = arith.constant dense<0.000000e+00> : vector<8x256xf32>
    %276 = tpu.matmul %275, %30, %cst_75 {dimension_numbers = #tpu.dot_dimension_numbers<[1], [0], [0], [1], [0, 0, 1, 1], [], []>} : vector<8x64xbf16>, vector<64x256xbf16>, vector<8x256xf32> -> vector<8x256xf32>
    %c48 = arith.constant 48 : index
    %c0_76 = arith.constant 0 : index
    %277 = vector.load %arg11[%c48, %c0_76] : memref<128x128xf32, #tpu.memory_space<vmem>>, vector<8x128xf32>
    %278 = vector.extract_strided_slice %276 {offsets = [0, 0], sizes = [8, 128], strides = [1, 1]} : vector<8x256xf32> to vector<8x128xf32>
    %279 = arith.addf %277, %278 : vector<8x128xf32>
    %cst_77 = arith.constant 5.000000e-01 : f32
    %280 = vector.broadcast %cst_77 : f32 to vector<8x128xf32>
    %281 = arith.mulf %280, %279 : vector<8x128xf32>
    %282 = math.tanh %281 : vector<8x128xf32>
    %cst_78 = arith.constant 1.000000e+00 : f32
    %283 = vector.broadcast %cst_78 : f32 to vector<8x128xf32>
    %284 = arith.addf %282, %283 : vector<8x128xf32>
    %cst_79 = arith.constant 5.000000e-01 : f32
    %285 = vector.broadcast %cst_79 : f32 to vector<8x128xf32>
    %286 = arith.mulf %285, %284 : vector<8x128xf32>
    %287 = math.tanh %279 : vector<8x128xf32>
    %288 = vector.extract_strided_slice %286 {offsets = [0, 32], sizes = [8, 32], strides = [1, 1]} : vector<8x128xf32> to vector<8x32xf32>
    %289 = arith.mulf %288, %250 : vector<8x32xf32>
    %290 = vector.extract_strided_slice %286 {offsets = [0, 0], sizes = [8, 32], strides = [1, 1]} : vector<8x128xf32> to vector<8x32xf32>
    %291 = vector.extract_strided_slice %287 {offsets = [0, 64], sizes = [8, 32], strides = [1, 1]} : vector<8x128xf32> to vector<8x32xf32>
    %292 = arith.mulf %290, %291 : vector<8x32xf32>
    %293 = arith.addf %289, %292 : vector<8x32xf32>
    %294 = vector.extract_strided_slice %286 {offsets = [0, 96], sizes = [8, 32], strides = [1, 1]} : vector<8x128xf32> to vector<8x32xf32>
    %295 = math.tanh %293 : vector<8x32xf32>
    %296 = arith.mulf %294, %295 : vector<8x32xf32>
    %297 = vector.extract_strided_slice %276 {offsets = [0, 128], sizes = [8, 128], strides = [1, 1]} : vector<8x256xf32> to vector<8x128xf32>
    %298 = vector.broadcast %31 : vector<1x128xf32> to vector<8x128xf32>
    %299 = arith.addf %297, %298 : vector<8x128xf32>
    %cst_80 = arith.constant 5.000000e-01 : f32
    %300 = vector.broadcast %cst_80 : f32 to vector<8x128xf32>
    %301 = arith.mulf %300, %299 : vector<8x128xf32>
    %302 = math.tanh %301 : vector<8x128xf32>
    %cst_81 = arith.constant 1.000000e+00 : f32
    %303 = vector.broadcast %cst_81 : f32 to vector<8x128xf32>
    %304 = arith.addf %302, %303 : vector<8x128xf32>
    %cst_82 = arith.constant 5.000000e-01 : f32
    %305 = vector.broadcast %cst_82 : f32 to vector<8x128xf32>
    %306 = arith.mulf %305, %304 : vector<8x128xf32>
    %307 = math.tanh %299 : vector<8x128xf32>
    %308 = vector.extract_strided_slice %306 {offsets = [0, 32], sizes = [8, 32], strides = [1, 1]} : vector<8x128xf32> to vector<8x32xf32>
    %309 = arith.mulf %308, %270 : vector<8x32xf32>
    %310 = vector.extract_strided_slice %306 {offsets = [0, 0], sizes = [8, 32], strides = [1, 1]} : vector<8x128xf32> to vector<8x32xf32>
    %311 = vector.extract_strided_slice %307 {offsets = [0, 64], sizes = [8, 32], strides = [1, 1]} : vector<8x128xf32> to vector<8x32xf32>
    %312 = arith.mulf %310, %311 : vector<8x32xf32>
    %313 = arith.addf %309, %312 : vector<8x32xf32>
    %314 = vector.extract_strided_slice %306 {offsets = [0, 96], sizes = [8, 32], strides = [1, 1]} : vector<8x128xf32> to vector<8x32xf32>
    %315 = math.tanh %313 : vector<8x32xf32>
    %316 = arith.mulf %314, %315 : vector<8x32xf32>
    %317 = tpu.concatenate %296, %316 in 1 : vector<8x32xf32>, vector<8x32xf32> -> vector<8x64xf32>
    %318 = arith.truncf %317 : vector<8x64xf32> to vector<8x64xbf16>
    %cst_83 = arith.constant dense<0.000000e+00> : vector<8x256xf32>
    %319 = tpu.matmul %318, %30, %cst_83 {dimension_numbers = #tpu.dot_dimension_numbers<[1], [0], [0], [1], [0, 0, 1, 1], [], []>} : vector<8x64xbf16>, vector<64x256xbf16>, vector<8x256xf32> -> vector<8x256xf32>
    %c56 = arith.constant 56 : index
    %c0_84 = arith.constant 0 : index
    %320 = vector.load %arg11[%c56, %c0_84] : memref<128x128xf32, #tpu.memory_space<vmem>>, vector<8x128xf32>
    %321 = vector.extract_strided_slice %319 {offsets = [0, 0], sizes = [8, 128], strides = [1, 1]} : vector<8x256xf32> to vector<8x128xf32>
    %322 = arith.addf %320, %321 : vector<8x128xf32>
    %cst_85 = arith.constant 5.000000e-01 : f32
    %323 = vector.broadcast %cst_85 : f32 to vector<8x128xf32>
    %324 = arith.mulf %323, %322 : vector<8x128xf32>
    %325 = math.tanh %324 : vector<8x128xf32>
    %cst_86 = arith.constant 1.000000e+00 : f32
    %326 = vector.broadcast %cst_86 : f32 to vector<8x128xf32>
    %327 = arith.addf %325, %326 : vector<8x128xf32>
    %cst_87 = arith.constant 5.000000e-01 : f32
    %328 = vector.broadcast %cst_87 : f32 to vector<8x128xf32>
    %329 = arith.mulf %328, %327 : vector<8x128xf32>
    %330 = math.tanh %322 : vector<8x128xf32>
    %331 = vector.extract_strided_slice %329 {offsets = [0, 32], sizes = [8, 32], strides = [1, 1]} : vector<8x128xf32> to vector<8x32xf32>
    %332 = arith.mulf %331, %293 : vector<8x32xf32>
    %333 = vector.extract_strided_slice %329 {offsets = [0, 0], sizes = [8, 32], strides = [1, 1]} : vector<8x128xf32> to vector<8x32xf32>
    %334 = vector.extract_strided_slice %330 {offsets = [0, 64], sizes = [8, 32], strides = [1, 1]} : vector<8x128xf32> to vector<8x32xf32>
    %335 = arith.mulf %333, %334 : vector<8x32xf32>
    %336 = arith.addf %332, %335 : vector<8x32xf32>
    %337 = vector.extract_strided_slice %329 {offsets = [0, 96], sizes = [8, 32], strides = [1, 1]} : vector<8x128xf32> to vector<8x32xf32>
    %338 = math.tanh %336 : vector<8x32xf32>
    %339 = arith.mulf %337, %338 : vector<8x32xf32>
    %340 = vector.extract_strided_slice %319 {offsets = [0, 128], sizes = [8, 128], strides = [1, 1]} : vector<8x256xf32> to vector<8x128xf32>
    %341 = vector.broadcast %31 : vector<1x128xf32> to vector<8x128xf32>
    %342 = arith.addf %340, %341 : vector<8x128xf32>
    %cst_88 = arith.constant 5.000000e-01 : f32
    %343 = vector.broadcast %cst_88 : f32 to vector<8x128xf32>
    %344 = arith.mulf %343, %342 : vector<8x128xf32>
    %345 = math.tanh %344 : vector<8x128xf32>
    %cst_89 = arith.constant 1.000000e+00 : f32
    %346 = vector.broadcast %cst_89 : f32 to vector<8x128xf32>
    %347 = arith.addf %345, %346 : vector<8x128xf32>
    %cst_90 = arith.constant 5.000000e-01 : f32
    %348 = vector.broadcast %cst_90 : f32 to vector<8x128xf32>
    %349 = arith.mulf %348, %347 : vector<8x128xf32>
    %350 = math.tanh %342 : vector<8x128xf32>
    %351 = vector.extract_strided_slice %349 {offsets = [0, 32], sizes = [8, 32], strides = [1, 1]} : vector<8x128xf32> to vector<8x32xf32>
    %352 = arith.mulf %351, %313 : vector<8x32xf32>
    %353 = vector.extract_strided_slice %349 {offsets = [0, 0], sizes = [8, 32], strides = [1, 1]} : vector<8x128xf32> to vector<8x32xf32>
    %354 = vector.extract_strided_slice %350 {offsets = [0, 64], sizes = [8, 32], strides = [1, 1]} : vector<8x128xf32> to vector<8x32xf32>
    %355 = arith.mulf %353, %354 : vector<8x32xf32>
    %356 = arith.addf %352, %355 : vector<8x32xf32>
    %357 = vector.extract_strided_slice %349 {offsets = [0, 96], sizes = [8, 32], strides = [1, 1]} : vector<8x128xf32> to vector<8x32xf32>
    %358 = math.tanh %356 : vector<8x32xf32>
    %359 = arith.mulf %357, %358 : vector<8x32xf32>
    %360 = tpu.concatenate %339, %359 in 1 : vector<8x32xf32>, vector<8x32xf32> -> vector<8x64xf32>
    %361 = arith.truncf %360 : vector<8x64xf32> to vector<8x64xbf16>
    %cst_91 = arith.constant dense<0.000000e+00> : vector<8x256xf32>
    %362 = tpu.matmul %361, %30, %cst_91 {dimension_numbers = #tpu.dot_dimension_numbers<[1], [0], [0], [1], [0, 0, 1, 1], [], []>} : vector<8x64xbf16>, vector<64x256xbf16>, vector<8x256xf32> -> vector<8x256xf32>
    %c64 = arith.constant 64 : index
    %c0_92 = arith.constant 0 : index
    %363 = vector.load %arg11[%c64, %c0_92] : memref<128x128xf32, #tpu.memory_space<vmem>>, vector<8x128xf32>
    %364 = vector.extract_strided_slice %362 {offsets = [0, 0], sizes = [8, 128], strides = [1, 1]} : vector<8x256xf32> to vector<8x128xf32>
    %365 = arith.addf %363, %364 : vector<8x128xf32>
    %cst_93 = arith.constant 5.000000e-01 : f32
    %366 = vector.broadcast %cst_93 : f32 to vector<8x128xf32>
    %367 = arith.mulf %366, %365 : vector<8x128xf32>
    %368 = math.tanh %367 : vector<8x128xf32>
    %cst_94 = arith.constant 1.000000e+00 : f32
    %369 = vector.broadcast %cst_94 : f32 to vector<8x128xf32>
    %370 = arith.addf %368, %369 : vector<8x128xf32>
    %cst_95 = arith.constant 5.000000e-01 : f32
    %371 = vector.broadcast %cst_95 : f32 to vector<8x128xf32>
    %372 = arith.mulf %371, %370 : vector<8x128xf32>
    %373 = math.tanh %365 : vector<8x128xf32>
    %374 = vector.extract_strided_slice %372 {offsets = [0, 32], sizes = [8, 32], strides = [1, 1]} : vector<8x128xf32> to vector<8x32xf32>
    %375 = arith.mulf %374, %336 : vector<8x32xf32>
    %376 = vector.extract_strided_slice %372 {offsets = [0, 0], sizes = [8, 32], strides = [1, 1]} : vector<8x128xf32> to vector<8x32xf32>
    %377 = vector.extract_strided_slice %373 {offsets = [0, 64], sizes = [8, 32], strides = [1, 1]} : vector<8x128xf32> to vector<8x32xf32>
    %378 = arith.mulf %376, %377 : vector<8x32xf32>
    %379 = arith.addf %375, %378 : vector<8x32xf32>
    %380 = vector.extract_strided_slice %372 {offsets = [0, 96], sizes = [8, 32], strides = [1, 1]} : vector<8x128xf32> to vector<8x32xf32>
    %381 = math.tanh %379 : vector<8x32xf32>
    %382 = arith.mulf %380, %381 : vector<8x32xf32>
    %383 = vector.extract_strided_slice %362 {offsets = [0, 128], sizes = [8, 128], strides = [1, 1]} : vector<8x256xf32> to vector<8x128xf32>
    %384 = vector.broadcast %31 : vector<1x128xf32> to vector<8x128xf32>
    %385 = arith.addf %383, %384 : vector<8x128xf32>
    %cst_96 = arith.constant 5.000000e-01 : f32
    %386 = vector.broadcast %cst_96 : f32 to vector<8x128xf32>
    %387 = arith.mulf %386, %385 : vector<8x128xf32>
    %388 = math.tanh %387 : vector<8x128xf32>
    %cst_97 = arith.constant 1.000000e+00 : f32
    %389 = vector.broadcast %cst_97 : f32 to vector<8x128xf32>
    %390 = arith.addf %388, %389 : vector<8x128xf32>
    %cst_98 = arith.constant 5.000000e-01 : f32
    %391 = vector.broadcast %cst_98 : f32 to vector<8x128xf32>
    %392 = arith.mulf %391, %390 : vector<8x128xf32>
    %393 = math.tanh %385 : vector<8x128xf32>
    %394 = vector.extract_strided_slice %392 {offsets = [0, 32], sizes = [8, 32], strides = [1, 1]} : vector<8x128xf32> to vector<8x32xf32>
    %395 = arith.mulf %394, %356 : vector<8x32xf32>
    %396 = vector.extract_strided_slice %392 {offsets = [0, 0], sizes = [8, 32], strides = [1, 1]} : vector<8x128xf32> to vector<8x32xf32>
    %397 = vector.extract_strided_slice %393 {offsets = [0, 64], sizes = [8, 32], strides = [1, 1]} : vector<8x128xf32> to vector<8x32xf32>
    %398 = arith.mulf %396, %397 : vector<8x32xf32>
    %399 = arith.addf %395, %398 : vector<8x32xf32>
    %400 = vector.extract_strided_slice %392 {offsets = [0, 96], sizes = [8, 32], strides = [1, 1]} : vector<8x128xf32> to vector<8x32xf32>
    %401 = math.tanh %399 : vector<8x32xf32>
    %402 = arith.mulf %400, %401 : vector<8x32xf32>
    %403 = tpu.concatenate %382, %402 in 1 : vector<8x32xf32>, vector<8x32xf32> -> vector<8x64xf32>
    %404 = arith.truncf %403 : vector<8x64xf32> to vector<8x64xbf16>
    %cst_99 = arith.constant dense<0.000000e+00> : vector<8x256xf32>
    %405 = tpu.matmul %404, %30, %cst_99 {dimension_numbers = #tpu.dot_dimension_numbers<[1], [0], [0], [1], [0, 0, 1, 1], [], []>} : vector<8x64xbf16>, vector<64x256xbf16>, vector<8x256xf32> -> vector<8x256xf32>
    %c72 = arith.constant 72 : index
    %c0_100 = arith.constant 0 : index
    %406 = vector.load %arg11[%c72, %c0_100] : memref<128x128xf32, #tpu.memory_space<vmem>>, vector<8x128xf32>
    %407 = vector.extract_strided_slice %405 {offsets = [0, 0], sizes = [8, 128], strides = [1, 1]} : vector<8x256xf32> to vector<8x128xf32>
    %408 = arith.addf %406, %407 : vector<8x128xf32>
    %cst_101 = arith.constant 5.000000e-01 : f32
    %409 = vector.broadcast %cst_101 : f32 to vector<8x128xf32>
    %410 = arith.mulf %409, %408 : vector<8x128xf32>
    %411 = math.tanh %410 : vector<8x128xf32>
    %cst_102 = arith.constant 1.000000e+00 : f32
    %412 = vector.broadcast %cst_102 : f32 to vector<8x128xf32>
    %413 = arith.addf %411, %412 : vector<8x128xf32>
    %cst_103 = arith.constant 5.000000e-01 : f32
    %414 = vector.broadcast %cst_103 : f32 to vector<8x128xf32>
    %415 = arith.mulf %414, %413 : vector<8x128xf32>
    %416 = math.tanh %408 : vector<8x128xf32>
    %417 = vector.extract_strided_slice %415 {offsets = [0, 32], sizes = [8, 32], strides = [1, 1]} : vector<8x128xf32> to vector<8x32xf32>
    %418 = arith.mulf %417, %379 : vector<8x32xf32>
    %419 = vector.extract_strided_slice %415 {offsets = [0, 0], sizes = [8, 32], strides = [1, 1]} : vector<8x128xf32> to vector<8x32xf32>
    %420 = vector.extract_strided_slice %416 {offsets = [0, 64], sizes = [8, 32], strides = [1, 1]} : vector<8x128xf32> to vector<8x32xf32>
    %421 = arith.mulf %419, %420 : vector<8x32xf32>
    %422 = arith.addf %418, %421 : vector<8x32xf32>
    %423 = vector.extract_strided_slice %415 {offsets = [0, 96], sizes = [8, 32], strides = [1, 1]} : vector<8x128xf32> to vector<8x32xf32>
    %424 = math.tanh %422 : vector<8x32xf32>
    %425 = arith.mulf %423, %424 : vector<8x32xf32>
    %426 = vector.extract_strided_slice %405 {offsets = [0, 128], sizes = [8, 128], strides = [1, 1]} : vector<8x256xf32> to vector<8x128xf32>
    %427 = vector.broadcast %31 : vector<1x128xf32> to vector<8x128xf32>
    %428 = arith.addf %426, %427 : vector<8x128xf32>
    %cst_104 = arith.constant 5.000000e-01 : f32
    %429 = vector.broadcast %cst_104 : f32 to vector<8x128xf32>
    %430 = arith.mulf %429, %428 : vector<8x128xf32>
    %431 = math.tanh %430 : vector<8x128xf32>
    %cst_105 = arith.constant 1.000000e+00 : f32
    %432 = vector.broadcast %cst_105 : f32 to vector<8x128xf32>
    %433 = arith.addf %431, %432 : vector<8x128xf32>
    %cst_106 = arith.constant 5.000000e-01 : f32
    %434 = vector.broadcast %cst_106 : f32 to vector<8x128xf32>
    %435 = arith.mulf %434, %433 : vector<8x128xf32>
    %436 = math.tanh %428 : vector<8x128xf32>
    %437 = vector.extract_strided_slice %435 {offsets = [0, 32], sizes = [8, 32], strides = [1, 1]} : vector<8x128xf32> to vector<8x32xf32>
    %438 = arith.mulf %437, %399 : vector<8x32xf32>
    %439 = vector.extract_strided_slice %435 {offsets = [0, 0], sizes = [8, 32], strides = [1, 1]} : vector<8x128xf32> to vector<8x32xf32>
    %440 = vector.extract_strided_slice %436 {offsets = [0, 64], sizes = [8, 32], strides = [1, 1]} : vector<8x128xf32> to vector<8x32xf32>
    %441 = arith.mulf %439, %440 : vector<8x32xf32>
    %442 = arith.addf %438, %441 : vector<8x32xf32>
    %443 = vector.extract_strided_slice %435 {offsets = [0, 96], sizes = [8, 32], strides = [1, 1]} : vector<8x128xf32> to vector<8x32xf32>
    %444 = math.tanh %442 : vector<8x32xf32>
    %445 = arith.mulf %443, %444 : vector<8x32xf32>
    %446 = tpu.concatenate %425, %445 in 1 : vector<8x32xf32>, vector<8x32xf32> -> vector<8x64xf32>
    %447 = arith.truncf %446 : vector<8x64xf32> to vector<8x64xbf16>
    %cst_107 = arith.constant dense<0.000000e+00> : vector<8x256xf32>
    %448 = tpu.matmul %447, %30, %cst_107 {dimension_numbers = #tpu.dot_dimension_numbers<[1], [0], [0], [1], [0, 0, 1, 1], [], []>} : vector<8x64xbf16>, vector<64x256xbf16>, vector<8x256xf32> -> vector<8x256xf32>
    %c80 = arith.constant 80 : index
    %c0_108 = arith.constant 0 : index
    %449 = vector.load %arg11[%c80, %c0_108] : memref<128x128xf32, #tpu.memory_space<vmem>>, vector<8x128xf32>
    %450 = vector.extract_strided_slice %448 {offsets = [0, 0], sizes = [8, 128], strides = [1, 1]} : vector<8x256xf32> to vector<8x128xf32>
    %451 = arith.addf %449, %450 : vector<8x128xf32>
    %cst_109 = arith.constant 5.000000e-01 : f32
    %452 = vector.broadcast %cst_109 : f32 to vector<8x128xf32>
    %453 = arith.mulf %452, %451 : vector<8x128xf32>
    %454 = math.tanh %453 : vector<8x128xf32>
    %cst_110 = arith.constant 1.000000e+00 : f32
    %455 = vector.broadcast %cst_110 : f32 to vector<8x128xf32>
    %456 = arith.addf %454, %455 : vector<8x128xf32>
    %cst_111 = arith.constant 5.000000e-01 : f32
    %457 = vector.broadcast %cst_111 : f32 to vector<8x128xf32>
    %458 = arith.mulf %457, %456 : vector<8x128xf32>
    %459 = math.tanh %451 : vector<8x128xf32>
    %460 = vector.extract_strided_slice %458 {offsets = [0, 32], sizes = [8, 32], strides = [1, 1]} : vector<8x128xf32> to vector<8x32xf32>
    %461 = arith.mulf %460, %422 : vector<8x32xf32>
    %462 = vector.extract_strided_slice %458 {offsets = [0, 0], sizes = [8, 32], strides = [1, 1]} : vector<8x128xf32> to vector<8x32xf32>
    %463 = vector.extract_strided_slice %459 {offsets = [0, 64], sizes = [8, 32], strides = [1, 1]} : vector<8x128xf32> to vector<8x32xf32>
    %464 = arith.mulf %462, %463 : vector<8x32xf32>
    %465 = arith.addf %461, %464 : vector<8x32xf32>
    %466 = vector.extract_strided_slice %458 {offsets = [0, 96], sizes = [8, 32], strides = [1, 1]} : vector<8x128xf32> to vector<8x32xf32>
    %467 = math.tanh %465 : vector<8x32xf32>
    %468 = arith.mulf %466, %467 : vector<8x32xf32>
    %469 = vector.extract_strided_slice %448 {offsets = [0, 128], sizes = [8, 128], strides = [1, 1]} : vector<8x256xf32> to vector<8x128xf32>
    %470 = vector.broadcast %31 : vector<1x128xf32> to vector<8x128xf32>
    %471 = arith.addf %469, %470 : vector<8x128xf32>
    %cst_112 = arith.constant 5.000000e-01 : f32
    %472 = vector.broadcast %cst_112 : f32 to vector<8x128xf32>
    %473 = arith.mulf %472, %471 : vector<8x128xf32>
    %474 = math.tanh %473 : vector<8x128xf32>
    %cst_113 = arith.constant 1.000000e+00 : f32
    %475 = vector.broadcast %cst_113 : f32 to vector<8x128xf32>
    %476 = arith.addf %474, %475 : vector<8x128xf32>
    %cst_114 = arith.constant 5.000000e-01 : f32
    %477 = vector.broadcast %cst_114 : f32 to vector<8x128xf32>
    %478 = arith.mulf %477, %476 : vector<8x128xf32>
    %479 = math.tanh %471 : vector<8x128xf32>
    %480 = vector.extract_strided_slice %478 {offsets = [0, 32], sizes = [8, 32], strides = [1, 1]} : vector<8x128xf32> to vector<8x32xf32>
    %481 = arith.mulf %480, %442 : vector<8x32xf32>
    %482 = vector.extract_strided_slice %478 {offsets = [0, 0], sizes = [8, 32], strides = [1, 1]} : vector<8x128xf32> to vector<8x32xf32>
    %483 = vector.extract_strided_slice %479 {offsets = [0, 64], sizes = [8, 32], strides = [1, 1]} : vector<8x128xf32> to vector<8x32xf32>
    %484 = arith.mulf %482, %483 : vector<8x32xf32>
    %485 = arith.addf %481, %484 : vector<8x32xf32>
    %486 = vector.extract_strided_slice %478 {offsets = [0, 96], sizes = [8, 32], strides = [1, 1]} : vector<8x128xf32> to vector<8x32xf32>
    %487 = math.tanh %485 : vector<8x32xf32>
    %488 = arith.mulf %486, %487 : vector<8x32xf32>
    %489 = tpu.concatenate %468, %488 in 1 : vector<8x32xf32>, vector<8x32xf32> -> vector<8x64xf32>
    %490 = arith.truncf %489 : vector<8x64xf32> to vector<8x64xbf16>
    %cst_115 = arith.constant dense<0.000000e+00> : vector<8x256xf32>
    %491 = tpu.matmul %490, %30, %cst_115 {dimension_numbers = #tpu.dot_dimension_numbers<[1], [0], [0], [1], [0, 0, 1, 1], [], []>} : vector<8x64xbf16>, vector<64x256xbf16>, vector<8x256xf32> -> vector<8x256xf32>
    %c88 = arith.constant 88 : index
    %c0_116 = arith.constant 0 : index
    %492 = vector.load %arg11[%c88, %c0_116] : memref<128x128xf32, #tpu.memory_space<vmem>>, vector<8x128xf32>
    %493 = vector.extract_strided_slice %491 {offsets = [0, 0], sizes = [8, 128], strides = [1, 1]} : vector<8x256xf32> to vector<8x128xf32>
    %494 = arith.addf %492, %493 : vector<8x128xf32>
    %cst_117 = arith.constant 5.000000e-01 : f32
    %495 = vector.broadcast %cst_117 : f32 to vector<8x128xf32>
    %496 = arith.mulf %495, %494 : vector<8x128xf32>
    %497 = math.tanh %496 : vector<8x128xf32>
    %cst_118 = arith.constant 1.000000e+00 : f32
    %498 = vector.broadcast %cst_118 : f32 to vector<8x128xf32>
    %499 = arith.addf %497, %498 : vector<8x128xf32>
    %cst_119 = arith.constant 5.000000e-01 : f32
    %500 = vector.broadcast %cst_119 : f32 to vector<8x128xf32>
    %501 = arith.mulf %500, %499 : vector<8x128xf32>
    %502 = math.tanh %494 : vector<8x128xf32>
    %503 = vector.extract_strided_slice %501 {offsets = [0, 32], sizes = [8, 32], strides = [1, 1]} : vector<8x128xf32> to vector<8x32xf32>
    %504 = arith.mulf %503, %465 : vector<8x32xf32>
    %505 = vector.extract_strided_slice %501 {offsets = [0, 0], sizes = [8, 32], strides = [1, 1]} : vector<8x128xf32> to vector<8x32xf32>
    %506 = vector.extract_strided_slice %502 {offsets = [0, 64], sizes = [8, 32], strides = [1, 1]} : vector<8x128xf32> to vector<8x32xf32>
    %507 = arith.mulf %505, %506 : vector<8x32xf32>
    %508 = arith.addf %504, %507 : vector<8x32xf32>
    %509 = vector.extract_strided_slice %501 {offsets = [0, 96], sizes = [8, 32], strides = [1, 1]} : vector<8x128xf32> to vector<8x32xf32>
    %510 = math.tanh %508 : vector<8x32xf32>
    %511 = arith.mulf %509, %510 : vector<8x32xf32>
    %512 = vector.extract_strided_slice %491 {offsets = [0, 128], sizes = [8, 128], strides = [1, 1]} : vector<8x256xf32> to vector<8x128xf32>
    %513 = vector.broadcast %31 : vector<1x128xf32> to vector<8x128xf32>
    %514 = arith.addf %512, %513 : vector<8x128xf32>
    %cst_120 = arith.constant 5.000000e-01 : f32
    %515 = vector.broadcast %cst_120 : f32 to vector<8x128xf32>
    %516 = arith.mulf %515, %514 : vector<8x128xf32>
    %517 = math.tanh %516 : vector<8x128xf32>
    %cst_121 = arith.constant 1.000000e+00 : f32
    %518 = vector.broadcast %cst_121 : f32 to vector<8x128xf32>
    %519 = arith.addf %517, %518 : vector<8x128xf32>
    %cst_122 = arith.constant 5.000000e-01 : f32
    %520 = vector.broadcast %cst_122 : f32 to vector<8x128xf32>
    %521 = arith.mulf %520, %519 : vector<8x128xf32>
    %522 = math.tanh %514 : vector<8x128xf32>
    %523 = vector.extract_strided_slice %521 {offsets = [0, 32], sizes = [8, 32], strides = [1, 1]} : vector<8x128xf32> to vector<8x32xf32>
    %524 = arith.mulf %523, %485 : vector<8x32xf32>
    %525 = vector.extract_strided_slice %521 {offsets = [0, 0], sizes = [8, 32], strides = [1, 1]} : vector<8x128xf32> to vector<8x32xf32>
    %526 = vector.extract_strided_slice %522 {offsets = [0, 64], sizes = [8, 32], strides = [1, 1]} : vector<8x128xf32> to vector<8x32xf32>
    %527 = arith.mulf %525, %526 : vector<8x32xf32>
    %528 = arith.addf %524, %527 : vector<8x32xf32>
    %529 = vector.extract_strided_slice %521 {offsets = [0, 96], sizes = [8, 32], strides = [1, 1]} : vector<8x128xf32> to vector<8x32xf32>
    %530 = math.tanh %528 : vector<8x32xf32>
    %531 = arith.mulf %529, %530 : vector<8x32xf32>
    %532 = tpu.concatenate %511, %531 in 1 : vector<8x32xf32>, vector<8x32xf32> -> vector<8x64xf32>
    %533 = arith.truncf %532 : vector<8x64xf32> to vector<8x64xbf16>
    %cst_123 = arith.constant dense<0.000000e+00> : vector<8x256xf32>
    %534 = tpu.matmul %533, %30, %cst_123 {dimension_numbers = #tpu.dot_dimension_numbers<[1], [0], [0], [1], [0, 0, 1, 1], [], []>} : vector<8x64xbf16>, vector<64x256xbf16>, vector<8x256xf32> -> vector<8x256xf32>
    %c96 = arith.constant 96 : index
    %c0_124 = arith.constant 0 : index
    %535 = vector.load %arg11[%c96, %c0_124] : memref<128x128xf32, #tpu.memory_space<vmem>>, vector<8x128xf32>
    %536 = vector.extract_strided_slice %534 {offsets = [0, 0], sizes = [8, 128], strides = [1, 1]} : vector<8x256xf32> to vector<8x128xf32>
    %537 = arith.addf %535, %536 : vector<8x128xf32>
    %cst_125 = arith.constant 5.000000e-01 : f32
    %538 = vector.broadcast %cst_125 : f32 to vector<8x128xf32>
    %539 = arith.mulf %538, %537 : vector<8x128xf32>
    %540 = math.tanh %539 : vector<8x128xf32>
    %cst_126 = arith.constant 1.000000e+00 : f32
    %541 = vector.broadcast %cst_126 : f32 to vector<8x128xf32>
    %542 = arith.addf %540, %541 : vector<8x128xf32>
    %cst_127 = arith.constant 5.000000e-01 : f32
    %543 = vector.broadcast %cst_127 : f32 to vector<8x128xf32>
    %544 = arith.mulf %543, %542 : vector<8x128xf32>
    %545 = math.tanh %537 : vector<8x128xf32>
    %546 = vector.extract_strided_slice %544 {offsets = [0, 32], sizes = [8, 32], strides = [1, 1]} : vector<8x128xf32> to vector<8x32xf32>
    %547 = arith.mulf %546, %508 : vector<8x32xf32>
    %548 = vector.extract_strided_slice %544 {offsets = [0, 0], sizes = [8, 32], strides = [1, 1]} : vector<8x128xf32> to vector<8x32xf32>
    %549 = vector.extract_strided_slice %545 {offsets = [0, 64], sizes = [8, 32], strides = [1, 1]} : vector<8x128xf32> to vector<8x32xf32>
    %550 = arith.mulf %548, %549 : vector<8x32xf32>
    %551 = arith.addf %547, %550 : vector<8x32xf32>
    %552 = vector.extract_strided_slice %544 {offsets = [0, 96], sizes = [8, 32], strides = [1, 1]} : vector<8x128xf32> to vector<8x32xf32>
    %553 = math.tanh %551 : vector<8x32xf32>
    %554 = arith.mulf %552, %553 : vector<8x32xf32>
    %555 = vector.extract_strided_slice %534 {offsets = [0, 128], sizes = [8, 128], strides = [1, 1]} : vector<8x256xf32> to vector<8x128xf32>
    %556 = vector.broadcast %31 : vector<1x128xf32> to vector<8x128xf32>
    %557 = arith.addf %555, %556 : vector<8x128xf32>
    %cst_128 = arith.constant 5.000000e-01 : f32
    %558 = vector.broadcast %cst_128 : f32 to vector<8x128xf32>
    %559 = arith.mulf %558, %557 : vector<8x128xf32>
    %560 = math.tanh %559 : vector<8x128xf32>
    %cst_129 = arith.constant 1.000000e+00 : f32
    %561 = vector.broadcast %cst_129 : f32 to vector<8x128xf32>
    %562 = arith.addf %560, %561 : vector<8x128xf32>
    %cst_130 = arith.constant 5.000000e-01 : f32
    %563 = vector.broadcast %cst_130 : f32 to vector<8x128xf32>
    %564 = arith.mulf %563, %562 : vector<8x128xf32>
    %565 = math.tanh %557 : vector<8x128xf32>
    %566 = vector.extract_strided_slice %564 {offsets = [0, 32], sizes = [8, 32], strides = [1, 1]} : vector<8x128xf32> to vector<8x32xf32>
    %567 = arith.mulf %566, %528 : vector<8x32xf32>
    %568 = vector.extract_strided_slice %564 {offsets = [0, 0], sizes = [8, 32], strides = [1, 1]} : vector<8x128xf32> to vector<8x32xf32>
    %569 = vector.extract_strided_slice %565 {offsets = [0, 64], sizes = [8, 32], strides = [1, 1]} : vector<8x128xf32> to vector<8x32xf32>
    %570 = arith.mulf %568, %569 : vector<8x32xf32>
    %571 = arith.addf %567, %570 : vector<8x32xf32>
    %572 = vector.extract_strided_slice %564 {offsets = [0, 96], sizes = [8, 32], strides = [1, 1]} : vector<8x128xf32> to vector<8x32xf32>
    %573 = math.tanh %571 : vector<8x32xf32>
    %574 = arith.mulf %572, %573 : vector<8x32xf32>
    %575 = tpu.concatenate %554, %574 in 1 : vector<8x32xf32>, vector<8x32xf32> -> vector<8x64xf32>
    %576 = arith.truncf %575 : vector<8x64xf32> to vector<8x64xbf16>
    %cst_131 = arith.constant dense<0.000000e+00> : vector<8x256xf32>
    %577 = tpu.matmul %576, %30, %cst_131 {dimension_numbers = #tpu.dot_dimension_numbers<[1], [0], [0], [1], [0, 0, 1, 1], [], []>} : vector<8x64xbf16>, vector<64x256xbf16>, vector<8x256xf32> -> vector<8x256xf32>
    %c104 = arith.constant 104 : index
    %c0_132 = arith.constant 0 : index
    %578 = vector.load %arg11[%c104, %c0_132] : memref<128x128xf32, #tpu.memory_space<vmem>>, vector<8x128xf32>
    %579 = vector.extract_strided_slice %577 {offsets = [0, 0], sizes = [8, 128], strides = [1, 1]} : vector<8x256xf32> to vector<8x128xf32>
    %580 = arith.addf %578, %579 : vector<8x128xf32>
    %cst_133 = arith.constant 5.000000e-01 : f32
    %581 = vector.broadcast %cst_133 : f32 to vector<8x128xf32>
    %582 = arith.mulf %581, %580 : vector<8x128xf32>
    %583 = math.tanh %582 : vector<8x128xf32>
    %cst_134 = arith.constant 1.000000e+00 : f32
    %584 = vector.broadcast %cst_134 : f32 to vector<8x128xf32>
    %585 = arith.addf %583, %584 : vector<8x128xf32>
    %cst_135 = arith.constant 5.000000e-01 : f32
    %586 = vector.broadcast %cst_135 : f32 to vector<8x128xf32>
    %587 = arith.mulf %586, %585 : vector<8x128xf32>
    %588 = math.tanh %580 : vector<8x128xf32>
    %589 = vector.extract_strided_slice %587 {offsets = [0, 32], sizes = [8, 32], strides = [1, 1]} : vector<8x128xf32> to vector<8x32xf32>
    %590 = arith.mulf %589, %551 : vector<8x32xf32>
    %591 = vector.extract_strided_slice %587 {offsets = [0, 0], sizes = [8, 32], strides = [1, 1]} : vector<8x128xf32> to vector<8x32xf32>
    %592 = vector.extract_strided_slice %588 {offsets = [0, 64], sizes = [8, 32], strides = [1, 1]} : vector<8x128xf32> to vector<8x32xf32>
    %593 = arith.mulf %591, %592 : vector<8x32xf32>
    %594 = arith.addf %590, %593 : vector<8x32xf32>
    %595 = vector.extract_strided_slice %587 {offsets = [0, 96], sizes = [8, 32], strides = [1, 1]} : vector<8x128xf32> to vector<8x32xf32>
    %596 = math.tanh %594 : vector<8x32xf32>
    %597 = arith.mulf %595, %596 : vector<8x32xf32>
    %598 = vector.extract_strided_slice %577 {offsets = [0, 128], sizes = [8, 128], strides = [1, 1]} : vector<8x256xf32> to vector<8x128xf32>
    %599 = vector.broadcast %31 : vector<1x128xf32> to vector<8x128xf32>
    %600 = arith.addf %598, %599 : vector<8x128xf32>
    %cst_136 = arith.constant 5.000000e-01 : f32
    %601 = vector.broadcast %cst_136 : f32 to vector<8x128xf32>
    %602 = arith.mulf %601, %600 : vector<8x128xf32>
    %603 = math.tanh %602 : vector<8x128xf32>
    %cst_137 = arith.constant 1.000000e+00 : f32
    %604 = vector.broadcast %cst_137 : f32 to vector<8x128xf32>
    %605 = arith.addf %603, %604 : vector<8x128xf32>
    %cst_138 = arith.constant 5.000000e-01 : f32
    %606 = vector.broadcast %cst_138 : f32 to vector<8x128xf32>
    %607 = arith.mulf %606, %605 : vector<8x128xf32>
    %608 = math.tanh %600 : vector<8x128xf32>
    %609 = vector.extract_strided_slice %607 {offsets = [0, 32], sizes = [8, 32], strides = [1, 1]} : vector<8x128xf32> to vector<8x32xf32>
    %610 = arith.mulf %609, %571 : vector<8x32xf32>
    %611 = vector.extract_strided_slice %607 {offsets = [0, 0], sizes = [8, 32], strides = [1, 1]} : vector<8x128xf32> to vector<8x32xf32>
    %612 = vector.extract_strided_slice %608 {offsets = [0, 64], sizes = [8, 32], strides = [1, 1]} : vector<8x128xf32> to vector<8x32xf32>
    %613 = arith.mulf %611, %612 : vector<8x32xf32>
    %614 = arith.addf %610, %613 : vector<8x32xf32>
    %615 = vector.extract_strided_slice %607 {offsets = [0, 96], sizes = [8, 32], strides = [1, 1]} : vector<8x128xf32> to vector<8x32xf32>
    %616 = math.tanh %614 : vector<8x32xf32>
    %617 = arith.mulf %615, %616 : vector<8x32xf32>
    %618 = tpu.concatenate %597, %617 in 1 : vector<8x32xf32>, vector<8x32xf32> -> vector<8x64xf32>
    %619 = arith.truncf %618 : vector<8x64xf32> to vector<8x64xbf16>
    %cst_139 = arith.constant dense<0.000000e+00> : vector<8x256xf32>
    %620 = tpu.matmul %619, %30, %cst_139 {dimension_numbers = #tpu.dot_dimension_numbers<[1], [0], [0], [1], [0, 0, 1, 1], [], []>} : vector<8x64xbf16>, vector<64x256xbf16>, vector<8x256xf32> -> vector<8x256xf32>
    %c112 = arith.constant 112 : index
    %c0_140 = arith.constant 0 : index
    %621 = vector.load %arg11[%c112, %c0_140] : memref<128x128xf32, #tpu.memory_space<vmem>>, vector<8x128xf32>
    %622 = vector.extract_strided_slice %620 {offsets = [0, 0], sizes = [8, 128], strides = [1, 1]} : vector<8x256xf32> to vector<8x128xf32>
    %623 = arith.addf %621, %622 : vector<8x128xf32>
    %cst_141 = arith.constant 5.000000e-01 : f32
    %624 = vector.broadcast %cst_141 : f32 to vector<8x128xf32>
    %625 = arith.mulf %624, %623 : vector<8x128xf32>
    %626 = math.tanh %625 : vector<8x128xf32>
    %cst_142 = arith.constant 1.000000e+00 : f32
    %627 = vector.broadcast %cst_142 : f32 to vector<8x128xf32>
    %628 = arith.addf %626, %627 : vector<8x128xf32>
    %cst_143 = arith.constant 5.000000e-01 : f32
    %629 = vector.broadcast %cst_143 : f32 to vector<8x128xf32>
    %630 = arith.mulf %629, %628 : vector<8x128xf32>
    %631 = math.tanh %623 : vector<8x128xf32>
    %632 = vector.extract_strided_slice %630 {offsets = [0, 32], sizes = [8, 32], strides = [1, 1]} : vector<8x128xf32> to vector<8x32xf32>
    %633 = arith.mulf %632, %594 : vector<8x32xf32>
    %634 = vector.extract_strided_slice %630 {offsets = [0, 0], sizes = [8, 32], strides = [1, 1]} : vector<8x128xf32> to vector<8x32xf32>
    %635 = vector.extract_strided_slice %631 {offsets = [0, 64], sizes = [8, 32], strides = [1, 1]} : vector<8x128xf32> to vector<8x32xf32>
    %636 = arith.mulf %634, %635 : vector<8x32xf32>
    %637 = arith.addf %633, %636 : vector<8x32xf32>
    %638 = vector.extract_strided_slice %630 {offsets = [0, 96], sizes = [8, 32], strides = [1, 1]} : vector<8x128xf32> to vector<8x32xf32>
    %639 = math.tanh %637 : vector<8x32xf32>
    %640 = arith.mulf %638, %639 : vector<8x32xf32>
    %641 = vector.extract_strided_slice %620 {offsets = [0, 128], sizes = [8, 128], strides = [1, 1]} : vector<8x256xf32> to vector<8x128xf32>
    %642 = vector.broadcast %31 : vector<1x128xf32> to vector<8x128xf32>
    %643 = arith.addf %641, %642 : vector<8x128xf32>
    %cst_144 = arith.constant 5.000000e-01 : f32
    %644 = vector.broadcast %cst_144 : f32 to vector<8x128xf32>
    %645 = arith.mulf %644, %643 : vector<8x128xf32>
    %646 = math.tanh %645 : vector<8x128xf32>
    %cst_145 = arith.constant 1.000000e+00 : f32
    %647 = vector.broadcast %cst_145 : f32 to vector<8x128xf32>
    %648 = arith.addf %646, %647 : vector<8x128xf32>
    %cst_146 = arith.constant 5.000000e-01 : f32
    %649 = vector.broadcast %cst_146 : f32 to vector<8x128xf32>
    %650 = arith.mulf %649, %648 : vector<8x128xf32>
    %651 = math.tanh %643 : vector<8x128xf32>
    %652 = vector.extract_strided_slice %650 {offsets = [0, 32], sizes = [8, 32], strides = [1, 1]} : vector<8x128xf32> to vector<8x32xf32>
    %653 = arith.mulf %652, %614 : vector<8x32xf32>
    %654 = vector.extract_strided_slice %650 {offsets = [0, 0], sizes = [8, 32], strides = [1, 1]} : vector<8x128xf32> to vector<8x32xf32>
    %655 = vector.extract_strided_slice %651 {offsets = [0, 64], sizes = [8, 32], strides = [1, 1]} : vector<8x128xf32> to vector<8x32xf32>
    %656 = arith.mulf %654, %655 : vector<8x32xf32>
    %657 = arith.addf %653, %656 : vector<8x32xf32>
    %658 = vector.extract_strided_slice %650 {offsets = [0, 96], sizes = [8, 32], strides = [1, 1]} : vector<8x128xf32> to vector<8x32xf32>
    %659 = math.tanh %657 : vector<8x32xf32>
    %660 = arith.mulf %658, %659 : vector<8x32xf32>
    %661 = tpu.concatenate %640, %660 in 1 : vector<8x32xf32>, vector<8x32xf32> -> vector<8x64xf32>
    %662 = arith.truncf %661 : vector<8x64xf32> to vector<8x64xbf16>
    %cst_147 = arith.constant dense<0.000000e+00> : vector<8x256xf32>
    %663 = tpu.matmul %662, %30, %cst_147 {dimension_numbers = #tpu.dot_dimension_numbers<[1], [0], [0], [1], [0, 0, 1, 1], [], []>} : vector<8x64xbf16>, vector<64x256xbf16>, vector<8x256xf32> -> vector<8x256xf32>
    %c120 = arith.constant 120 : index
    %c0_148 = arith.constant 0 : index
    %664 = vector.load %arg11[%c120, %c0_148] : memref<128x128xf32, #tpu.memory_space<vmem>>, vector<8x128xf32>
    %665 = vector.extract_strided_slice %663 {offsets = [0, 0], sizes = [8, 128], strides = [1, 1]} : vector<8x256xf32> to vector<8x128xf32>
    %666 = arith.addf %664, %665 : vector<8x128xf32>
    %cst_149 = arith.constant 5.000000e-01 : f32
    %667 = vector.broadcast %cst_149 : f32 to vector<8x128xf32>
    %668 = arith.mulf %667, %666 : vector<8x128xf32>
    %669 = math.tanh %668 : vector<8x128xf32>
    %cst_150 = arith.constant 1.000000e+00 : f32
    %670 = vector.broadcast %cst_150 : f32 to vector<8x128xf32>
    %671 = arith.addf %669, %670 : vector<8x128xf32>
    %cst_151 = arith.constant 5.000000e-01 : f32
    %672 = vector.broadcast %cst_151 : f32 to vector<8x128xf32>
    %673 = arith.mulf %672, %671 : vector<8x128xf32>
    %674 = math.tanh %666 : vector<8x128xf32>
    %675 = vector.extract_strided_slice %673 {offsets = [0, 32], sizes = [8, 32], strides = [1, 1]} : vector<8x128xf32> to vector<8x32xf32>
    %676 = arith.mulf %675, %637 : vector<8x32xf32>
    %677 = vector.extract_strided_slice %673 {offsets = [0, 0], sizes = [8, 32], strides = [1, 1]} : vector<8x128xf32> to vector<8x32xf32>
    %678 = vector.extract_strided_slice %674 {offsets = [0, 64], sizes = [8, 32], strides = [1, 1]} : vector<8x128xf32> to vector<8x32xf32>
    %679 = arith.mulf %677, %678 : vector<8x32xf32>
    %680 = arith.addf %676, %679 : vector<8x32xf32>
    %681 = vector.extract_strided_slice %673 {offsets = [0, 96], sizes = [8, 32], strides = [1, 1]} : vector<8x128xf32> to vector<8x32xf32>
    %682 = math.tanh %680 : vector<8x32xf32>
    %683 = arith.mulf %681, %682 : vector<8x32xf32>
    %684 = vector.extract_strided_slice %663 {offsets = [0, 128], sizes = [8, 128], strides = [1, 1]} : vector<8x256xf32> to vector<8x128xf32>
    %685 = vector.broadcast %31 : vector<1x128xf32> to vector<8x128xf32>
    %686 = arith.addf %684, %685 : vector<8x128xf32>
    %cst_152 = arith.constant 5.000000e-01 : f32
    %687 = vector.broadcast %cst_152 : f32 to vector<8x128xf32>
    %688 = arith.mulf %687, %686 : vector<8x128xf32>
    %689 = math.tanh %688 : vector<8x128xf32>
    %cst_153 = arith.constant 1.000000e+00 : f32
    %690 = vector.broadcast %cst_153 : f32 to vector<8x128xf32>
    %691 = arith.addf %689, %690 : vector<8x128xf32>
    %cst_154 = arith.constant 5.000000e-01 : f32
    %692 = vector.broadcast %cst_154 : f32 to vector<8x128xf32>
    %693 = arith.mulf %692, %691 : vector<8x128xf32>
    %694 = math.tanh %686 : vector<8x128xf32>
    %695 = vector.extract_strided_slice %693 {offsets = [0, 32], sizes = [8, 32], strides = [1, 1]} : vector<8x128xf32> to vector<8x32xf32>
    %696 = arith.mulf %695, %657 : vector<8x32xf32>
    %697 = vector.extract_strided_slice %693 {offsets = [0, 0], sizes = [8, 32], strides = [1, 1]} : vector<8x128xf32> to vector<8x32xf32>
    %698 = vector.extract_strided_slice %694 {offsets = [0, 64], sizes = [8, 32], strides = [1, 1]} : vector<8x128xf32> to vector<8x32xf32>
    %699 = arith.mulf %697, %698 : vector<8x32xf32>
    %700 = arith.addf %696, %699 : vector<8x32xf32>
    %701 = vector.extract_strided_slice %693 {offsets = [0, 96], sizes = [8, 32], strides = [1, 1]} : vector<8x128xf32> to vector<8x32xf32>
    %702 = math.tanh %700 : vector<8x32xf32>
    %703 = arith.mulf %701, %702 : vector<8x32xf32>
    %704 = tpu.concatenate %683, %703 in 1 : vector<8x32xf32>, vector<8x32xf32> -> vector<8x64xf32>
    %705 = arith.truncf %704 : vector<8x64xf32> to vector<8x64xbf16>
    %cst_155 = arith.constant dense<0.000000e+00> : vector<8x256xf32>
    %706 = tpu.matmul %705, %30, %cst_155 {dimension_numbers = #tpu.dot_dimension_numbers<[1], [0], [0], [1], [0, 0, 1, 1], [], []>} : vector<8x64xbf16>, vector<64x256xbf16>, vector<8x256xf32> -> vector<8x256xf32>
    %707 = vector.extract_strided_slice %706 {offsets = [0, 128], sizes = [8, 128], strides = [1, 1]} : vector<8x256xf32> to vector<8x128xf32>
    %708 = vector.broadcast %31 : vector<1x128xf32> to vector<8x128xf32>
    %709 = arith.addf %707, %708 : vector<8x128xf32>
    %cst_156 = arith.constant 5.000000e-01 : f32
    %710 = vector.broadcast %cst_156 : f32 to vector<8x128xf32>
    %711 = arith.mulf %710, %709 : vector<8x128xf32>
    %712 = math.tanh %711 : vector<8x128xf32>
    %cst_157 = arith.constant 1.000000e+00 : f32
    %713 = vector.broadcast %cst_157 : f32 to vector<8x128xf32>
    %714 = arith.addf %712, %713 : vector<8x128xf32>
    %cst_158 = arith.constant 5.000000e-01 : f32
    %715 = vector.broadcast %cst_158 : f32 to vector<8x128xf32>
    %716 = arith.mulf %715, %714 : vector<8x128xf32>
    %717 = math.tanh %709 : vector<8x128xf32>
    %718 = vector.extract_strided_slice %716 {offsets = [0, 32], sizes = [8, 32], strides = [1, 1]} : vector<8x128xf32> to vector<8x32xf32>
    %719 = arith.mulf %718, %700 : vector<8x32xf32>
    %720 = vector.extract_strided_slice %716 {offsets = [0, 0], sizes = [8, 32], strides = [1, 1]} : vector<8x128xf32> to vector<8x32xf32>
    %721 = vector.extract_strided_slice %717 {offsets = [0, 64], sizes = [8, 32], strides = [1, 1]} : vector<8x128xf32> to vector<8x32xf32>
    %722 = arith.mulf %720, %721 : vector<8x32xf32>
    %723 = arith.addf %719, %722 : vector<8x32xf32>
    %724 = vector.extract_strided_slice %716 {offsets = [0, 96], sizes = [8, 32], strides = [1, 1]} : vector<8x128xf32> to vector<8x32xf32>
    %725 = math.tanh %723 : vector<8x32xf32>
    %726 = arith.mulf %724, %725 : vector<8x32xf32>
    %c0_159 = arith.constant 0 : index
    %c0_160 = arith.constant 0 : index
    %727 = vector.load %arg10[%c0_159, %c0_160] : memref<8x32xf32, #tpu.memory_space<vmem>>, vector<8x32xf32>
    tpu.vector_store %arg10[%c0_159, %c0_160], %726 {strides = array<i32>} : memref<8x32xf32, #tpu.memory_space<vmem>>, vector<8x32xf32>,
    return
  }
  func.func @transform_0(%arg0: i32) -> (i32, i32) {
    %c0_i32 = arith.constant 0 : i32
    %c0_i32_0 = arith.constant 0 : i32
    %c0_i32_1 = arith.constant 0 : i32
    return %c0_i32, %c0_i32_0 : i32, i32
  }
  func.func @transform_1(%arg0: i32) -> (i32, i32) {
    %c0_i32 = arith.constant 0 : i32
    %c0_i32_0 = arith.constant 0 : i32
    %c0_i32_1 = arith.constant 0 : i32
    return %c0_i32, %c0_i32_0 : i32, i32
  }
  func.func @transform_2(%arg0: i32) -> (i32, i32) {
    %c0_i32 = arith.constant 0 : i32
    %c0_i32_0 = arith.constant 0 : i32
    %c0_i32_1 = arith.constant 0 : i32
    return %c0_i32, %c0_i32_0 : i32, i32
  }
  func.func @transform_3(%arg0: i32) -> (i32, i32) {
    %c0_i32 = arith.constant 0 : i32
    %c0_i32_0 = arith.constant 0 : i32
    %c0_i32_1 = arith.constant 0 : i32
    return %c0_i32, %c0_i32_0 : i32, i32
  }
  func.func @transform_4(%arg0: i32) -> (i32, i32) {
    %c0_i32 = arith.constant 0 : i32
    %c0_i32_0 = arith.constant 0 : i32
    %c0_i32_1 = arith.constant 0 : i32
    return %c0_i32, %c0_i32_0 : i32, i32
  }
  func.func @transform_5(%arg0: i32) -> (i32, i32) {
    %c0_i32 = arith.constant 0 : i32
    %c0_i32_0 = arith.constant 0 : i32
    %c0_i32_1 = arith.constant 0 : i32
    return %c0_i32, %c0_i32_0 : i32, i32
  }
  func.func @transform_6(%arg0: i32) -> (i32, i32) {
    %c0_i32 = arith.constant 0 : i32
    %c0_i32_0 = arith.constant 0 : i32
    %c0_i32_1 = arith.constant 0 : i32
    return %c0_i32, %c0_i32_0 : i32, i32
  }
  func.func @transform_7(%arg0: i32) -> (i32, i32) {
    %c0_i32 = arith.constant 0 : i32
    %c0_i32_0 = arith.constant 0 : i32
    %c0_i32_1 = arith.constant 0 : i32
    return %c0_i32, %c0_i32_0 : i32, i32
  }
  func.func @transform_8(%arg0: i32) -> (i32, i32) {
    %c0_i32 = arith.constant 0 : i32
    %c0_i32_0 = arith.constant 0 : i32
    %c0_i32_1 = arith.constant 0 : i32
    return %c0_i32, %c0_i32_0 : i32, i32
  }
  func.func @transform_9(%arg0: i32) -> (i32, i32) {
    %c0_i32 = arith.constant 0 : i32
    %c0_i32_0 = arith.constant 0 : i32
    %c0_i32_1 = arith.constant 0 : i32
    return %c0_i32, %c0_i32_0 : i32, i32
  }
}

</mosaic_0001>

<bundles_post_ra>
// kernel: convlstm_forward.1
= control target key start
LH: loop header
LB: loop body
LE: loop exit
PB: predicated region body
PF: predicated region fallthrough
CT: control target
= control target key end

     0   :  { %vm122_vm0 = vcmask 1040384   ;;  %vm123_vm1 = vcmask 1041408   ;;  %vm97_vm2 = vcmask 23552   ;;  %v2901_v1 = vmov 65535   ;;  %s2908_s29 = smov 32   ;;  %s3657_s1 = inlined_call_operand.vmem [shape: bf16[3,8], index: 1, kind: input, shape index: {}]   ;;  %s3658_s0 = inlined_call_operand.vmem [shape: bf16[128,3], index: 0, kind: input, shape index: {}]   ;;  %s3659_s2 = inlined_call_operand.vmem [shape: f32[1,8], index: 2, kind: input, shape index: {}]   ;;  %s3660_s3 = inlined_call_operand.vmem [shape: bf16[24,16], index: 3, kind: input, shape index: {}]   ;;  %s3661_s7 = inlined_call_operand.vmem [shape: bf16[64,256], index: 7, kind: input, shape index: {}]   ;;  %s3662_s5 = inlined_call_operand.vmem [shape: bf16[16,128], index: 5, kind: input, shape index: {}]   ;;  %s3663_s4 = inlined_call_operand.vmem [shape: f32[1,16], index: 4, kind: input, shape index: {}]   ;;  %s3664_s6 = inlined_call_operand.vmem [shape: f32[1,128], index: 6, kind: input, shape index: {}]   ;;  %s3665_s8 = inlined_call_operand.vmem [shape: f32[1,128], index: 8, kind: input, shape index: {}]   ;;  %s3666_s9 = inlined_call_operand.vmem [shape: f32[8,32], index: 9, kind: output, shape index: {}]  }
   0x1   :  { %v49_v0 = vld [vmem:[%s3657_s1] sm:$0x3]  ;;  %v124_v2 = vsel %vm122_vm0, 4294967295, %v2901_v1  ;;  %v2678_v6 = vld [vmem:[%s3658_s0 + $0x8] sm:$0xff]   ;;  %v2679_v7 = vld [vmem:[%s3658_s0 + $0x10] sm:$0xff]   ;;  %vm441_vm3 = vcmask 1043456  }
   0x2   :  { %v2677_v3 = vld [vmem:[%s3658_s0] sm:$0xff]   ;;  %v125_v4 = vsel %vm123_vm1, %v124_v2, 0  ;;  %v2683_v8 = vld [vmem:[%s3658_s0 + $0x30] sm:$0xff]   ;;  %v2684_v9 = vld [vmem:[%s3658_s0 + $0x38] sm:$0xff]   ;;  %vm355_vm4 = vcmask 64512   ;;  %vm372_vm5 = vcmask 130048  }
   0x3   :  { %v127_v5 = vand.u32 %v125_v4, %v49_v0  ;;  %2532 = vmatprep.mubr.msk.bf16.mxu0 %vm97_vm2, %v2677_v3  ;;  %2544 = vmatprep.mubr.msk.bf16.mxu1 %vm97_vm2, %v2683_v8  ;;  %v2680_v10 = vld [vmem:[%s3658_s0 + $0x18] sm:$0xff]   ;;  %v2681_v11 = vld [vmem:[%s3658_s0 + $0x20] sm:$0xff]   ;;  %v2682_v12 = vld [vmem:[%s3658_s0 + $0x28] sm:$0xff]   ;;  %vm416_vm6 = vcmask 195584   ;;  %vm840_vm7 = vcmask 261120   ;;  %vm768_vm8 = vcmask 523264  }
   0x4   :  { %v2685_v13 = vld [vmem:[%s3660_s3] sm:$0xff]   ;;  %v2686_v21 = vld [vmem:[%s3660_s3 + $0x8] ss:$0 sps:$4 sm:$0xff]   ;;  %s2903_s3 = smov 8  }
   0x5   :  { %2530 = vmatprep.subr.bf16.mxu0 %v127_v5  ;;  %2586 = vmatprep.subr.bf16.mxu1 %v127_v5  ;;  %v3000_v14 = vld [vmem:[%s3659_s2] ss:$0 sm:$0xff]  ;;  %v443_v27 = vsel %vm441_vm3, %v2686_v21, 0  ;;  %s2902_s2 = smov 16  }
   0x6   :  { %2531 = vmatpush3.bf16.msra.mxu0 %v127_v5  ;;  %2587 = vmatpush3.bf16.msra.mxu1 %v127_v5 }
   0x7   :  { %2548 = vmatprep.subr.bf16.mxu1 %v2685_v13 }
   0x9   :  { %2533 = vmatmul.mubr.msk.bf16.vlgmr.msra.gmra.mrb[0].mxu0 %vm97_vm2, %v2678_v6  ;;  %2545 = vmatmul.mubr.msk.bf16.vlgmr.msra.gmra.mrb[0].mxu1 %vm97_vm2, %v2684_v9 }
   0xa   :  { %2536 = vmatprep.mubr.msk.bf16.mxu0 %vm97_vm2, %v2679_v7  ;;  %2549 = vmatpush3.bf16.msra.mxu1 %v2685_v13 }
   0xb   :  { %2588 = vmatprep.subr.msk.bf16.mxu1 %vm441_vm3, %v2686_v21 }
   0xe   :  { %2551 = vmatpush3.bf16.msra.mxu1 %v443_v27 }
  0x11   :  { %2537 = vmatmul.mubr.msk.bf16.gmra.mrb[4].mxu0 %vm97_vm2, %v2680_v10 }
  0x12   :  { %2540 = vmatprep.mubr.msk.bf16.mxu0 %vm97_vm2, %v2681_v11 }
  0x19   :  { %2541 = vmatmul.mubr.msk.bf16.gmra.mrb[8].mxu0 %vm97_vm2, %v2682_v12 }
  0xdc   :  { %v2534_v15 = vpop.f32.mrb[0].mxu0  ;;  %v2546_v20 = vpop.f32.mrb[0].mxu1 }
  0xdd   :  { %v163_v16 = vpop.f32.mrb[1].mxu0  ;;  %v172_v17 = vadd.f32 %v2534_v15, %v3000_v14  ;;  %v211_v23 = vpop.f32.mrb[1].mxu1  ;;  %v220_v3 = vadd.f32 %v2546_v20, %v3000_v14  ;;  %v3095_v15 = vld [vmem:[%s3661_s7 + $0x4] ss:$8 sps:$4 sm:$0xff]  }
  0xde   :  { %v3004_v18 = vadd.f32 %v3000_v14, %v163_v16  ;;  %v2535_v19 = vpop.f32.mrb[2].mxu0  ;;  %v2547_v26 = vpop.f32.mrb[2].mxu1  ;;  %v212_v61 = vadd.f32 %v3000_v14, %v211_v23  ;;  %772 = vmatprep.subr.bf16.mxu1 %v3095_v15 }
  0xdf   :  { %v166_v22 = vpop.f32.mrb[3].mxu0  ;;  %v175_v24 = vadd.f32 %v2535_v19, %v3000_v14  ;;  %v214_v28 = vpop.f32.mrb[3].mxu1  ;;  %v3011_v29 = vmax.f32 %v172_v17, 0.0  ;;  %v223_v6 = vadd.f32 %v2547_v26, %v3000_v14  ;;  %v3082_v10 = vmax.f32 %v220_v3, 0.0  ;;  %v2690_v17 = vld [vmem:[%s3662_s5] sm:$0xff]  }
  0xe0   :  { %v167_v25 = vadd.f32 %v3000_v14, %v166_v22  ;;  %v226_v30 = vmax.f32 %v3004_v18, 0.0  ;;  %v215_v2 = vadd.f32 %v3000_v14, %v214_v28  ;;  %v3072_v5 = vmax.f32 %v212_v61, 0.0  ;;  %2568 = vmatprep.subr.bf16.mxu0 %v2690_v17 }
  0xe1   :  { %v3016_v32 = vmax.f32 %v175_v24, 0.0  ;;  %v241_v11 = vmax.f32 %v223_v6, 0.0  ;;  %v2904_v19 = vmov 0.0   ;;  %2569 = vmatpush3.bf16.msra.mxu0 %v2690_v17 }
  0xe2   :  { %v3014_v31 = vmax.f32 %v167_v25, 0.0  ;;  %v3080_v9 = vmax.f32 %v215_v2, 0.0  ;;  %953 = vmatprep.subr.bf16.mxu0 %v3095_v15  ;;  %v3146_v2 = vld [vmem:[%s3661_s7 + $0x24] ss:$8 sps:$4 sm:$0xff]  }
  0xe3   :  { %v2602_v44 = vpack.i.bf16 %v3016_v32, %v3011_v29  ;;  %v2672_v20 = vpack.i.bf16 %v2904_v19, %v241_v11 }
  0xe4   :  { %v2538_v33 = vpop.f32.mrb[4].mxu0  ;;  %v2607_v34 = vpack.i.bf16 %v3011_v29, %v3014_v31  ;;  %v2597_v35 = vpack.i.bf16 %v3014_v31, %v226_v30  ;;  %v2657_v13 = vpack.i.bf16 %v3080_v9, %v3072_v5  ;;  %v2667_v16 = vpack.i.bf16 %v3082_v10, %v3080_v9 }
  0xe5   :  { %v179_v36 = vpop.f32.mrb[5].mxu0  ;;  %v188_v41 = vadd.f32 %v2538_v33, %v3000_v14 }
  0xe6   :  { %v180_v37 = vadd.f32 %v3000_v14, %v179_v36  ;;  %v2539_v38 = vpop.f32.mrb[6].mxu0  ;;  %2608 = vrot.lane.b32.xlu1 %v2607_v34, %s2902_s2  ;;  %2598 = vrot.lane.b32.xlu0 %v2597_v35, %s2903_s3 }
  0xe7   :  { %v191_v39 = vadd.f32 %v2539_v38, %v3000_v14  ;;  %v182_v40 = vpop.f32.mrb[7].mxu0  ;;  %v3040_v48 = vmax.f32 %v188_v41, 0.0 }
  0xe8   :  { %v3028_v42 = vmax.f32 %v180_v37, 0.0  ;;  %v183_v43 = vadd.f32 %v3000_v14, %v182_v40 }
  0xe9   :  { %v3033_v45 = vmax.f32 %v191_v39, 0.0 }
  0xea   :  { %v3035_v46 = vmax.f32 %v183_v43, 0.0  ;;  %2603 = vrot.lane.b32.xlu0 %v2602_v44, %s2903_s3  ;;  %v2612_v47 = vpack.i.bf16 %v3028_v42, %v3016_v32 }
  0xeb   :  { %v2617_v55 = vpack.i.bf16 %v3033_v45, %v3040_v48 }
  0xec   :  { %v2542_v49 = vpop.f32.mrb[8].mxu0  ;;  %2613 = vrot.lane.b32.xlu1 %v2612_v47, %s2902_s2  ;;  %v2622_v50 = vpack.i.bf16 %v3035_v46, %v3028_v42  ;;  %v2627_v60 = vpack.i.bf16 %v3040_v48, %v3035_v46 }
  0xed   :  { %v195_v51 = vpop.f32.mrb[9].mxu0  ;;  %v204_v52 = vadd.f32 %v2542_v49, %v3000_v14  ;;  %v3124_v49 = vld [vmem:[%s3661_s7] ss:$8 sps:$4 sm:$0xff]  }
  0xee   :  { %v196_v53 = vadd.f32 %v3000_v14, %v195_v51  ;;  %v2543_v54 = vpop.f32.mrb[10].mxu0  ;;  %2623 = vrot.lane.b32.xlu0 %v2622_v50, %s2903_s3 }
  0xef   :  { %v207_v56 = vadd.f32 %v2543_v54, %v3000_v14  ;;  %v198_v57 = vpop.f32.mrb[11].mxu0  ;;  %v3060_v63 = vmax.f32 %v204_v52, 0.0 }
  0xf0   :  { %v3051_v58 = vmax.f32 %v196_v53, 0.0  ;;  %v199_v59 = vadd.f32 %v3000_v14, %v198_v57  ;;  %2618 = vrot.lane.b32.xlu1 %v2617_v55, %s2903_s3  ;;  %v2662_v14 = vpack.i.bf16 %v241_v11, %v3082_v10 }
  0xf1   :  { %v3058_v62 = vmax.f32 %v207_v56, 0.0 }
  0xf2   :  { %v3062_v0 = vmax.f32 %v199_v59, 0.0  ;;  %2628 = vrot.lane.b32.xlu0 %v2627_v60, %s2902_s2  ;;  %v2632_v1 = vpack.i.bf16 %v3051_v58, %v3033_v45  ;;  %v3136_v59 = vld [vmem:[%s3661_s7 + $0x10] ss:$8 sps:$4 sm:$0xff]  }
  0xf3   :  { %v2637_v7 = vpack.i.bf16 %v3058_v62, %v3060_v63  ;;  %v2642_v12 = vpack.i.bf16 %v3072_v5, %v3058_v62 }
  0xf4   :  { %2633 = vrot.lane.b32.xlu1 %v2632_v1, %s2902_s2  ;;  %v2647_v4 = vpack.i.bf16 %v3062_v0, %v3051_v58  ;;  %v2652_v8 = vpack.i.bf16 %v3060_v63, %v3062_v0 }
  0xf6   :  { %2648 = vrot.lane.b32.xlu0 %v2647_v4, %s2903_s3 }
  0xf8   :  { %2638 = vrot.lane.b32.xlu1 %v2637_v7, %s2903_s3 }
  0xfa   :  { %2653 = vrot.lane.b32.xlu0 %v2652_v8, %s2902_s2 }
  0xfc   :  { %2643 = vrot.lane.b32.xlu1 %v2642_v12, %s2902_s2 }
  0xfe   :  { %2658 = vrot.lane.b32.xlu0 %v2657_v13, %s2903_s3 }
 0x100   :  { %2663 = vrot.lane.b32.xlu1 %v2662_v14, %s2903_s3 }
 0x102   :  { %2668 = vrot.lane.b32.xlu0 %v2667_v16, %s2902_s2  ;;  %v3160_v16 = vld [vmem:[%s3661_s7 + $0x20] ss:$8 sps:$4 sm:$0xff]  }
 0x104   :  { %2673 = vrot.lane.b32.xlu1 %v2672_v20, %s2902_s2 }
 0x158   :  { %v2609_v21 = vpop.permute.xlu1 %2608  ;;  %v2599_v22 = vpop.permute.xlu0 %2598 }
 0x159   :  { %v2611_v23 = vunpack.i.h.bf16 %v2609_v21  ;;  %v2610_v24 = vunpack.i.l.bf16 %v2609_v21  ;;  %v2601_v25 = vunpack.i.h.bf16 %v2599_v22  ;;  %v2600_v26 = vunpack.i.l.bf16 %v2599_v22 }
 0x15b   :  { %v357_v27 = vsel %vm355_vm4, %v226_v30, %v2601_v25  ;;  %v356_v28 = vsel %vm355_vm4, 0.0, %v2600_v26 }
 0x15c   :  { %v373_v33 = vsel %vm372_vm5, %v356_v28, %v2610_v24  ;;  %v2604_v34 = vpop.permute.xlu0 %2603  ;;  %v374_v35 = vsel %vm372_vm5, %v357_v27, %v2611_v23 }
 0x15d   :  { %v2606_v36 = vunpack.i.h.bf16 %v2604_v34  ;;  %v2605_v37 = vunpack.i.l.bf16 %v2604_v34  ;;  %v389_v38 = vpack.c.bf16 %v374_v35, %v373_v33 }
 0x15e   :  { %v2614_v39 = vpop.permute.xlu1 %2613 }
 0x15f   :  { %v359_v40 = vsel %vm355_vm4, %v3011_v29, %v2606_v36  ;;  %v358_v18 = vsel %vm355_vm4, %v3014_v31, %v2605_v37  ;;  %v2616_v41 = vunpack.i.h.bf16 %v2614_v39  ;;  %v2615_v30 = vunpack.i.l.bf16 %v2614_v39  ;;  %2552 = vmatprep.mubr.msk.bf16.mxu1 %vm416_vm6, %v389_v38  ;;  %v3129_v31 = vld [vmem:[%s3661_s7 + $0x14] ss:$8 sps:$4 sm:$0xff]  }
 0x160   :  { %v2624_v43 = vpop.permute.xlu0 %2623 }
 0x161   :  { %v375_v44 = vsel %vm372_vm5, %v358_v18, %v2615_v30  ;;  %v376_v47 = vsel %vm372_vm5, %v359_v40, %v2616_v41  ;;  %v2626_v51 = vunpack.i.h.bf16 %v2624_v43  ;;  %v2625_v29 = vunpack.i.l.bf16 %v2624_v43 }
 0x162   :  { %v390_v50 = vpack.c.bf16 %v376_v47, %v375_v44  ;;  %v2619_v52 = vpop.permute.xlu1 %2618 }
 0x163   :  { %v2621_v53 = vunpack.i.h.bf16 %v2619_v52  ;;  %v2620_v54 = vunpack.i.l.bf16 %v2619_v52  ;;  %v361_v60 = vsel %vm355_vm4, %v3028_v42, %v2626_v51  ;;  %v360_v61 = vsel %vm355_vm4, %v3016_v32, %v2625_v29 }
 0x164   :  { %v2629_v55 = vpop.permute.xlu0 %2628  ;;  %2553 = vmatmul.mubr.msk.bf16.vlgmr.msra.gmra.mrb[4].mxu1 %vm416_vm6, %v390_v50 }
 0x165   :  { %v2631_v56 = vunpack.i.h.bf16 %v2629_v55  ;;  %v2630_v57 = vunpack.i.l.bf16 %v2629_v55  ;;  %773 = vmatpush1.bf16.msra.mxu1 %v3124_v49  ;;  %v363_v42 = vsel %vm355_vm4, %v3040_v48, %v2621_v53  ;;  %v362_v32 = vsel %vm355_vm4, %v3035_v46, %v2620_v54 }
 0x166   :  { %v2634_v1 = vpop.permute.xlu1 %2633  ;;  %774 = vmatprep.subr.bf16.mxu1 %v3129_v31 }
 0x167   :  { %v377_v3 = vsel %vm372_vm5, %v360_v61, %v2630_v57  ;;  %v378_v4 = vsel %vm372_vm5, %v361_v60, %v2631_v56  ;;  %v2636_v6 = vunpack.i.h.bf16 %v2634_v1  ;;  %v2635_v7 = vunpack.i.l.bf16 %v2634_v1 }
 0x168   :  { %v2649_v8 = vpop.permute.xlu0 %2648  ;;  %v391_v11 = vpack.c.bf16 %v378_v4, %v377_v3  ;;  %v2905_v61 = vmov 0   ;;  %v2906_v1 = vmov 0.0|0.0   ;;  %v3220_v3 = vld [vmem:[%s3663_s4] ss:$0 sm:$0xff] }
 0x169   :  { %v379_v12 = vsel %vm372_vm5, %v362_v32, %v2635_v7  ;;  %v380_v13 = vsel %vm372_vm5, %v363_v42, %v2636_v6  ;;  %v2651_v14 = vunpack.i.h.bf16 %v2649_v8  ;;  %775 = vmatpush1.bf16.msra.mxu1 %v3136_v59  ;;  %v2650_v17 = vunpack.i.l.bf16 %v2649_v8 }
 0x16a   :  { %2556 = vmatprep.mubr.msk.bf16.mxu1 %vm416_vm6, %v391_v11  ;;  %v392_v48 = vpack.c.bf16 %v380_v13, %v379_v12  ;;  %v2639_v19 = vpop.permute.xlu1 %2638  ;;  %776 = vmatprep.subr.bf16.mxu1 %v3146_v2 }
 0x16b   :  { %v2641_v46 = vunpack.i.h.bf16 %v2639_v19  ;;  %v2640_v20 = vunpack.i.l.bf16 %v2639_v19  ;;  %v365_v21 = vsel %vm355_vm4, %v3051_v58, %v2651_v14  ;;  %v364_v25 = vsel %vm355_vm4, %v3033_v45, %v2650_v17 }
 0x16c   :  { %v2654_v22 = vpop.permute.xlu0 %2653  ;;  %2557 = vmatmul.mubr.msk.bf16.gmra.mrb[8].mxu1 %vm416_vm6, %v392_v48 }
 0x16d   :  { %v2656_v23 = vunpack.i.h.bf16 %v2654_v22  ;;  %v2655_v24 = vunpack.i.l.bf16 %v2654_v22  ;;  %777 = vmatpush1.bf16.msra.mxu1 %v3160_v16  ;;  %v367_v26 = vsel %vm355_vm4, %v3060_v63, %v2641_v46  ;;  %v366_v27 = vsel %vm355_vm4, %v3062_v0, %v2640_v20 }
 0x16e   :  { %v2644_v28 = vpop.permute.xlu1 %2643 }
 0x16f   :  { %v381_v33 = vsel %vm372_vm5, %v364_v25, %v2655_v24  ;;  %v382_v58 = vsel %vm372_vm5, %v365_v21, %v2656_v23  ;;  %v2646_v34 = vunpack.i.h.bf16 %v2644_v28  ;;  %v2645_v35 = vunpack.i.l.bf16 %v2644_v28 }
 0x170   :  { %v393_v36 = vpack.c.bf16 %v382_v58, %v381_v33  ;;  %v2659_v37 = vpop.permute.xlu0 %2658 }
 0x171   :  { %v383_v38 = vsel %vm372_vm5, %v366_v27, %v2645_v35  ;;  %v384_v39 = vsel %vm372_vm5, %v367_v26, %v2646_v34  ;;  %v2661_v45 = vunpack.i.h.bf16 %v2659_v37  ;;  %v2660_v40 = vunpack.i.l.bf16 %v2659_v37 }
 0x172   :  { %2560 = vmatprep.mubr.msk.bf16.mxu1 %vm416_vm6, %v393_v36  ;;  %v2664_v63 = vpop.permute.xlu1 %2663  ;;  %v394_v18 = vpack.c.bf16 %v384_v39, %v383_v38 }
 0x173   :  { %v2666_v0 = vunpack.i.h.bf16 %v2664_v63  ;;  %v2665_v41 = vunpack.i.l.bf16 %v2664_v63  ;;  %v369_v30 = vsel %vm355_vm4, %v3072_v5, %v2661_v45  ;;  %v368_v43 = vsel %vm355_vm4, %v3058_v62, %v2660_v40 }
 0x174   :  { %2561 = vmatmul.mubr.msk.bf16.gmra.mrb[12].mxu1 %vm416_vm6, %v394_v18  ;;  %v2669_v44 = vpop.permute.xlu0 %2668 }
 0x175   :  { %v2671_v47 = vunpack.i.h.bf16 %v2669_v44  ;;  %v2670_v50 = vunpack.i.l.bf16 %v2669_v44  ;;  %v371_v51 = vsel %vm355_vm4, %v3082_v10, %v2666_v0  ;;  %v370_v29 = vsel %vm355_vm4, %v3080_v9, %v2665_v41  ;;  %v3197_v9 = vld [vmem:[%s3661_s7 + $0x34] ss:$8 sps:$4 sm:$0xff]   ;;  %v3202_v10 = vld [vmem:[%s3661_s7 + $0x30] ss:$8 sps:$4 sm:$0xff]  }
 0x176   :  { %v2674_v52 = vpop.permute.xlu1 %2673  ;;  %778 = vmatprep.subr.bf16.mxu1 %v3197_v9 }
 0x177   :  { %v385_v53 = vsel %vm372_vm5, %v368_v43, %v2670_v50  ;;  %v386_v54 = vsel %vm372_vm5, %v369_v30, %v2671_v47  ;;  %v2676_v5 = vunpack.i.h.bf16 %v2674_v52  ;;  %v2675_v55 = vunpack.i.l.bf16 %v2674_v52  ;;  %779 = vmatpush1.bf16.msra.mxu1 %v3202_v10 }
 0x178   :  { %v395_v56 = vpack.c.bf16 %v386_v54, %v385_v53  ;;  %846 = vmatprep.subr.bf16.mxu1 %v3095_v15 }
 0x179   :  { %v387_v62 = vsel %vm372_vm5, %v370_v29, %v2675_v55  ;;  %v388_v57 = vsel %vm372_vm5, %v371_v51, %v2676_v5 }
 0x17a   :  { %2564 = vmatprep.mubr.msk.bf16.mxu1 %vm416_vm6, %v395_v56  ;;  %v396_v60 = vpack.c.bf16 %v388_v57, %v387_v62 }
 0x17c   :  { %2565 = vmatmul.mubr.msk.bf16.gmra.mrb[16].mxu1 %vm416_vm6, %v396_v60 }
 0x17d   :  { %804 = vmatprep.mubr.bf16.mxu1 %v2905_v61 }
 0x184   :  { %805 = vmatmul.mubr.bf16.vlgmr.msra.gmra.mrb[20].mxu1 %v2906_v1 }
 0x185   :  { %847 = vmatpush1.bf16.msra.mxu1 %v3124_v49  ;;  %878 = vmatprep.mubr.bf16.mxu1 %v2905_v61 }
 0x186   :  { %848 = vmatprep.subr.bf16.mxu1 %v3129_v31 }
 0x189   :  { %849 = vmatpush1.bf16.msra.mxu1 %v3136_v59 }
 0x18a   :  { %850 = vmatprep.subr.bf16.mxu1 %v3146_v2 }
 0x18d   :  { %851 = vmatpush1.bf16.msra.mxu1 %v3160_v16 }
 0x18e   :  { %852 = vmatprep.subr.bf16.mxu1 %v3197_v9 }
 0x191   :  { %853 = vmatpush1.bf16.msra.mxu1 %v3202_v10 }
 0x192   :  { %1054 = vmatprep.subr.bf16.mxu1 %v3095_v15 }
 0x237   :  { %v2554_v4 = vpop.f32.mrb[4].mxu1 }
 0x238   :  { %v488_v6 = vadd.f32 %v2554_v4, %v3220_v3  ;;  %v479_v7 = vpop.f32.mrb[5].mxu1 }
 0x239   :  { %v480_v42 = vadd.f32 %v3220_v3, %v479_v7  ;;  %v2555_v32 = vpop.f32.mrb[6].mxu1 }
 0x23a   :  { %v491_v8 = vadd.f32 %v2555_v32, %v3220_v3  ;;  %v482_v11 = vpop.f32.mrb[7].mxu1  ;;  %v544_v13 = vmax.f32 %v488_v6, 0.0 }
 0x23b   :  { %v483_v12 = vadd.f32 %v3220_v3, %v482_v11  ;;  %v542_v17 = vmax.f32 %v480_v42, 0.0  ;;  %v2467_v11 = vld [vmem:[%s3664_s6] ss:$0 sm:$0xff]  ;;  %s2907_s6 = smov 64  }
 0x23c   :  { %v545_v14 = vmax.f32 %v491_v8, 0.0 }
 0x23d   :  { %v543_v48 = vmax.f32 %v483_v12, 0.0 }
 0x23e   :  { %v559_v19 = vpack.c.bf16 %v545_v14, %v544_v13 }
 0x23f   :  { %v558_v46 = vpack.c.bf16 %v543_v48, %v542_v17  ;;  %v2558_v20 = vpop.f32.mrb[8].mxu1 }
 0x240   :  { %v504_v21 = vadd.f32 %v2558_v20, %v3220_v3  ;;  %v495_v22 = vpop.f32.mrb[9].mxu1 }
 0x241   :  { %v496_v23 = vadd.f32 %v3220_v3, %v495_v22  ;;  %v2559_v24 = vpop.f32.mrb[10].mxu1  ;;  %2570 = vmatprep.mubr.msk.bf16.mxu0 %vm372_vm5, %v558_v46 }
 0x242   :  { %v507_v25 = vadd.f32 %v2559_v24, %v3220_v3  ;;  %v498_v26 = vpop.f32.mrb[11].mxu1  ;;  %2571 = vmatmul.mubr.msk.bf16.vlgmr.msra.gmra.mrb[12].mxu0 %vm372_vm5, %v559_v19  ;;  %v548_v28 = vmax.f32 %v504_v21, 0.0 }
 0x243   :  { %v499_v27 = vadd.f32 %v3220_v3, %v498_v26  ;;  %954 = vmatpush1.bf16.msra.mxu0 %v3124_v49  ;;  %v546_v58 = vmax.f32 %v496_v23, 0.0 }
 0x244   :  { %v549_v33 = vmax.f32 %v507_v25, 0.0  ;;  %955 = vmatprep.subr.bf16.mxu0 %v3129_v31 }
 0x245   :  { %v547_v34 = vmax.f32 %v499_v27, 0.0 }
 0x246   :  { %v561_v35 = vpack.c.bf16 %v549_v33, %v548_v28 }
 0x247   :  { %v560_v36 = vpack.c.bf16 %v547_v34, %v546_v58  ;;  %v2562_v37 = vpop.f32.mrb[12].mxu1  ;;  %956 = vmatpush1.bf16.msra.mxu0 %v3136_v59 }
 0x248   :  { %v520_v38 = vadd.f32 %v2562_v37, %v3220_v3  ;;  %v511_v39 = vpop.f32.mrb[13].mxu1  ;;  %957 = vmatprep.subr.bf16.mxu0 %v3146_v2 }
 0x249   :  { %2574 = vmatprep.mubr.msk.bf16.mxu0 %vm372_vm5, %v560_v36  ;;  %v512_v45 = vadd.f32 %v3220_v3, %v511_v39  ;;  %v2563_v40 = vpop.f32.mrb[14].mxu1 }
 0x24a   :  { %2575 = vmatmul.mubr.msk.bf16.gmra.mrb[16].mxu0 %vm372_vm5, %v561_v35  ;;  %v552_v63 = vmax.f32 %v520_v38, 0.0  ;;  %v523_v18 = vadd.f32 %v2563_v40, %v3220_v3  ;;  %v514_v0 = vpop.f32.mrb[15].mxu1 }
 0x24b   :  { %v550_v41 = vmax.f32 %v512_v45, 0.0  ;;  %v515_v30 = vadd.f32 %v3220_v3, %v514_v0  ;;  %958 = vmatpush1.bf16.msra.mxu0 %v3160_v16 }
 0x24c   :  { %v553_v43 = vmax.f32 %v523_v18, 0.0  ;;  %959 = vmatprep.subr.bf16.mxu0 %v3197_v9 }
 0x24d   :  { %v551_v44 = vmax.f32 %v515_v30, 0.0 }
 0x24e   :  { %v563_v47 = vpack.c.bf16 %v553_v43, %v552_v63 }
 0x24f   :  { %v562_v50 = vpack.c.bf16 %v551_v44, %v550_v41  ;;  %v2566_v51 = vpop.f32.mrb[16].mxu1  ;;  %960 = vmatpush1.bf16.msra.mxu0 %v3202_v10 }
 0x250   :  { %v536_v29 = vadd.f32 %v2566_v51, %v3220_v3  ;;  %v527_v52 = vpop.f32.mrb[17].mxu1  ;;  %1155 = vmatprep.subr.bf16.mxu0 %v3095_v15 }
 0x251   :  { %v528_v53 = vadd.f32 %v3220_v3, %v527_v52  ;;  %v2567_v54 = vpop.f32.mrb[18].mxu1  ;;  %2578 = vmatprep.mubr.msk.bf16.mxu0 %vm372_vm5, %v562_v50 }
 0x252   :  { %v556_v5 = vmax.f32 %v536_v29, 0.0  ;;  %v539_v55 = vadd.f32 %v2567_v54, %v3220_v3  ;;  %v530_v56 = vpop.f32.mrb[19].mxu1  ;;  %2579 = vmatmul.mubr.msk.bf16.gmra.mrb[20].mxu0 %vm372_vm5, %v563_v47 }
 0x253   :  { %v554_v62 = vmax.f32 %v528_v53, 0.0  ;;  %v531_v57 = vadd.f32 %v3220_v3, %v530_v56 }
 0x254   :  { %v557_v60 = vmax.f32 %v539_v55, 0.0 }
 0x255   :  { %v555_v1 = vmax.f32 %v531_v57, 0.0 }
 0x256   :  { %v565_v4 = vpack.c.bf16 %v557_v60, %v556_v5 }
 0x257   :  { %v564_v6 = vpack.c.bf16 %v555_v1, %v554_v62  ;;  %v806_v7 = vpop.f32.mrb[20].mxu1 }
 0x258   :  { %v808_v42 = vpop.f32.mrb[21].mxu1 }
 0x259   :  { %2582 = vmatprep.mubr.msk.bf16.mxu0 %vm372_vm5, %v564_v6  ;;  %v809_v32 = vpop.f32.mrb[22].mxu1  ;;  %v3306_v6 = vld [vmem:[%s3665_s8] ss:$0 sm:$0xff] }
 0x25a   :  { %2583 = vmatmul.mubr.msk.bf16.gmra.mrb[24].mxu0 %vm372_vm5, %v565_v4  ;;  %v810_v8 = vpop.f32.mrb[23].mxu1 }
 0x25b   :  { %985 = vmatprep.mubr.bf16.mxu0 %v2905_v61 }
 0x315   :  { %v2572_v12 = vpop.f32.mrb[12].mxu0 }
 0x316   :  { %v3258_v3 = vadd.f32 %v2572_v12, %v2467_v11  ;;  %v639_v13 = vpop.f32.mrb[13].mxu0 }
 0x317   :  { %v640_v14 = vadd.f32 %v2467_v11, %v639_v13  ;;  %v2573_v17 = vpop.f32.mrb[14].mxu0 }
 0x318   :  { %v3260_v48 = vadd.f32 %v2573_v17, %v2467_v11  ;;  %v642_v19 = vpop.f32.mrb[15].mxu0 }
 0x319   :  { %v813_v46 = vadd.f32 %v806_v7, %v640_v14  ;;  %v3262_v20 = vadd.f32 %v2467_v11, %v642_v19 }
 0x31b   :  { %2700 = vtanh.f32 %v813_v46  ;;  %v814_v47 = vmul.f32 0.5, %v813_v46 }
 0x31d   :  { %v2576_v21 = vpop.f32.mrb[16].mxu0  ;;  %2702 = vtanh.f32 %v814_v47 }
 0x31e   :  { %v3264_v22 = vadd.f32 %v2576_v21, %v2467_v11  ;;  %v655_v23 = vpop.f32.mrb[17].mxu0 }
 0x31f   :  { %v3266_v24 = vadd.f32 %v2467_v11, %v655_v23  ;;  %v2577_v25 = vpop.f32.mrb[18].mxu0 }
 0x320   :  { %v3268_v26 = vadd.f32 %v2577_v25, %v2467_v11  ;;  %v658_v27 = vpop.f32.mrb[19].mxu0 }
 0x321   :  { %v3270_v28 = vadd.f32 %v2467_v11, %v658_v27 }
 0x325   :  { %v2701_v33 = vpop.eup %2700  ;;  %v2580_v58 = vpop.f32.mrb[20].mxu0 }
 0x326   :  { %821 = vrot.lane.b32.xlu0 %v2701_v33, %s2907_s6  ;;  %v3273_v34 = vadd.f32 %v2580_v58, %v2467_v11  ;;  %v671_v35 = vpop.f32.mrb[21].mxu0 }
 0x327   :  { %v3275_v36 = vadd.f32 %v2467_v11, %v671_v35  ;;  %v2581_v37 = vpop.f32.mrb[22].mxu0  ;;  %v2703_v50 = vpop.eup %2702 }
 0x328   :  { %v3277_v38 = vadd.f32 %v2581_v37, %v2467_v11  ;;  %v674_v39 = vpop.f32.mrb[23].mxu0  ;;  %v816_v51 = vadd.f32 1.0, %v2703_v50 }
 0x329   :  { %v3279_v45 = vadd.f32 %v2467_v11, %v674_v39 }
 0x32a   :  { %v817_v29 = vmul.f32 0.5, %v816_v51 }
 0x32c   :  { %v819_v54 = vmul.f32 0.0, %v817_v29 }
 0x32d   :  { %v2584_v40 = vpop.f32.mrb[24].mxu0 }
 0x32e   :  { %v3281_v63 = vadd.f32 %v2584_v40, %v2467_v11  ;;  %v687_v18 = vpop.f32.mrb[25].mxu0 }
 0x32f   :  { %v3283_v0 = vadd.f32 %v2467_v11, %v687_v18  ;;  %v2585_v41 = vpop.f32.mrb[26].mxu0 }
 0x330   :  { %v3285_v30 = vadd.f32 %v2585_v41, %v2467_v11  ;;  %v690_v43 = vpop.f32.mrb[27].mxu0 }
 0x331   :  { %v3287_v44 = vadd.f32 %v2467_v11, %v690_v43 }
 0x398   :  { %v822_v52 = vpop.permute.xlu0 %821 }
 0x399   :  { %v824_v53 = vmul.f32 %v822_v52, %v817_v29 }
 0x39b   :  { %826 = vrot.lane.b32.xlu1 %v824_v53, %s2908_s29 }
 0x40d   :  { %v827_v5 = vpop.permute.xlu1 %826 }
 0x40e   :  { %v829_v55 = vadd.f32 %v827_v5, %v819_v54 }
 0x410   :  { %2704 = vtanh.f32 %v829_v55 }
 0x41a   :  { %v2705_v56 = vpop.eup %2704 }
 0x41b   :  { %832 = vrot.lane.b32.xlu0 %v2705_v56, %s2907_s6 }
 0x48d   :  { %v833_v62 = vpop.permute.xlu0 %832 }
 0x48e   :  { %v835_v57 = vmul.f32 %v833_v62, %v817_v29 }
 0x490   :  { %837 = vrot.lane.b32.xlu1 %v835_v57, %s2908_s29 }
 0x502   :  { %v838_v60 = vpop.permute.xlu1 %837 }
 0x503   :  { %v841_v1 = vsel %vm840_vm7, %v838_v60, 0.0 }
 0x504   :  { %v842_v4 = vpack.c.bf16 %v841_v1, %v841_v1 }
 0x506   :  { %2485 = vmatmul.mubr.msk.bf16.vlgmr.msra.gmra.mrb[24].mxu1 %vm768_vm8, %v842_v4 }
 0x507   :  { %1055 = vmatpush1.bf16.msra.mxu1 %v3124_v49  ;;  %1086 = vmatprep.mubr.bf16.mxu1 %v2905_v61 }
 0x508   :  { %1056 = vmatprep.subr.bf16.mxu1 %v3129_v31 }
 0x50b   :  { %1057 = vmatpush1.bf16.msra.mxu1 %v3136_v59 }
 0x50c   :  { %1058 = vmatprep.subr.bf16.mxu1 %v3146_v2 }
 0x50f   :  { %1059 = vmatpush1.bf16.msra.mxu1 %v3160_v16 }
 0x510   :  { %1060 = vmatprep.subr.bf16.mxu1 %v3197_v9 }
 0x513   :  { %1061 = vmatpush1.bf16.msra.mxu1 %v3202_v10 }
 0x514   :  { %1256 = vmatprep.subr.bf16.mxu1 %v3095_v15 }
 0x5d9   :  { %v880_v7 = vpop.f32.mrb[24].mxu1 }
 0x5da   :  { %v888_v42 = vadd.f32 %v880_v7, %v3262_v20  ;;  %v882_v32 = vpop.f32.mrb[25].mxu1 }
 0x5db   :  { %v917_v8 = vadd.f32 %v3306_v6, %v882_v32  ;;  %v884_v11 = vpop.f32.mrb[26].mxu1 }
 0x5dc   :  { %2706 = vtanh.f32 %v888_v42  ;;  %v885_v12 = vpop.f32.mrb[27].mxu1  ;;  %v889_v17 = vmul.f32 0.5, %v888_v42 }
 0x5dd   :  { %2708 = vtanh.f32 %v917_v8  ;;  %v918_v19 = vmul.f32 0.5, %v917_v8 }
 0x5de   :  { %2710 = vtanh.f32 %v889_v17 }
 0x5df   :  { %2712 = vtanh.f32 %v918_v19 }
 0x5e6   :  { %v2707_v13 = vpop.eup %2706 }
 0x5e7   :  { %v2709_v14 = vpop.eup %2708  ;;  %896 = vrot.lane.b32.xlu0 %v2707_v13, %s2907_s6 }
 0x5e8   :  { %925 = vrot.lane.b32.xlu1 %v2709_v14, %s2907_s6  ;;  %v2711_v46 = vpop.eup %2710 }
 0x5e9   :  { %v2713_v21 = vpop.eup %2712  ;;  %v891_v20 = vadd.f32 1.0, %v2711_v46 }
 0x5ea   :  { %v920_v23 = vadd.f32 1.0, %v2713_v21 }
 0x5eb   :  { %v892_v25 = vmul.f32 0.5, %v891_v20 }
 0x5ec   :  { %v921_v33 = vmul.f32 0.5, %v920_v23 }
 0x5ed   :  { %v894_v39 = vmul.f32 %v892_v25, %v829_v55 }
 0x5ee   :  { %v923_v18 = vmul.f32 0.0, %v921_v33 }
 0x659   :  { %v897_v27 = vpop.permute.xlu0 %896 }
 0x65a   :  { %v899_v58 = vmul.f32 %v897_v27, %v892_v25  ;;  %v926_v35 = vpop.permute.xlu1 %925 }
 0x65b   :  { %v928_v37 = vmul.f32 %v926_v35, %v921_v33 }
 0x65c   :  { %901 = vrot.lane.b32.xlu0 %v899_v58, %s2908_s29 }
 0x65d   :  { %930 = vrot.lane.b32.xlu1 %v928_v37, %s2908_s29 }
 0x6ce   :  { %v902_v40 = vpop.permute.xlu0 %901 }
 0x6cf   :  { %v904_v41 = vadd.f32 %v902_v40, %v894_v39  ;;  %v931_v43 = vpop.permute.xlu1 %930 }
 0x6d0   :  { %v933_v47 = vadd.f32 %v931_v43, %v923_v18 }
 0x6d1   :  { %2714 = vtanh.f32 %v904_v41 }
 0x6d2   :  { %2716 = vtanh.f32 %v933_v47 }
 0x6db   :  { %v2715_v50 = vpop.eup %2714 }
 0x6dc   :  { %v2717_v51 = vpop.eup %2716  ;;  %907 = vrot.lane.b32.xlu0 %v2715_v50, %s2907_s6 }
 0x6dd   :  { %936 = vrot.lane.b32.xlu1 %v2717_v51, %s2907_s6 }
 0x74e   :  { %v908_v29 = vpop.permute.xlu0 %907 }
 0x74f   :  { %v910_v52 = vmul.f32 %v908_v29, %v892_v25  ;;  %v937_v53 = vpop.permute.xlu1 %936 }
 0x750   :  { %v939_v54 = vmul.f32 %v937_v53, %v921_v33 }
 0x751   :  { %941 = vrot.lane.b32.xlu0 %v910_v52, %s2908_s29 }
 0x752   :  { %945 = vrot.lane.b32.xlu1 %v939_v54, %s2907_s6 }
 0x7c3   :  { %v942_v5 = vpop.permute.xlu0 %941 }
 0x7c4   :  { %v946_v55 = vpop.permute.xlu1 %945 }
 0x7c5   :  { %v948_v56 = vsel %vm840_vm7, %v942_v5, %v946_v55 }
 0x7c6   :  { %v949_v62 = vpack.c.bf16 %v948_v56, %v948_v56 }
 0x7c8   :  { %2487 = vmatmul.mubr.msk.bf16.vlgmr.msra.gmra.mrb[28].mxu0 %vm768_vm8, %v949_v62 }
 0x7c9   :  { %1156 = vmatpush1.bf16.msra.mxu0 %v3124_v49  ;;  %1187 = vmatprep.mubr.bf16.mxu0 %v2905_v61 }
 0x7ca   :  { %1157 = vmatprep.subr.bf16.mxu0 %v3129_v31 }
 0x7cd   :  { %1158 = vmatpush1.bf16.msra.mxu0 %v3136_v59 }
 0x7ce   :  { %1159 = vmatprep.subr.bf16.mxu0 %v3146_v2 }
 0x7d1   :  { %1160 = vmatpush1.bf16.msra.mxu0 %v3160_v16 }
 0x7d2   :  { %1161 = vmatprep.subr.bf16.mxu0 %v3197_v9 }
 0x7d5   :  { %1162 = vmatpush1.bf16.msra.mxu0 %v3202_v10 }
 0x7d6   :  { %1357 = vmatprep.subr.bf16.mxu0 %v3095_v15 }
 0x89b   :  { %v987_v57 = vpop.f32.mrb[28].mxu0 }
 0x89c   :  { %v995_v60 = vadd.f32 %v987_v57, %v3258_v3  ;;  %v989_v1 = vpop.f32.mrb[29].mxu0 }
 0x89d   :  { %v1018_v4 = vadd.f32 %v3306_v6, %v989_v1  ;;  %v991_v7 = vpop.f32.mrb[30].mxu0 }
 0x89e   :  { %2718 = vtanh.f32 %v995_v60  ;;  %v992_v42 = vpop.f32.mrb[31].mxu0  ;;  %v996_v11 = vmul.f32 0.5, %v995_v60 }
 0x89f   :  { %2720 = vtanh.f32 %v1018_v4  ;;  %v1019_v12 = vmul.f32 0.5, %v1018_v4 }
 0x8a0   :  { %2722 = vtanh.f32 %v996_v11 }
 0x8a1   :  { %2724 = vtanh.f32 %v1019_v12 }
 0x8a8   :  { %v2719_v32 = vpop.eup %2718 }
 0x8a9   :  { %v2721_v8 = vpop.eup %2720  ;;  %1003 = vrot.lane.b32.xlu0 %v2719_v32, %s2907_s6 }
 0x8aa   :  { %1026 = vrot.lane.b32.xlu1 %v2721_v8, %s2907_s6  ;;  %v2723_v13 = vpop.eup %2722 }
 0x8ab   :  { %v2725_v14 = vpop.eup %2724  ;;  %v998_v3 = vadd.f32 1.0, %v2723_v13 }
 0x8ac   :  { %v1021_v17 = vadd.f32 1.0, %v2725_v14 }
 0x8ad   :  { %v999_v19 = vmul.f32 0.5, %v998_v3 }
 0x8ae   :  { %v1022_v21 = vmul.f32 0.5, %v1021_v17 }
 0x8af   :  { %v1001_v27 = vmul.f32 %v999_v19, %v904_v41 }
 0x8b0   :  { %v1024_v58 = vmul.f32 %v1022_v21, %v933_v47 }
 0x91b   :  { %v1004_v46 = vpop.permute.xlu0 %1003 }
 0x91c   :  { %v1006_v20 = vmul.f32 %v1004_v46, %v999_v19  ;;  %v1027_v23 = vpop.permute.xlu1 %1026 }
 0x91d   :  { %v1029_v25 = vmul.f32 %v1027_v23, %v1022_v21 }
 0x91e   :  { %1008 = vrot.lane.b32.xlu0 %v1006_v20, %s2908_s29 }
 0x91f   :  { %1031 = vrot.lane.b32.xlu1 %v1029_v25, %s2908_s29 }
 0x990   :  { %v1009_v33 = vpop.permute.xlu0 %1008 }
 0x991   :  { %v1011_v35 = vadd.f32 %v1009_v33, %v1001_v27  ;;  %v1032_v37 = vpop.permute.xlu1 %1031 }
 0x992   :  { %v1034_v39 = vadd.f32 %v1032_v37, %v1024_v58 }
 0x993   :  { %2726 = vtanh.f32 %v1011_v35 }
 0x994   :  { %2728 = vtanh.f32 %v1034_v39 }
 0x99d   :  { %v2727_v40 = vpop.eup %2726 }
 0x99e   :  { %v2729_v18 = vpop.eup %2728  ;;  %1014 = vrot.lane.b32.xlu0 %v2727_v40, %s2907_s6 }
 0x99f   :  { %1037 = vrot.lane.b32.xlu1 %v2729_v18, %s2907_s6 }
 0xa10   :  { %v1015_v43 = vpop.permute.xlu0 %1014 }
 0xa11   :  { %v1017_v50 = vmul.f32 %v1015_v43, %v999_v19  ;;  %v1038_v51 = vpop.permute.xlu1 %1037 }
 0xa12   :  { %v1040_v29 = vmul.f32 %v1038_v51, %v1022_v21 }
 0xa13   :  { %1042 = vrot.lane.b32.xlu0 %v1017_v50, %s2908_s29 }
 0xa14   :  { %1046 = vrot.lane.b32.xlu1 %v1040_v29, %s2907_s6 }
 0xa85   :  { %v1043_v41 = vpop.permute.xlu0 %1042 }
 0xa86   :  { %v1047_v47 = vpop.permute.xlu1 %1046 }
 0xa87   :  { %v1049_v52 = vsel %vm840_vm7, %v1043_v41, %v1047_v47 }
 0xa88   :  { %v1050_v53 = vpack.c.bf16 %v1049_v52, %v1049_v52 }
 0xa8a   :  { %2488 = vmatmul.mubr.msk.bf16.vlgmr.msra.gmra.mrb[28].mxu1 %vm768_vm8, %v1050_v53 }
 0xa8b   :  { %1257 = vmatpush1.bf16.msra.mxu1 %v3124_v49  ;;  %1288 = vmatprep.mubr.bf16.mxu1 %v2905_v61 }
 0xa8c   :  { %1258 = vmatprep.subr.bf16.mxu1 %v3129_v31 }
 0xa8f   :  { %1259 = vmatpush1.bf16.msra.mxu1 %v3136_v59 }
 0xa90   :  { %1260 = vmatprep.subr.bf16.mxu1 %v3146_v2 }
 0xa93   :  { %1261 = vmatpush1.bf16.msra.mxu1 %v3160_v16 }
 0xa94   :  { %1262 = vmatprep.subr.bf16.mxu1 %v3197_v9 }
 0xa97   :  { %1263 = vmatpush1.bf16.msra.mxu1 %v3202_v10 }
 0xa98   :  { %1458 = vmatprep.subr.bf16.mxu1 %v3095_v15 }
 0xb5d   :  { %v1088_v54 = vpop.f32.mrb[28].mxu1 }
 0xb5e   :  { %v1096_v5 = vadd.f32 %v1088_v54, %v3260_v48  ;;  %v1090_v55 = vpop.f32.mrb[29].mxu1 }
 0xb5f   :  { %v1119_v56 = vadd.f32 %v3306_v6, %v1090_v55  ;;  %v1092_v62 = vpop.f32.mrb[30].mxu1 }
 0xb60   :  { %2730 = vtanh.f32 %v1096_v5  ;;  %v1093_v57 = vpop.f32.mrb[31].mxu1  ;;  %v1097_v4 = vmul.f32 0.5, %v1096_v5 }
 0xb61   :  { %2732 = vtanh.f32 %v1119_v56  ;;  %v1120_v7 = vmul.f32 0.5, %v1119_v56 }
 0xb62   :  { %2734 = vtanh.f32 %v1097_v4 }
 0xb63   :  { %2736 = vtanh.f32 %v1120_v7 }
 0xb6a   :  { %v2731_v60 = vpop.eup %2730 }
 0xb6b   :  { %v2733_v1 = vpop.eup %2732  ;;  %1104 = vrot.lane.b32.xlu0 %v2731_v60, %s2907_s6 }
 0xb6c   :  { %1127 = vrot.lane.b32.xlu1 %v2733_v1, %s2907_s6  ;;  %v2735_v42 = vpop.eup %2734 }
 0xb6d   :  { %v2737_v32 = vpop.eup %2736  ;;  %v1099_v48 = vadd.f32 1.0, %v2735_v42 }
 0xb6e   :  { %v1122_v8 = vadd.f32 1.0, %v2737_v32 }
 0xb6f   :  { %v1100_v11 = vmul.f32 0.5, %v1099_v48 }
 0xb70   :  { %v1123_v13 = vmul.f32 0.5, %v1122_v8 }
 0xb71   :  { %v1102_v19 = vmul.f32 %v1100_v11, %v1011_v35 }
 0xb72   :  { %v1125_v21 = vmul.f32 %v1123_v13, %v1034_v39 }
 0xbdd   :  { %v1105_v12 = vpop.permute.xlu0 %1104 }
 0xbde   :  { %v1107_v14 = vmul.f32 %v1105_v12, %v1100_v11  ;;  %v1128_v3 = vpop.permute.xlu1 %1127 }
 0xbdf   :  { %v1130_v17 = vmul.f32 %v1128_v3, %v1123_v13 }
 0xbe0   :  { %1109 = vrot.lane.b32.xlu0 %v1107_v14, %s2908_s29 }
 0xbe1   :  { %1132 = vrot.lane.b32.xlu1 %v1130_v17, %s2908_s29 }
 0xc52   :  { %v1110_v46 = vpop.permute.xlu0 %1109 }
 0xc53   :  { %v1112_v20 = vadd.f32 %v1110_v46, %v1102_v19  ;;  %v1133_v23 = vpop.permute.xlu1 %1132 }
 0xc54   :  { %v1135_v25 = vadd.f32 %v1133_v23, %v1125_v21 }
 0xc55   :  { %2738 = vtanh.f32 %v1112_v20 }
 0xc56   :  { %2740 = vtanh.f32 %v1135_v25 }
 0xc5f   :  { %v2739_v27 = vpop.eup %2738 }
 0xc60   :  { %v2741_v33 = vpop.eup %2740  ;;  %1115 = vrot.lane.b32.xlu0 %v2739_v27, %s2907_s6 }
 0xc61   :  { %1138 = vrot.lane.b32.xlu1 %v2741_v33, %s2907_s6 }
 0xcd2   :  { %v1116_v58 = vpop.permute.xlu0 %1115 }
 0xcd3   :  { %v1118_v37 = vmul.f32 %v1116_v58, %v1100_v11  ;;  %v1139_v40 = vpop.permute.xlu1 %1138  ;;  %v3394_v58 = vld [vmem:[%s3661_s7 + $0x4] ss:$8 sps:$4 sm:$0xff]  }
 0xcd4   :  { %v1141_v18 = vmul.f32 %v1139_v40, %v1123_v13 }
 0xcd5   :  { %1143 = vrot.lane.b32.xlu0 %v1118_v37, %s2908_s29 }
 0xcd6   :  { %1147 = vrot.lane.b32.xlu1 %v1141_v18, %s2907_s6 }
 0xd47   :  { %v1144_v35 = vpop.permute.xlu0 %1143 }
 0xd48   :  { %v1148_v39 = vpop.permute.xlu1 %1147 }
 0xd49   :  { %v1150_v43 = vsel %vm840_vm7, %v1144_v35, %v1148_v39 }
 0xd4a   :  { %v1151_v50 = vpack.c.bf16 %v1150_v43, %v1150_v43 }
 0xd4c   :  { %2489 = vmatmul.mubr.msk.bf16.vlgmr.msra.gmra.mrb[32].mxu0 %vm768_vm8, %v1151_v50 }
 0xd4d   :  { %1358 = vmatpush1.bf16.msra.mxu0 %v3124_v49  ;;  %1389 = vmatprep.mubr.bf16.mxu0 %v2905_v61 }
 0xd4e   :  { %1359 = vmatprep.subr.bf16.mxu0 %v3129_v31 }
 0xd51   :  { %1360 = vmatpush1.bf16.msra.mxu0 %v3136_v59 }
 0xd52   :  { %1361 = vmatprep.subr.bf16.mxu0 %v3146_v2 }
 0xd55   :  { %1362 = vmatpush1.bf16.msra.mxu0 %v3160_v16 }
 0xd56   :  { %1363 = vmatprep.subr.bf16.mxu0 %v3197_v9 }
 0xd59   :  { %1364 = vmatpush1.bf16.msra.mxu0 %v3202_v10 }
 0xd5a   :  { %1559 = vmatprep.subr.bf16.mxu0 %v3095_v15 }
 0xe1f   :  { %v1189_v51 = vpop.f32.mrb[32].mxu0 }
 0xe20   :  { %v1197_v29 = vadd.f32 %v1189_v51, %v3266_v24  ;;  %v1191_v41 = vpop.f32.mrb[33].mxu0 }
 0xe21   :  { %v1220_v47 = vadd.f32 %v3306_v6, %v1191_v41  ;;  %v1193_v52 = vpop.f32.mrb[34].mxu0 }
 0xe22   :  { %2742 = vtanh.f32 %v1197_v29  ;;  %v1194_v53 = vpop.f32.mrb[35].mxu0  ;;  %v1198_v55 = vmul.f32 0.5, %v1197_v29 }
 0xe23   :  { %2744 = vtanh.f32 %v1220_v47  ;;  %v1221_v56 = vmul.f32 0.5, %v1220_v47 }
 0xe24   :  { %2746 = vtanh.f32 %v1198_v55 }
 0xe25   :  { %2748 = vtanh.f32 %v1221_v56 }
 0xe2c   :  { %v2743_v54 = vpop.eup %2742 }
 0xe2d   :  { %v2745_v5 = vpop.eup %2744  ;;  %1205 = vrot.lane.b32.xlu0 %v2743_v54, %s2907_s6 }
 0xe2e   :  { %1228 = vrot.lane.b32.xlu1 %v2745_v5, %s2907_s6  ;;  %v2747_v15 = vpop.eup %2746 }
 0xe2f   :  { %v2749_v62 = vpop.eup %2748  ;;  %v1200_v24 = vadd.f32 1.0, %v2747_v15 }
 0xe30   :  { %v1223_v57 = vadd.f32 1.0, %v2749_v62 }
 0xe31   :  { %v1201_v60 = vmul.f32 0.5, %v1200_v24 }
 0xe32   :  { %v1224_v4 = vmul.f32 0.5, %v1223_v57 }
 0xe33   :  { %v1203_v48 = vmul.f32 %v1201_v60, %v1112_v20 }
 0xe34   :  { %v1226_v11 = vmul.f32 %v1224_v4, %v1135_v25 }
 0xe9f   :  { %v1206_v1 = vpop.permute.xlu0 %1205 }
 0xea0   :  { %v1208_v7 = vmul.f32 %v1206_v1, %v1201_v60  ;;  %v1229_v42 = vpop.permute.xlu1 %1228 }
 0xea1   :  { %v1231_v32 = vmul.f32 %v1229_v42, %v1224_v4 }
 0xea2   :  { %1210 = vrot.lane.b32.xlu0 %v1208_v7, %s2908_s29 }
 0xea3   :  { %1233 = vrot.lane.b32.xlu1 %v1231_v32, %s2908_s29 }
 0xf14   :  { %v1211_v8 = vpop.permute.xlu0 %1210 }
 0xf15   :  { %v1213_v12 = vadd.f32 %v1211_v8, %v1203_v48  ;;  %v1234_v13 = vpop.permute.xlu1 %1233 }
 0xf16   :  { %v1236_v14 = vadd.f32 %v1234_v13, %v1226_v11  ;;  %v3419_v13 = vld [vmem:[%s3661_s7 + $0x14] ss:$8 sps:$4 sm:$0xff]  }
 0xf17   :  { %2750 = vtanh.f32 %v1213_v12 }
 0xf18   :  { %2752 = vtanh.f32 %v1236_v14 }
 0xf21   :  { %v2751_v3 = vpop.eup %2750 }
 0xf22   :  { %v2753_v17 = vpop.eup %2752  ;;  %1216 = vrot.lane.b32.xlu0 %v2751_v3, %s2907_s6  ;;  %v3431_v3 = vld [vmem:[%s3661_s7 + $0x24] ss:$8 sps:$4 sm:$0xff]  }
 0xf23   :  { %1239 = vrot.lane.b32.xlu1 %v2753_v17, %s2907_s6  ;;  %v3437_v17 = vld [vmem:[%s3661_s7 + $0x20] ss:$8 sps:$4 sm:$0xff]  }
 0xf94   :  { %v1217_v19 = vpop.permute.xlu0 %1216 }
 0xf95   :  { %v1219_v46 = vmul.f32 %v1217_v19, %v1201_v60  ;;  %v1240_v21 = vpop.permute.xlu1 %1239 }
 0xf96   :  { %v1242_v23 = vmul.f32 %v1240_v21, %v1224_v4 }
 0xf97   :  { %1244 = vrot.lane.b32.xlu0 %v1219_v46, %s2908_s29 }
 0xf98   :  { %1248 = vrot.lane.b32.xlu1 %v1242_v23, %s2907_s6 }
0x1009   :  { %v1245_v20 = vpop.permute.xlu0 %1244 }
0x100a   :  { %v1249_v25 = vpop.permute.xlu1 %1248 }
0x100b   :  { %v1251_v27 = vsel %vm840_vm7, %v1245_v20, %v1249_v25 }
0x100c   :  { %v1252_v33 = vpack.c.bf16 %v1251_v27, %v1251_v27 }
0x100e   :  { %2490 = vmatmul.mubr.msk.bf16.vlgmr.msra.gmra.mrb[32].mxu1 %vm768_vm8, %v1252_v33 }
0x100f   :  { %1459 = vmatpush1.bf16.msra.mxu1 %v3124_v49  ;;  %1490 = vmatprep.mubr.bf16.mxu1 %v2905_v61 }
0x1010   :  { %1460 = vmatprep.subr.bf16.mxu1 %v3129_v31 }
0x1013   :  { %1461 = vmatpush1.bf16.msra.mxu1 %v3136_v59 }
0x1014   :  { %1462 = vmatprep.subr.bf16.mxu1 %v3146_v2 }
0x1017   :  { %1463 = vmatpush1.bf16.msra.mxu1 %v3160_v16 }
0x1018   :  { %1464 = vmatprep.subr.bf16.mxu1 %v3197_v9 }
0x101b   :  { %1465 = vmatpush1.bf16.msra.mxu1 %v3202_v10 }
0x101c   :  { %1660 = vmatprep.subr.bf16.mxu1 %v3394_v58 }
0x10e1   :  { %v1290_v49 = vpop.f32.mrb[32].mxu1 }
0x10e2   :  { %v1298_v31 = vadd.f32 %v1290_v49, %v3270_v28  ;;  %v1292_v37 = vpop.f32.mrb[33].mxu1 }
0x10e3   :  { %v1321_v59 = vadd.f32 %v3306_v6, %v1292_v37  ;;  %v1294_v2 = vpop.f32.mrb[34].mxu1 }
0x10e4   :  { %2754 = vtanh.f32 %v1298_v31  ;;  %v1295_v16 = vpop.f32.mrb[35].mxu1  ;;  %v1299_v35 = vmul.f32 0.5, %v1298_v31 }
0x10e5   :  { %2756 = vtanh.f32 %v1321_v59  ;;  %v1322_v39 = vmul.f32 0.5, %v1321_v59 }
0x10e6   :  { %2758 = vtanh.f32 %v1299_v35 }
0x10e7   :  { %2760 = vtanh.f32 %v1322_v39 }
0x10ee   :  { %v2755_v40 = vpop.eup %2754 }
0x10ef   :  { %v2757_v18 = vpop.eup %2756  ;;  %1306 = vrot.lane.b32.xlu0 %v2755_v40, %s2907_s6 }
0x10f0   :  { %1329 = vrot.lane.b32.xlu1 %v2757_v18, %s2907_s6  ;;  %v2759_v43 = vpop.eup %2758 }
0x10f1   :  { %v2761_v50 = vpop.eup %2760  ;;  %v1301_v28 = vadd.f32 1.0, %v2759_v43 }
0x10f2   :  { %v1324_v51 = vadd.f32 1.0, %v2761_v50 }
0x10f3   :  { %v1302_v29 = vmul.f32 0.5, %v1301_v28 }
0x10f4   :  { %v1325_v47 = vmul.f32 0.5, %v1324_v51 }
0x10f5   :  { %v1304_v5 = vmul.f32 %v1302_v29, %v1213_v12  ;;  %v3412_v12 = vld [vmem:[%s3661_s7] ss:$8 sps:$4 sm:$0xff]  }
0x10f6   :  { %v1327_v56 = vmul.f32 %v1325_v47, %v1236_v14  ;;  %v3425_v14 = vld [vmem:[%s3661_s7 + $0x10] ss:$8 sps:$4 sm:$0xff]  }
0x1161   :  { %v1307_v41 = vpop.permute.xlu0 %1306 }
0x1162   :  { %v1309_v52 = vmul.f32 %v1307_v41, %v1302_v29  ;;  %v1330_v53 = vpop.permute.xlu1 %1329 }
0x1163   :  { %v1332_v54 = vmul.f32 %v1330_v53, %v1325_v47 }
0x1164   :  { %1311 = vrot.lane.b32.xlu0 %v1309_v52, %s2908_s29 }
0x1165   :  { %1334 = vrot.lane.b32.xlu1 %v1332_v54, %s2908_s29 }
0x11d6   :  { %v1312_v55 = vpop.permute.xlu0 %1311 }
0x11d7   :  { %v1314_v15 = vadd.f32 %v1312_v55, %v1304_v5  ;;  %v1335_v62 = vpop.permute.xlu1 %1334 }
0x11d8   :  { %v1337_v24 = vadd.f32 %v1335_v62, %v1327_v56 }
0x11d9   :  { %2762 = vtanh.f32 %v1314_v15 }
0x11da   :  { %2764 = vtanh.f32 %v1337_v24 }
0x11e3   :  { %v2763_v57 = vpop.eup %2762 }
0x11e4   :  { %v2765_v60 = vpop.eup %2764  ;;  %1317 = vrot.lane.b32.xlu0 %v2763_v57, %s2907_s6  ;;  %v3470_v57 = vld [vmem:[%s3661_s7 + $0x30] ss:$8 sps:$4 sm:$0xff]  }
0x11e5   :  { %1340 = vrot.lane.b32.xlu1 %v2765_v60, %s2907_s6 }
0x1256   :  { %v1318_v1 = vpop.permute.xlu0 %1317 }
0x1257   :  { %v1320_v4 = vmul.f32 %v1318_v1, %v1302_v29  ;;  %v1341_v7 = vpop.permute.xlu1 %1340 }
0x1258   :  { %v1343_v42 = vmul.f32 %v1341_v7, %v1325_v47 }
0x1259   :  { %1345 = vrot.lane.b32.xlu0 %v1320_v4, %s2908_s29 }
0x125a   :  { %1349 = vrot.lane.b32.xlu1 %v1343_v42, %s2907_s6 }
0x12cb   :  { %v1346_v32 = vpop.permute.xlu0 %1345 }
0x12cc   :  { %v1350_v48 = vpop.permute.xlu1 %1349 }
0x12cd   :  { %v1352_v8 = vsel %vm840_vm7, %v1346_v32, %v1350_v48 }
0x12ce   :  { %v1353_v11 = vpack.c.bf16 %v1352_v8, %v1352_v8 }
0x12d0   :  { %2491 = vmatmul.mubr.msk.bf16.vlgmr.msra.gmra.mrb[36].mxu0 %vm768_vm8, %v1353_v11 }
0x12d1   :  { %1560 = vmatpush1.bf16.msra.mxu0 %v3412_v12  ;;  %1591 = vmatprep.mubr.bf16.mxu0 %v2905_v61 }
0x12d2   :  { %1561 = vmatprep.subr.bf16.mxu0 %v3419_v13 }
0x12d5   :  { %1562 = vmatpush1.bf16.msra.mxu0 %v3425_v14 }
0x12d6   :  { %1563 = vmatprep.subr.bf16.mxu0 %v3431_v3 }
0x12d9   :  { %1564 = vmatpush1.bf16.msra.mxu0 %v3437_v17 }
0x12da   :  { %1565 = vmatprep.subr.bf16.mxu0 %v3197_v9 }
0x12dd   :  { %1566 = vmatpush1.bf16.msra.mxu0 %v3202_v10 }
0x12de   :  { %1761 = vmatprep.subr.bf16.mxu0 %v3394_v58 }
0x13a3   :  { %v1391_v19 = vpop.f32.mrb[36].mxu0 }
0x13a4   :  { %v1399_v46 = vadd.f32 %v1391_v19, %v3264_v22  ;;  %v1393_v21 = vpop.f32.mrb[37].mxu0 }
0x13a5   :  { %v1422_v23 = vadd.f32 %v3306_v6, %v1393_v21  ;;  %v1395_v20 = vpop.f32.mrb[38].mxu0 }
0x13a6   :  { %2766 = vtanh.f32 %v1399_v46  ;;  %v1396_v25 = vpop.f32.mrb[39].mxu0  ;;  %v1400_v9 = vmul.f32 0.5, %v1399_v46 }
0x13a7   :  { %2768 = vtanh.f32 %v1422_v23  ;;  %v1423_v10 = vmul.f32 0.5, %v1422_v23 }
0x13a8   :  { %2770 = vtanh.f32 %v1400_v9 }
0x13a9   :  { %2772 = vtanh.f32 %v1423_v10 }
0x13b0   :  { %v2767_v27 = vpop.eup %2766 }
0x13b1   :  { %v2769_v33 = vpop.eup %2768  ;;  %1407 = vrot.lane.b32.xlu0 %v2767_v27, %s2907_s6 }
0x13b2   :  { %1430 = vrot.lane.b32.xlu1 %v2769_v33, %s2907_s6  ;;  %v2771_v49 = vpop.eup %2770 }
0x13b3   :  { %v2773_v31 = vpop.eup %2772  ;;  %v1402_v22 = vadd.f32 1.0, %v2771_v49 }
0x13b4   :  { %v1425_v37 = vadd.f32 1.0, %v2773_v31 }
0x13b5   :  { %v1403_v59 = vmul.f32 0.5, %v1402_v22 }
0x13b6   :  { %v1426_v16 = vmul.f32 0.5, %v1425_v37 }
0x13b7   :  { %v1405_v39 = vmul.f32 %v1403_v59, %v1314_v15 }
0x13b8   :  { %v1428_v50 = vmul.f32 %v1426_v16, %v1337_v24  ;;  %v3464_v24 = vld [vmem:[%s3661_s7 + $0x34] ss:$8 sps:$4 sm:$0xff]  }
0x1423   :  { %v1408_v2 = vpop.permute.xlu0 %1407 }
0x1424   :  { %v1410_v40 = vmul.f32 %v1408_v2, %v1403_v59  ;;  %v1431_v18 = vpop.permute.xlu1 %1430 }
0x1425   :  { %v1433_v35 = vmul.f32 %v1431_v18, %v1426_v16 }
0x1426   :  { %1412 = vrot.lane.b32.xlu0 %v1410_v40, %s2908_s29 }
0x1427   :  { %1435 = vrot.lane.b32.xlu1 %v1433_v35, %s2908_s29 }
0x1498   :  { %v1413_v43 = vpop.permute.xlu0 %1412 }
0x1499   :  { %v1415_v28 = vadd.f32 %v1413_v43, %v1405_v39  ;;  %v1436_v51 = vpop.permute.xlu1 %1435 }
0x149a   :  { %v1438_v29 = vadd.f32 %v1436_v51, %v1428_v50 }
0x149b   :  { %2774 = vtanh.f32 %v1415_v28 }
0x149c   :  { %2776 = vtanh.f32 %v1438_v29 }
0x14a5   :  { %v2775_v41 = vpop.eup %2774 }
0x14a6   :  { %v2777_v47 = vpop.eup %2776  ;;  %1418 = vrot.lane.b32.xlu0 %v2775_v41, %s2907_s6 }
0x14a7   :  { %1441 = vrot.lane.b32.xlu1 %v2777_v47, %s2907_s6 }
0x1518   :  { %v1419_v52 = vpop.permute.xlu0 %1418 }
0x1519   :  { %v1421_v53 = vmul.f32 %v1419_v52, %v1403_v59  ;;  %v1442_v54 = vpop.permute.xlu1 %1441 }
0x151a   :  { %v1444_v5 = vmul.f32 %v1442_v54, %v1426_v16 }
0x151b   :  { %1446 = vrot.lane.b32.xlu0 %v1421_v53, %s2908_s29 }
0x151c   :  { %1450 = vrot.lane.b32.xlu1 %v1444_v5, %s2907_s6 }
0x158d   :  { %v1447_v55 = vpop.permute.xlu0 %1446 }
0x158e   :  { %v1451_v56 = vpop.permute.xlu1 %1450 }
0x158f   :  { %v1453_v15 = vsel %vm840_vm7, %v1447_v55, %v1451_v56 }
0x1590   :  { %v1454_v62 = vpack.c.bf16 %v1453_v15, %v1453_v15 }
0x1592   :  { %2492 = vmatmul.mubr.msk.bf16.vlgmr.msra.gmra.mrb[36].mxu1 %vm768_vm8, %v1454_v62 }
0x1593   :  { %1661 = vmatpush1.bf16.msra.mxu1 %v3412_v12  ;;  %1692 = vmatprep.mubr.bf16.mxu1 %v2905_v61 }
0x1594   :  { %1662 = vmatprep.subr.bf16.mxu1 %v3419_v13 }
0x1597   :  { %1663 = vmatpush1.bf16.msra.mxu1 %v3425_v14 }
0x1598   :  { %1664 = vmatprep.subr.bf16.mxu1 %v3431_v3 }
0x159b   :  { %1665 = vmatpush1.bf16.msra.mxu1 %v3437_v17 }
0x159c   :  { %1666 = vmatprep.subr.bf16.mxu1 %v3464_v24 }
0x159f   :  { %1667 = vmatpush1.bf16.msra.mxu1 %v3470_v57 }
0x15a0   :  { %1862 = vmatprep.subr.bf16.mxu1 %v3394_v58 }
0x1665   :  { %v1492_v60 = vpop.f32.mrb[36].mxu1 }
0x1666   :  { %v1500_v1 = vadd.f32 %v1492_v60, %v3268_v26  ;;  %v1494_v4 = vpop.f32.mrb[37].mxu1 }
0x1667   :  { %v1523_v7 = vadd.f32 %v3306_v6, %v1494_v4  ;;  %v1496_v42 = vpop.f32.mrb[38].mxu1 }
0x1668   :  { %2778 = vtanh.f32 %v1500_v1  ;;  %v1497_v32 = vpop.f32.mrb[39].mxu1  ;;  %v1501_v11 = vmul.f32 0.5, %v1500_v1 }
0x1669   :  { %2780 = vtanh.f32 %v1523_v7  ;;  %v1524_v19 = vmul.f32 0.5, %v1523_v7 }
0x166a   :  { %2782 = vtanh.f32 %v1501_v11 }
0x166b   :  { %2784 = vtanh.f32 %v1524_v19 }
0x1672   :  { %v2779_v48 = vpop.eup %2778 }
0x1673   :  { %v2781_v8 = vpop.eup %2780  ;;  %1508 = vrot.lane.b32.xlu0 %v2779_v48, %s2907_s6 }
0x1674   :  { %1531 = vrot.lane.b32.xlu1 %v2781_v8, %s2907_s6  ;;  %v2783_v46 = vpop.eup %2782 }
0x1675   :  { %v2785_v21 = vpop.eup %2784  ;;  %v1503_v26 = vadd.f32 1.0, %v2783_v46 }
0x1676   :  { %v1526_v23 = vadd.f32 1.0, %v2785_v21 }
0x1677   :  { %v1504_v20 = vmul.f32 0.5, %v1503_v26 }
0x1678   :  { %v1527_v27 = vmul.f32 0.5, %v1526_v23 }
0x1679   :  { %v1506_v49 = vmul.f32 %v1504_v20, %v1415_v28 }
0x167a   :  { %v1529_v22 = vmul.f32 %v1527_v27, %v1438_v29 }
0x16e5   :  { %v1509_v25 = vpop.permute.xlu0 %1508 }
0x16e6   :  { %v1511_v33 = vmul.f32 %v1509_v25, %v1504_v20  ;;  %v1532_v9 = vpop.permute.xlu1 %1531 }
0x16e7   :  { %v1534_v10 = vmul.f32 %v1532_v9, %v1527_v27 }
0x16e8   :  { %1513 = vrot.lane.b32.xlu0 %v1511_v33, %s2908_s29 }
0x16e9   :  { %1536 = vrot.lane.b32.xlu1 %v1534_v10, %s2908_s29 }
0x175a   :  { %v1514_v31 = vpop.permute.xlu0 %1513 }
0x175b   :  { %v1516_v37 = vadd.f32 %v1514_v31, %v1506_v49  ;;  %v1537_v59 = vpop.permute.xlu1 %1536 }
0x175c   :  { %v1539_v2 = vadd.f32 %v1537_v59, %v1529_v22 }
0x175d   :  { %2786 = vtanh.f32 %v1516_v37 }
0x175e   :  { %2788 = vtanh.f32 %v1539_v2 }
0x1767   :  { %v2787_v16 = vpop.eup %2786 }
0x1768   :  { %v2789_v40 = vpop.eup %2788  ;;  %1519 = vrot.lane.b32.xlu0 %v2787_v16, %s2907_s6 }
0x1769   :  { %1542 = vrot.lane.b32.xlu1 %v2789_v40, %s2907_s6 }
0x17da   :  { %v1520_v18 = vpop.permute.xlu0 %1519 }
0x17db   :  { %v1522_v35 = vmul.f32 %v1520_v18, %v1504_v20  ;;  %v1543_v39 = vpop.permute.xlu1 %1542 }
0x17dc   :  { %v1545_v43 = vmul.f32 %v1543_v39, %v1527_v27 }
0x17dd   :  { %1547 = vrot.lane.b32.xlu0 %v1522_v35, %s2908_s29 }
0x17de   :  { %1551 = vrot.lane.b32.xlu1 %v1545_v43, %s2907_s6 }
0x184f   :  { %v1548_v50 = vpop.permute.xlu0 %1547 }
0x1850   :  { %v1552_v28 = vpop.permute.xlu1 %1551 }
0x1851   :  { %v1554_v51 = vsel %vm840_vm7, %v1548_v50, %v1552_v28 }
0x1852   :  { %v1555_v29 = vpack.c.bf16 %v1554_v51, %v1554_v51 }
0x1854   :  { %2493 = vmatmul.mubr.msk.bf16.vlgmr.msra.gmra.mrb[40].mxu0 %vm768_vm8, %v1555_v29 }
0x1855   :  { %1762 = vmatpush1.bf16.msra.mxu0 %v3412_v12  ;;  %1793 = vmatprep.mubr.bf16.mxu0 %v2905_v61 }
0x1856   :  { %1763 = vmatprep.subr.bf16.mxu0 %v3419_v13 }
0x1859   :  { %1764 = vmatpush1.bf16.msra.mxu0 %v3425_v14 }
0x185a   :  { %1765 = vmatprep.subr.bf16.mxu0 %v3431_v3 }
0x185d   :  { %1766 = vmatpush1.bf16.msra.mxu0 %v3437_v17 }
0x185e   :  { %1767 = vmatprep.subr.bf16.mxu0 %v3464_v24 }
0x1861   :  { %1768 = vmatpush1.bf16.msra.mxu0 %v3470_v57 }
0x1862   :  { %1963 = vmatprep.subr.bf16.mxu0 %v3394_v58 }
0x1927   :  { %v1593_v41 = vpop.f32.mrb[40].mxu0 }
0x1928   :  { %v1601_v47 = vadd.f32 %v1593_v41, %v3275_v36  ;;  %v1595_v52 = vpop.f32.mrb[41].mxu0 }
0x1929   :  { %v1624_v53 = vadd.f32 %v3306_v6, %v1595_v52  ;;  %v1597_v54 = vpop.f32.mrb[42].mxu0 }
0x192a   :  { %2790 = vtanh.f32 %v1601_v47  ;;  %v1598_v5 = vpop.f32.mrb[43].mxu0  ;;  %v1602_v15 = vmul.f32 0.5, %v1601_v47 }
0x192b   :  { %2792 = vtanh.f32 %v1624_v53  ;;  %v1625_v62 = vmul.f32 0.5, %v1624_v53 }
0x192c   :  { %2794 = vtanh.f32 %v1602_v15 }
0x192d   :  { %2796 = vtanh.f32 %v1625_v62 }
0x1934   :  { %v2791_v55 = vpop.eup %2790 }
0x1935   :  { %v2793_v56 = vpop.eup %2792  ;;  %1609 = vrot.lane.b32.xlu0 %v2791_v55, %s2907_s6 }
0x1936   :  { %1632 = vrot.lane.b32.xlu1 %v2793_v56, %s2907_s6  ;;  %v2795_v60 = vpop.eup %2794 }
0x1937   :  { %v2797_v1 = vpop.eup %2796  ;;  %v1604_v36 = vadd.f32 1.0, %v2795_v60 }
0x1938   :  { %v1627_v4 = vadd.f32 1.0, %v2797_v1 }
0x1939   :  { %v1605_v7 = vmul.f32 0.5, %v1604_v36 }
0x193a   :  { %v1628_v32 = vmul.f32 0.5, %v1627_v4 }
0x193b   :  { %v1607_v19 = vmul.f32 %v1605_v7, %v1516_v37 }
0x193c   :  { %v1630_v21 = vmul.f32 %v1628_v32, %v1539_v2 }
0x19a7   :  { %v1610_v42 = vpop.permute.xlu0 %1609 }
0x19a8   :  { %v1612_v48 = vmul.f32 %v1610_v42, %v1605_v7  ;;  %v1633_v8 = vpop.permute.xlu1 %1632 }
0x19a9   :  { %v1635_v11 = vmul.f32 %v1633_v8, %v1628_v32 }
0x19aa   :  { %1614 = vrot.lane.b32.xlu0 %v1612_v48, %s2908_s29 }
0x19ab   :  { %1637 = vrot.lane.b32.xlu1 %v1635_v11, %s2908_s29 }
0x1a1c   :  { %v1615_v46 = vpop.permute.xlu0 %1614 }
0x1a1d   :  { %v1617_v26 = vadd.f32 %v1615_v46, %v1607_v19  ;;  %v1638_v23 = vpop.permute.xlu1 %1637 }
0x1a1e   :  { %v1640_v20 = vadd.f32 %v1638_v23, %v1630_v21 }
0x1a1f   :  { %2798 = vtanh.f32 %v1617_v26 }
0x1a20   :  { %2800 = vtanh.f32 %v1640_v20 }
0x1a29   :  { %v2799_v25 = vpop.eup %2798 }
0x1a2a   :  { %v2801_v27 = vpop.eup %2800  ;;  %1620 = vrot.lane.b32.xlu0 %v2799_v25, %s2907_s6  ;;  %v3541_v25 = vld [vmem:[%s3665_s8] ss:$0 sm:$0xff] }
0x1a2b   :  { %1643 = vrot.lane.b32.xlu1 %v2801_v27, %s2907_s6 }
0x1a9c   :  { %v1621_v33 = vpop.permute.xlu0 %1620 }
0x1a9d   :  { %v1623_v9 = vmul.f32 %v1621_v33, %v1605_v7  ;;  %v1644_v10 = vpop.permute.xlu1 %1643 }
0x1a9e   :  { %v1646_v49 = vmul.f32 %v1644_v10, %v1628_v32 }
0x1a9f   :  { %1648 = vrot.lane.b32.xlu0 %v1623_v9, %s2908_s29 }
0x1aa0   :  { %1652 = vrot.lane.b32.xlu1 %v1646_v49, %s2907_s6 }
0x1b11   :  { %v1649_v31 = vpop.permute.xlu0 %1648 }
0x1b12   :  { %v1653_v22 = vpop.permute.xlu1 %1652 }
0x1b13   :  { %v1655_v37 = vsel %vm840_vm7, %v1649_v31, %v1653_v22 }
0x1b14   :  { %v1656_v59 = vpack.c.bf16 %v1655_v37, %v1655_v37 }
0x1b16   :  { %2494 = vmatmul.mubr.msk.bf16.vlgmr.msra.gmra.mrb[40].mxu1 %vm768_vm8, %v1656_v59 }
0x1b17   :  { %1863 = vmatpush1.bf16.msra.mxu1 %v3412_v12  ;;  %1894 = vmatprep.mubr.bf16.mxu1 %v2905_v61 }
0x1b18   :  { %1864 = vmatprep.subr.bf16.mxu1 %v3419_v13 }
0x1b1b   :  { %1865 = vmatpush1.bf16.msra.mxu1 %v3425_v14 }
0x1b1c   :  { %1866 = vmatprep.subr.bf16.mxu1 %v3431_v3 }
0x1b1f   :  { %1867 = vmatpush1.bf16.msra.mxu1 %v3437_v17 }
0x1b20   :  { %1868 = vmatprep.subr.bf16.mxu1 %v3464_v24 }
0x1b23   :  { %1869 = vmatpush1.bf16.msra.mxu1 %v3470_v57 }
0x1b24   :  { %2064 = vmatprep.subr.bf16.mxu1 %v3394_v58 }
0x1be9   :  { %v1694_v2 = vpop.f32.mrb[40].mxu1 }
0x1bea   :  { %v1702_v16 = vadd.f32 %v1694_v2, %v3279_v45  ;;  %v1696_v40 = vpop.f32.mrb[41].mxu1 }
0x1beb   :  { %v1725_v18 = vadd.f32 %v3306_v6, %v1696_v40  ;;  %v1698_v35 = vpop.f32.mrb[42].mxu1 }
0x1bec   :  { %2802 = vtanh.f32 %v1702_v16  ;;  %v1699_v39 = vpop.f32.mrb[43].mxu1  ;;  %v1703_v28 = vmul.f32 0.5, %v1702_v16 }
0x1bed   :  { %2804 = vtanh.f32 %v1725_v18  ;;  %v1726_v51 = vmul.f32 0.5, %v1725_v18 }
0x1bee   :  { %2806 = vtanh.f32 %v1703_v28 }
0x1bef   :  { %2808 = vtanh.f32 %v1726_v51 }
0x1bf6   :  { %v2803_v43 = vpop.eup %2802 }
0x1bf7   :  { %v2805_v50 = vpop.eup %2804  ;;  %1710 = vrot.lane.b32.xlu0 %v2803_v43, %s2907_s6 }
0x1bf8   :  { %1733 = vrot.lane.b32.xlu1 %v2805_v50, %s2907_s6  ;;  %v2807_v29 = vpop.eup %2806 }
0x1bf9   :  { %v2809_v41 = vpop.eup %2808  ;;  %v1705_v45 = vadd.f32 1.0, %v2807_v29 }
0x1bfa   :  { %v1728_v47 = vadd.f32 1.0, %v2809_v41 }
0x1bfb   :  { %v1706_v52 = vmul.f32 0.5, %v1705_v45 }
0x1bfc   :  { %v1729_v53 = vmul.f32 0.5, %v1728_v47 }
0x1bfd   :  { %v1708_v56 = vmul.f32 %v1706_v52, %v1617_v26 }
0x1bfe   :  { %v1731_v62 = vmul.f32 %v1729_v53, %v1640_v20 }
0x1c69   :  { %v1711_v6 = vpop.permute.xlu0 %1710 }
0x1c6a   :  { %v1713_v54 = vmul.f32 %v1711_v6, %v1706_v52  ;;  %v1734_v5 = vpop.permute.xlu1 %1733 }
0x1c6b   :  { %v1736_v55 = vmul.f32 %v1734_v5, %v1729_v53 }
0x1c6c   :  { %1715 = vrot.lane.b32.xlu0 %v1713_v54, %s2908_s29 }
0x1c6d   :  { %1738 = vrot.lane.b32.xlu1 %v1736_v55, %s2908_s29 }
0x1cde   :  { %v1716_v15 = vpop.permute.xlu0 %1715 }
0x1cdf   :  { %v1718_v60 = vadd.f32 %v1716_v15, %v1708_v56  ;;  %v1739_v1 = vpop.permute.xlu1 %1738 }
0x1ce0   :  { %v1741_v36 = vadd.f32 %v1739_v1, %v1731_v62 }
0x1ce1   :  { %2810 = vtanh.f32 %v1718_v60 }
0x1ce2   :  { %2812 = vtanh.f32 %v1741_v36 }
0x1ceb   :  { %v2811_v4 = vpop.eup %2810 }
0x1cec   :  { %v2813_v7 = vpop.eup %2812  ;;  %1721 = vrot.lane.b32.xlu0 %v2811_v4, %s2907_s6 }
0x1ced   :  { %1744 = vrot.lane.b32.xlu1 %v2813_v7, %s2907_s6 }
0x1d5e   :  { %v1722_v42 = vpop.permute.xlu0 %1721 }
0x1d5f   :  { %v1724_v32 = vmul.f32 %v1722_v42, %v1706_v52  ;;  %v1745_v48 = vpop.permute.xlu1 %1744 }
0x1d60   :  { %v1747_v8 = vmul.f32 %v1745_v48, %v1729_v53 }
0x1d61   :  { %1749 = vrot.lane.b32.xlu0 %v1724_v32, %s2908_s29 }
0x1d62   :  { %1753 = vrot.lane.b32.xlu1 %v1747_v8, %s2907_s6 }
0x1dd3   :  { %v1750_v11 = vpop.permute.xlu0 %1749 }
0x1dd4   :  { %v1754_v19 = vpop.permute.xlu1 %1753 }
0x1dd5   :  { %v1756_v46 = vsel %vm840_vm7, %v1750_v11, %v1754_v19 }
0x1dd6   :  { %v1757_v21 = vpack.c.bf16 %v1756_v46, %v1756_v46 }
0x1dd8   :  { %2495 = vmatmul.mubr.msk.bf16.vlgmr.msra.gmra.mrb[44].mxu0 %vm768_vm8, %v1757_v21 }
0x1dd9   :  { %1964 = vmatpush1.bf16.msra.mxu0 %v3412_v12  ;;  %1995 = vmatprep.mubr.bf16.mxu0 %v2905_v61 }
0x1dda   :  { %1965 = vmatprep.subr.bf16.mxu0 %v3419_v13 }
0x1ddd   :  { %1966 = vmatpush1.bf16.msra.mxu0 %v3425_v14 }
0x1dde   :  { %1967 = vmatprep.subr.bf16.mxu0 %v3431_v3 }
0x1de1   :  { %1968 = vmatpush1.bf16.msra.mxu0 %v3437_v17 }
0x1de2   :  { %1969 = vmatprep.subr.bf16.mxu0 %v3464_v24 }
0x1de5   :  { %1970 = vmatpush1.bf16.msra.mxu0 %v3470_v57 }
0x1de6   :  { %2165 = vmatprep.subr.bf16.mxu0 %v3394_v58 }
0x1eab   :  { %v1795_v26 = vpop.f32.mrb[44].mxu0 }
0x1eac   :  { %v1803_v23 = vadd.f32 %v1795_v26, %v3273_v34  ;;  %v1797_v20 = vpop.f32.mrb[45].mxu0 }
0x1ead   :  { %v1826_v27 = vadd.f32 %v3541_v25, %v1797_v20  ;;  %v1799_v33 = vpop.f32.mrb[46].mxu0 }
0x1eae   :  { %2814 = vtanh.f32 %v1803_v23  ;;  %v1800_v9 = vpop.f32.mrb[47].mxu0  ;;  %v1804_v31 = vmul.f32 0.5, %v1803_v23 }
0x1eaf   :  { %2816 = vtanh.f32 %v1826_v27  ;;  %v1827_v34 = vmul.f32 0.5, %v1826_v27 }
0x1eb0   :  { %2818 = vtanh.f32 %v1804_v31 }
0x1eb1   :  { %2820 = vtanh.f32 %v1827_v34 }
0x1eb8   :  { %v2815_v10 = vpop.eup %2814 }
0x1eb9   :  { %v2817_v49 = vpop.eup %2816  ;;  %1811 = vrot.lane.b32.xlu0 %v2815_v10, %s2907_s6 }
0x1eba   :  { %1834 = vrot.lane.b32.xlu1 %v2817_v49, %s2907_s6  ;;  %v2819_v22 = vpop.eup %2818 }
0x1ebb   :  { %v2821_v37 = vpop.eup %2820  ;;  %v1806_v59 = vadd.f32 1.0, %v2819_v22 }
0x1ebc   :  { %v1829_v2 = vadd.f32 1.0, %v2821_v37 }
0x1ebd   :  { %v1807_v16 = vmul.f32 0.5, %v1806_v59 }
0x1ebe   :  { %v1830_v18 = vmul.f32 0.5, %v1829_v2 }
0x1ebf   :  { %v1809_v50 = vmul.f32 %v1807_v16, %v1718_v60 }
0x1ec0   :  { %v1832_v51 = vmul.f32 %v1830_v18, %v1741_v36 }
0x1f2b   :  { %v1812_v40 = vpop.permute.xlu0 %1811 }
0x1f2c   :  { %v1814_v35 = vmul.f32 %v1812_v40, %v1807_v16  ;;  %v1835_v39 = vpop.permute.xlu1 %1834 }
0x1f2d   :  { %v1837_v43 = vmul.f32 %v1835_v39, %v1830_v18 }
0x1f2e   :  { %1816 = vrot.lane.b32.xlu0 %v1814_v35, %s2908_s29 }
0x1f2f   :  { %1839 = vrot.lane.b32.xlu1 %v1837_v43, %s2908_s29 }
0x1fa0   :  { %v1817_v28 = vpop.permute.xlu0 %1816 }
0x1fa1   :  { %v1819_v29 = vadd.f32 %v1817_v28, %v1809_v50  ;;  %v1840_v41 = vpop.permute.xlu1 %1839 }
0x1fa2   :  { %v1842_v45 = vadd.f32 %v1840_v41, %v1832_v51 }
0x1fa3   :  { %2822 = vtanh.f32 %v1819_v29 }
0x1fa4   :  { %2824 = vtanh.f32 %v1842_v45 }
0x1fad   :  { %v2823_v47 = vpop.eup %2822 }
0x1fae   :  { %v2825_v52 = vpop.eup %2824  ;;  %1822 = vrot.lane.b32.xlu0 %v2823_v47, %s2907_s6 }
0x1faf   :  { %1845 = vrot.lane.b32.xlu1 %v2825_v52, %s2907_s6 }
0x2020   :  { %v1823_v6 = vpop.permute.xlu0 %1822 }
0x2021   :  { %v1825_v53 = vmul.f32 %v1823_v6, %v1807_v16  ;;  %v1846_v54 = vpop.permute.xlu1 %1845 }
0x2022   :  { %v1848_v5 = vmul.f32 %v1846_v54, %v1830_v18 }
0x2023   :  { %1850 = vrot.lane.b32.xlu0 %v1825_v53, %s2908_s29 }
0x2024   :  { %1854 = vrot.lane.b32.xlu1 %v1848_v5, %s2907_s6 }
0x2095   :  { %v1851_v55 = vpop.permute.xlu0 %1850 }
0x2096   :  { %v1855_v56 = vpop.permute.xlu1 %1854 }
0x2097   :  { %v1857_v15 = vsel %vm840_vm7, %v1851_v55, %v1855_v56 }
0x2098   :  { %v1858_v62 = vpack.c.bf16 %v1857_v15, %v1857_v15 }
0x209a   :  { %2496 = vmatmul.mubr.msk.bf16.vlgmr.msra.gmra.mrb[44].mxu1 %vm768_vm8, %v1858_v62 }
0x209b   :  { %2065 = vmatpush1.bf16.msra.mxu1 %v3412_v12  ;;  %2096 = vmatprep.mubr.bf16.mxu1 %v2905_v61 }
0x209c   :  { %2066 = vmatprep.subr.bf16.mxu1 %v3419_v13 }
0x209f   :  { %2067 = vmatpush1.bf16.msra.mxu1 %v3425_v14 }
0x20a0   :  { %2068 = vmatprep.subr.bf16.mxu1 %v3431_v3 }
0x20a3   :  { %2069 = vmatpush1.bf16.msra.mxu1 %v3437_v17 }
0x20a4   :  { %2070 = vmatprep.subr.bf16.mxu1 %v3464_v24 }
0x20a7   :  { %2071 = vmatpush1.bf16.msra.mxu1 %v3470_v57 }
0x20a8   :  { %2266 = vmatprep.subr.bf16.mxu1 %v3394_v58 }
0x216d   :  { %v1896_v60 = vpop.f32.mrb[44].mxu1 }
0x216e   :  { %v1904_v1 = vadd.f32 %v1896_v60, %v3277_v38  ;;  %v1898_v36 = vpop.f32.mrb[45].mxu1 }
0x216f   :  { %v1927_v4 = vadd.f32 %v3541_v25, %v1898_v36  ;;  %v1900_v7 = vpop.f32.mrb[46].mxu1 }
0x2170   :  { %2826 = vtanh.f32 %v1904_v1  ;;  %v1901_v42 = vpop.f32.mrb[47].mxu1  ;;  %v1905_v8 = vmul.f32 0.5, %v1904_v1 }
0x2171   :  { %2828 = vtanh.f32 %v1927_v4  ;;  %v1928_v11 = vmul.f32 0.5, %v1927_v4 }
0x2172   :  { %2830 = vtanh.f32 %v1905_v8 }
0x2173   :  { %2832 = vtanh.f32 %v1928_v11 }
0x217a   :  { %v2827_v32 = vpop.eup %2826 }
0x217b   :  { %v2829_v48 = vpop.eup %2828  ;;  %1912 = vrot.lane.b32.xlu0 %v2827_v32, %s2907_s6 }
0x217c   :  { %1935 = vrot.lane.b32.xlu1 %v2829_v48, %s2907_s6  ;;  %v2831_v19 = vpop.eup %2830 }
0x217d   :  { %v2833_v46 = vpop.eup %2832  ;;  %v1907_v38 = vadd.f32 1.0, %v2831_v19 }
0x217e   :  { %v1930_v21 = vadd.f32 1.0, %v2833_v46 }
0x217f   :  { %v1908_v26 = vmul.f32 0.5, %v1907_v38 }
0x2180   :  { %v1931_v20 = vmul.f32 0.5, %v1930_v21 }
0x2181   :  { %v1910_v10 = vmul.f32 %v1908_v26, %v1819_v29 }
0x2182   :  { %v1933_v31 = vmul.f32 %v1931_v20, %v1842_v45 }
0x21ed   :  { %v1913_v23 = vpop.permute.xlu0 %1912 }
0x21ee   :  { %v1915_v27 = vmul.f32 %v1913_v23, %v1908_v26  ;;  %v1936_v33 = vpop.permute.xlu1 %1935 }
0x21ef   :  { %v1938_v9 = vmul.f32 %v1936_v33, %v1931_v20 }
0x21f0   :  { %1917 = vrot.lane.b32.xlu0 %v1915_v27, %s2908_s29 }
0x21f1   :  { %1940 = vrot.lane.b32.xlu1 %v1938_v9, %s2908_s29 }
0x2262   :  { %v1918_v49 = vpop.permute.xlu0 %1917 }
0x2263   :  { %v1920_v34 = vadd.f32 %v1918_v49, %v1910_v10  ;;  %v1941_v22 = vpop.permute.xlu1 %1940 }
0x2264   :  { %v1943_v37 = vadd.f32 %v1941_v22, %v1933_v31 }
0x2265   :  { %2834 = vtanh.f32 %v1920_v34 }
0x2266   :  { %2836 = vtanh.f32 %v1943_v37 }
0x226f   :  { %v2835_v59 = vpop.eup %2834 }
0x2270   :  { %v2837_v2 = vpop.eup %2836  ;;  %1923 = vrot.lane.b32.xlu0 %v2835_v59, %s2907_s6 }
0x2271   :  { %1946 = vrot.lane.b32.xlu1 %v2837_v2, %s2907_s6 }
0x22e2   :  { %v1924_v16 = vpop.permute.xlu0 %1923 }
0x22e3   :  { %v1926_v40 = vmul.f32 %v1924_v16, %v1908_v26  ;;  %v1947_v18 = vpop.permute.xlu1 %1946 }
0x22e4   :  { %v1949_v35 = vmul.f32 %v1947_v18, %v1931_v20 }
0x22e5   :  { %1951 = vrot.lane.b32.xlu0 %v1926_v40, %s2908_s29 }
0x22e6   :  { %1955 = vrot.lane.b32.xlu1 %v1949_v35, %s2907_s6 }
0x2357   :  { %v1952_v39 = vpop.permute.xlu0 %1951 }
0x2358   :  { %v1956_v43 = vpop.permute.xlu1 %1955 }
0x2359   :  { %v1958_v50 = vsel %vm840_vm7, %v1952_v39, %v1956_v43 }
0x235a   :  { %v1959_v28 = vpack.c.bf16 %v1958_v50, %v1958_v50 }
0x235c   :  { %2497 = vmatmul.mubr.msk.bf16.vlgmr.msra.gmra.mrb[48].mxu0 %vm768_vm8, %v1959_v28 }
0x235d   :  { %2166 = vmatpush1.bf16.msra.mxu0 %v3412_v12  ;;  %2197 = vmatprep.mubr.bf16.mxu0 %v2905_v61 }
0x235e   :  { %2167 = vmatprep.subr.bf16.mxu0 %v3419_v13 }
0x2361   :  { %2168 = vmatpush1.bf16.msra.mxu0 %v3425_v14 }
0x2362   :  { %2169 = vmatprep.subr.bf16.mxu0 %v3431_v3 }
0x2365   :  { %2170 = vmatpush1.bf16.msra.mxu0 %v3437_v17 }
0x2366   :  { %2171 = vmatprep.subr.bf16.mxu0 %v3464_v24 }
0x2369   :  { %2172 = vmatpush1.bf16.msra.mxu0 %v3470_v57 }
0x236a   :  { %2367 = vmatprep.subr.bf16.mxu0 %v3394_v58 }
0x242f   :  { %v1997_v51 = vpop.f32.mrb[48].mxu0 }
0x2430   :  { %v2005_v29 = vadd.f32 %v1997_v51, %v3283_v0  ;;  %v1999_v41 = vpop.f32.mrb[49].mxu0 }
0x2431   :  { %v2028_v45 = vadd.f32 %v3541_v25, %v1999_v41  ;;  %v2001_v47 = vpop.f32.mrb[50].mxu0 }
0x2432   :  { %2838 = vtanh.f32 %v2005_v29  ;;  %v2002_v52 = vpop.f32.mrb[51].mxu0  ;;  %v2006_v54 = vmul.f32 0.5, %v2005_v29 }
0x2433   :  { %2840 = vtanh.f32 %v2028_v45  ;;  %v2029_v5 = vmul.f32 0.5, %v2028_v45 }
0x2434   :  { %2842 = vtanh.f32 %v2006_v54 }
0x2435   :  { %2844 = vtanh.f32 %v2029_v5 }
0x243c   :  { %v2839_v6 = vpop.eup %2838 }
0x243d   :  { %v2841_v53 = vpop.eup %2840  ;;  %2013 = vrot.lane.b32.xlu0 %v2839_v6, %s2907_s6 }
0x243e   :  { %2036 = vrot.lane.b32.xlu1 %v2841_v53, %s2907_s6  ;;  %v2843_v58 = vpop.eup %2842 }
0x243f   :  { %v2845_v55 = vpop.eup %2844  ;;  %v2008_v0 = vadd.f32 1.0, %v2843_v58 }
0x2440   :  { %v2031_v56 = vadd.f32 1.0, %v2845_v55 }
0x2441   :  { %v2009_v15 = vmul.f32 0.5, %v2008_v0 }
0x2442   :  { %v2032_v60 = vmul.f32 0.5, %v2031_v56 }
0x2443   :  { %v2011_v7 = vmul.f32 %v2009_v15, %v1920_v34 }
0x2444   :  { %v2034_v32 = vmul.f32 %v2032_v60, %v1943_v37 }
0x24af   :  { %v2014_v62 = vpop.permute.xlu0 %2013 }
0x24b0   :  { %v2016_v1 = vmul.f32 %v2014_v62, %v2009_v15  ;;  %v2037_v36 = vpop.permute.xlu1 %2036 }
0x24b1   :  { %v2039_v4 = vmul.f32 %v2037_v36, %v2032_v60 }
0x24b2   :  { %2018 = vrot.lane.b32.xlu0 %v2016_v1, %s2908_s29 }
0x24b3   :  { %2041 = vrot.lane.b32.xlu1 %v2039_v4, %s2908_s29 }
0x2524   :  { %v2019_v42 = vpop.permute.xlu0 %2018 }
0x2525   :  { %v2021_v48 = vadd.f32 %v2019_v42, %v2011_v7  ;;  %v2042_v8 = vpop.permute.xlu1 %2041 }
0x2526   :  { %v2044_v11 = vadd.f32 %v2042_v8, %v2034_v32 }
0x2527   :  { %2846 = vtanh.f32 %v2021_v48 }
0x2528   :  { %2848 = vtanh.f32 %v2044_v11 }
0x2531   :  { %v2847_v19 = vpop.eup %2846 }
0x2532   :  { %v2849_v46 = vpop.eup %2848  ;;  %2024 = vrot.lane.b32.xlu0 %v2847_v19, %s2907_s6 }
0x2533   :  { %2047 = vrot.lane.b32.xlu1 %v2849_v46, %s2907_s6 }
0x25a4   :  { %v2025_v38 = vpop.permute.xlu0 %2024 }
0x25a5   :  { %v2027_v21 = vmul.f32 %v2025_v38, %v2009_v15  ;;  %v2048_v26 = vpop.permute.xlu1 %2047 }
0x25a6   :  { %v2050_v23 = vmul.f32 %v2048_v26, %v2032_v60 }
0x25a7   :  { %2052 = vrot.lane.b32.xlu0 %v2027_v21, %s2908_s29 }
0x25a8   :  { %2056 = vrot.lane.b32.xlu1 %v2050_v23, %s2907_s6 }
0x2619   :  { %v2053_v20 = vpop.permute.xlu0 %2052 }
0x261a   :  { %v2057_v27 = vpop.permute.xlu1 %2056 }
0x261b   :  { %v2059_v33 = vsel %vm840_vm7, %v2053_v20, %v2057_v27 }
0x261c   :  { %v2060_v9 = vpack.c.bf16 %v2059_v33, %v2059_v33 }
0x261e   :  { %2498 = vmatmul.mubr.msk.bf16.vlgmr.msra.gmra.mrb[48].mxu1 %vm768_vm8, %v2060_v9 }
0x261f   :  { %2267 = vmatpush1.bf16.msra.mxu1 %v3412_v12  ;;  %2298 = vmatprep.mubr.bf16.mxu1 %v2905_v61 }
0x2620   :  { %2268 = vmatprep.subr.bf16.mxu1 %v3419_v13 }
0x2623   :  { %2269 = vmatpush1.bf16.msra.mxu1 %v3425_v14 }
0x2624   :  { %2270 = vmatprep.subr.bf16.mxu1 %v3431_v3 }
0x2627   :  { %2271 = vmatpush1.bf16.msra.mxu1 %v3437_v17 }
0x2628   :  { %2272 = vmatprep.subr.bf16.mxu1 %v3464_v24 }
0x262b   :  { %2273 = vmatpush1.bf16.msra.mxu1 %v3470_v57 }
0x26f1   :  { %v2098_v10 = vpop.f32.mrb[48].mxu1 }
0x26f2   :  { %v2106_v49 = vadd.f32 %v2098_v10, %v3287_v44  ;;  %v2100_v31 = vpop.f32.mrb[49].mxu1 }
0x26f3   :  { %v2129_v34 = vadd.f32 %v3541_v25, %v2100_v31  ;;  %v2102_v22 = vpop.f32.mrb[50].mxu1 }
0x26f4   :  { %2850 = vtanh.f32 %v2106_v49  ;;  %v2103_v37 = vpop.f32.mrb[51].mxu1  ;;  %v2107_v16 = vmul.f32 0.5, %v2106_v49 }
0x26f5   :  { %2852 = vtanh.f32 %v2129_v34  ;;  %v2130_v40 = vmul.f32 0.5, %v2129_v34 }
0x26f6   :  { %2854 = vtanh.f32 %v2107_v16 }
0x26f7   :  { %2856 = vtanh.f32 %v2130_v40 }
0x26fe   :  { %v2851_v59 = vpop.eup %2850 }
0x26ff   :  { %v2853_v2 = vpop.eup %2852  ;;  %2114 = vrot.lane.b32.xlu0 %v2851_v59, %s2907_s6 }
0x2700   :  { %2137 = vrot.lane.b32.xlu1 %v2853_v2, %s2907_s6  ;;  %v2855_v18 = vpop.eup %2854 }
0x2701   :  { %v2857_v35 = vpop.eup %2856  ;;  %v2109_v44 = vadd.f32 1.0, %v2855_v18 }
0x2702   :  { %v2132_v39 = vadd.f32 1.0, %v2857_v35 }
0x2703   :  { %v2110_v43 = vmul.f32 0.5, %v2109_v44 }
0x2704   :  { %v2133_v28 = vmul.f32 0.5, %v2132_v39 }
0x2705   :  { %v2112_v45 = vmul.f32 %v2110_v43, %v2021_v48 }
0x2706   :  { %v2135_v52 = vmul.f32 %v2133_v28, %v2044_v11 }
0x2771   :  { %v2115_v50 = vpop.permute.xlu0 %2114 }
0x2772   :  { %v2117_v51 = vmul.f32 %v2115_v50, %v2110_v43  ;;  %v2138_v29 = vpop.permute.xlu1 %2137 }
0x2773   :  { %v2140_v41 = vmul.f32 %v2138_v29, %v2133_v28 }
0x2774   :  { %2119 = vrot.lane.b32.xlu0 %v2117_v51, %s2908_s29 }
0x2775   :  { %2142 = vrot.lane.b32.xlu1 %v2140_v41, %s2908_s29 }
0x27e6   :  { %v2120_v47 = vpop.permute.xlu0 %2119 }
0x27e7   :  { %v2122_v6 = vadd.f32 %v2120_v47, %v2112_v45  ;;  %v2143_v53 = vpop.permute.xlu1 %2142 }
0x27e8   :  { %v2145_v54 = vadd.f32 %v2143_v53, %v2135_v52 }
0x27e9   :  { %2858 = vtanh.f32 %v2122_v6 }
0x27ea   :  { %2860 = vtanh.f32 %v2145_v54 }
0x27f3   :  { %v2859_v5 = vpop.eup %2858 }
0x27f4   :  { %v2861_v58 = vpop.eup %2860  ;;  %2125 = vrot.lane.b32.xlu0 %v2859_v5, %s2907_s6 }
0x27f5   :  { %2148 = vrot.lane.b32.xlu1 %v2861_v58, %s2907_s6 }
0x2866   :  { %v2126_v55 = vpop.permute.xlu0 %2125 }
0x2867   :  { %v2128_v0 = vmul.f32 %v2126_v55, %v2110_v43  ;;  %v2149_v56 = vpop.permute.xlu1 %2148 }
0x2868   :  { %v2151_v15 = vmul.f32 %v2149_v56, %v2133_v28 }
0x2869   :  { %2153 = vrot.lane.b32.xlu0 %v2128_v0, %s2908_s29 }
0x286a   :  { %2157 = vrot.lane.b32.xlu1 %v2151_v15, %s2907_s6 }
0x28db   :  { %v2154_v62 = vpop.permute.xlu0 %2153 }
0x28dc   :  { %v2158_v60 = vpop.permute.xlu1 %2157 }
0x28dd   :  { %v2160_v1 = vsel %vm840_vm7, %v2154_v62, %v2158_v60 }
0x28de   :  { %v2161_v36 = vpack.c.bf16 %v2160_v1, %v2160_v1 }
0x28e0   :  { %2499 = vmatmul.mubr.msk.bf16.vlgmr.msra.gmra.mrb[52].mxu0 %vm768_vm8, %v2161_v36 }
0x28e1   :  { %2368 = vmatpush1.bf16.msra.mxu0 %v3412_v12  ;;  %2399 = vmatprep.mubr.bf16.mxu0 %v2905_v61 }
0x28e2   :  { %2369 = vmatprep.subr.bf16.mxu0 %v3419_v13 }
0x28e5   :  { %2370 = vmatpush1.bf16.msra.mxu0 %v3425_v14 }
0x28e6   :  { %2371 = vmatprep.subr.bf16.mxu0 %v3431_v3 }
0x28e9   :  { %2372 = vmatpush1.bf16.msra.mxu0 %v3437_v17 }
0x28ea   :  { %2373 = vmatprep.subr.bf16.mxu0 %v3464_v24 }
0x28ed   :  { %2374 = vmatpush1.bf16.msra.mxu0 %v3470_v57 }
0x29b3   :  { %v2199_v4 = vpop.f32.mrb[52].mxu0 }
0x29b4   :  { %v2207_v7 = vadd.f32 %v2199_v4, %v3281_v63  ;;  %v2201_v42 = vpop.f32.mrb[53].mxu0 }
0x29b5   :  { %v2230_v12 = vadd.f32 %v3541_v25, %v2201_v42  ;;  %v2203_v32 = vpop.f32.mrb[54].mxu0 }
0x29b6   :  { %2862 = vtanh.f32 %v2207_v7  ;;  %v2204_v61 = vpop.f32.mrb[55].mxu0  ;;  %v2208_v3 = vmul.f32 0.5, %v2207_v7 }
0x29b7   :  { %2864 = vtanh.f32 %v2230_v12  ;;  %v2231_v17 = vmul.f32 0.5, %v2230_v12 }
0x29b8   :  { %2866 = vtanh.f32 %v2208_v3 }
0x29b9   :  { %2868 = vtanh.f32 %v2231_v17 }
0x29c0   :  { %v2863_v13 = vpop.eup %2862 }
0x29c1   :  { %v2865_v14 = vpop.eup %2864  ;;  %2215 = vrot.lane.b32.xlu0 %v2863_v13, %s2907_s6 }
0x29c2   :  { %2238 = vrot.lane.b32.xlu1 %v2865_v14, %s2907_s6  ;;  %v2867_v24 = vpop.eup %2866 }
0x29c3   :  { %v2869_v57 = vpop.eup %2868  ;;  %v2210_v63 = vadd.f32 1.0, %v2867_v24 }
0x29c4   :  { %v2233_v48 = vadd.f32 1.0, %v2869_v57 }
0x29c5   :  { %v2211_v8 = vmul.f32 0.5, %v2210_v63 }
0x29c6   :  { %v2234_v19 = vmul.f32 0.5, %v2233_v48 }
0x29c7   :  { %v2213_v26 = vmul.f32 %v2211_v8, %v2122_v6 }
0x29c8   :  { %v2236_v20 = vmul.f32 %v2234_v19, %v2145_v54 }
0x2a33   :  { %v2216_v11 = vpop.permute.xlu0 %2215 }
0x2a34   :  { %v2218_v46 = vmul.f32 %v2216_v11, %v2211_v8  ;;  %v2239_v38 = vpop.permute.xlu1 %2238 }
0x2a35   :  { %v2241_v21 = vmul.f32 %v2239_v38, %v2234_v19 }
0x2a36   :  { %2220 = vrot.lane.b32.xlu0 %v2218_v46, %s2908_s29 }
0x2a37   :  { %2243 = vrot.lane.b32.xlu1 %v2241_v21, %s2908_s29 }
0x2aa8   :  { %v2221_v23 = vpop.permute.xlu0 %2220 }
0x2aa9   :  { %v2223_v27 = vadd.f32 %v2221_v23, %v2213_v26  ;;  %v2244_v33 = vpop.permute.xlu1 %2243 }
0x2aaa   :  { %v2246_v9 = vadd.f32 %v2244_v33, %v2236_v20 }
0x2aab   :  { %2870 = vtanh.f32 %v2223_v27 }
0x2aac   :  { %2872 = vtanh.f32 %v2246_v9 }
0x2ab5   :  { %v2871_v10 = vpop.eup %2870 }
0x2ab6   :  { %v2873_v49 = vpop.eup %2872  ;;  %2226 = vrot.lane.b32.xlu0 %v2871_v10, %s2907_s6 }
0x2ab7   :  { %2249 = vrot.lane.b32.xlu1 %v2873_v49, %s2907_s6 }
0x2b28   :  { %v2227_v31 = vpop.permute.xlu0 %2226 }
0x2b29   :  { %v2229_v34 = vmul.f32 %v2227_v31, %v2211_v8  ;;  %v2250_v22 = vpop.permute.xlu1 %2249 }
0x2b2a   :  { %v2252_v37 = vmul.f32 %v2250_v22, %v2234_v19 }
0x2b2b   :  { %2254 = vrot.lane.b32.xlu0 %v2229_v34, %s2908_s29 }
0x2b2c   :  { %2258 = vrot.lane.b32.xlu1 %v2252_v37, %s2907_s6 }
0x2b9d   :  { %v2255_v59 = vpop.permute.xlu0 %2254 }
0x2b9e   :  { %v2259_v2 = vpop.permute.xlu1 %2258 }
0x2b9f   :  { %v2261_v16 = vsel %vm840_vm7, %v2255_v59, %v2259_v2 }
0x2ba0   :  { %v2262_v40 = vpack.c.bf16 %v2261_v16, %v2261_v16 }
0x2ba2   :  { %2500 = vmatmul.mubr.msk.bf16.vlgmr.msra.gmra.mrb[52].mxu1 %vm768_vm8, %v2262_v40 }
0x2c75   :  { %v2300_v18 = vpop.f32.mrb[52].mxu1 }
0x2c76   :  { %v2308_v35 = vadd.f32 %v2300_v18, %v3285_v30  ;;  %v2302_v44 = vpop.f32.mrb[53].mxu1 }
0x2c77   :  { %v2331_v39 = vadd.f32 %v3541_v25, %v2302_v44  ;;  %v2304_v43 = vpop.f32.mrb[54].mxu1 }
0x2c78   :  { %2874 = vtanh.f32 %v2308_v35  ;;  %v2305_v50 = vpop.f32.mrb[55].mxu1  ;;  %v2309_v29 = vmul.f32 0.5, %v2308_v35 }
0x2c79   :  { %2876 = vtanh.f32 %v2331_v39  ;;  %v2332_v41 = vmul.f32 0.5, %v2331_v39 }
0x2c7a   :  { %2878 = vtanh.f32 %v2309_v29 }
0x2c7b   :  { %2880 = vtanh.f32 %v2332_v41 }
0x2c82   :  { %v2875_v28 = vpop.eup %2874 }
0x2c83   :  { %v2877_v51 = vpop.eup %2876  ;;  %2316 = vrot.lane.b32.xlu0 %v2875_v28, %s2907_s6 }
0x2c84   :  { %2339 = vrot.lane.b32.xlu1 %v2877_v51, %s2907_s6  ;;  %v2879_v45 = vpop.eup %2878 }
0x2c85   :  { %v2881_v47 = vpop.eup %2880  ;;  %v2311_v30 = vadd.f32 1.0, %v2879_v45 }
0x2c86   :  { %v2334_v52 = vadd.f32 1.0, %v2881_v47 }
0x2c87   :  { %v2312_v6 = vmul.f32 0.5, %v2311_v30 }
0x2c88   :  { %v2335_v54 = vmul.f32 0.5, %v2334_v52 }
0x2c89   :  { %v2314_v0 = vmul.f32 %v2312_v6, %v2223_v27 }
0x2c8a   :  { %v2337_v15 = vmul.f32 %v2335_v54, %v2246_v9 }
0x2cf5   :  { %v2317_v53 = vpop.permute.xlu0 %2316 }
0x2cf6   :  { %v2319_v5 = vmul.f32 %v2317_v53, %v2312_v6  ;;  %v2340_v58 = vpop.permute.xlu1 %2339 }
0x2cf7   :  { %v2342_v55 = vmul.f32 %v2340_v58, %v2335_v54 }
0x2cf8   :  { %2321 = vrot.lane.b32.xlu0 %v2319_v5, %s2908_s29 }
0x2cf9   :  { %2344 = vrot.lane.b32.xlu1 %v2342_v55, %s2908_s29 }
0x2d6a   :  { %v2322_v56 = vpop.permute.xlu0 %2321 }
0x2d6b   :  { %v2324_v62 = vadd.f32 %v2322_v56, %v2314_v0  ;;  %v2345_v60 = vpop.permute.xlu1 %2344 }
0x2d6c   :  { %v2347_v1 = vadd.f32 %v2345_v60, %v2337_v15 }
0x2d6d   :  { %2882 = vtanh.f32 %v2324_v62 }
0x2d6e   :  { %2884 = vtanh.f32 %v2347_v1 }
0x2d77   :  { %v2883_v36 = vpop.eup %2882 }
0x2d78   :  { %v2885_v4 = vpop.eup %2884  ;;  %2327 = vrot.lane.b32.xlu0 %v2883_v36, %s2907_s6 }
0x2d79   :  { %2350 = vrot.lane.b32.xlu1 %v2885_v4, %s2907_s6 }
0x2dea   :  { %v2328_v7 = vpop.permute.xlu0 %2327 }
0x2deb   :  { %v2330_v42 = vmul.f32 %v2328_v7, %v2312_v6  ;;  %v2351_v12 = vpop.permute.xlu1 %2350 }
0x2dec   :  { %v2353_v32 = vmul.f32 %v2351_v12, %v2335_v54 }
0x2ded   :  { %2355 = vrot.lane.b32.xlu0 %v2330_v42, %s2908_s29 }
0x2dee   :  { %2359 = vrot.lane.b32.xlu1 %v2353_v32, %s2907_s6 }
0x2e5f   :  { %v2356_v61 = vpop.permute.xlu0 %2355 }
0x2e60   :  { %v2360_v13 = vpop.permute.xlu1 %2359 }
0x2e61   :  { %v2362_v14 = vsel %vm840_vm7, %v2356_v61, %v2360_v13 }
0x2e62   :  { %v2363_v3 = vpack.c.bf16 %v2362_v14, %v2362_v14 }
0x2e64   :  { %2501 = vmatmul.mubr.msk.bf16.vlgmr.msra.gmra.mrb[56].mxu0 %vm768_vm8, %v2363_v3 }
0x2f37   :  { %v2401_v17 = vpop.f32.mrb[56].mxu0 }
0x2f38   :  { %v2402_v24 = vpop.f32.mrb[57].mxu0 }
0x2f39   :  { %v2407_v57 = vadd.f32 %v3541_v25, %v2402_v24  ;;  %v2404_v63 = vpop.f32.mrb[58].mxu0 }
0x2f3a   :  { %v2405_v48 = vpop.f32.mrb[59].mxu0 }
0x2f3b   :  { %2886 = vtanh.f32 %v2407_v57  ;;  %v2408_v11 = vmul.f32 0.5, %v2407_v57 }
0x2f3d   :  { %2888 = vtanh.f32 %v2408_v11 }
0x2f45   :  { %v2887_v8 = vpop.eup %2886 }
0x2f46   :  { %2415 = vrot.lane.b32.xlu0 %v2887_v8, %s2907_s6 }
0x2f47   :  { %v2889_v19 = vpop.eup %2888 }
0x2f48   :  { %v2410_v46 = vadd.f32 1.0, %v2889_v19 }
0x2f4a   :  { %v2411_v38 = vmul.f32 0.5, %v2410_v46 }
0x2f4c   :  { %v2413_v23 = vmul.f32 %v2411_v38, %v2347_v1 }
0x2fb8   :  { %v2416_v21 = vpop.permute.xlu0 %2415 }
0x2fb9   :  { %v2418_v26 = vmul.f32 %v2416_v21, %v2411_v38 }
0x2fbb   :  { %2420 = vrot.lane.b32.xlu1 %v2418_v26, %s2908_s29 }
0x302d   :  { %v2421_v20 = vpop.permute.xlu1 %2420 }
0x302e   :  { %v2423_v27 = vadd.f32 %v2421_v20, %v2413_v23 }
0x3030   :  { %2890 = vtanh.f32 %v2423_v27 }
0x303a   :  { %v2891_v25 = vpop.eup %2890 }
0x303b   :  { %2426 = vrot.lane.b32.xlu0 %v2891_v25, %s2907_s6 }
0x30ad   :  { %v2427_v33 = vpop.permute.xlu0 %2426 }
0x30ae   :  { %v2429_v9 = vmul.f32 %v2427_v33, %v2411_v38 }
0x30b0   :  { %2431 = vrot.lane.b32.xlu1 %v2429_v9, %s2908_s29 }
0x3122   :  { %v2432_v10 = vpop.permute.xlu1 %2431 }
0x3123   :  { %2434 = vst.msk [vmem:[%s3666_s9] sm:$0xff] %vm840_vm7, %v2432_v10 }

</bundles_post_ra>
